<compile_context>
chip_gen: v6e
topology: v6e:2x2x1
jax: 0.10.0
libtpu: 0.0.40
codegen_flags: <defaults>
</compile_context>

<pallas_src>
import jax
import jax.numpy as jnp
from jax.experimental import pallas as pl
from jax.experimental.pallas import tpu as pltpu

BN_EPS = 1e-5


# ----------------------------------------------------------------------------
# Fused RSU4F kernel (8 x [dilated 3x3 conv + BatchNorm + ReLU] + residual)
# ----------------------------------------------------------------------------
def _make_rsu4f_kernel(layer_cfgs, red_couts, scratch_wcs, n_batch, height, width):
    """layer_cfgs: tuple of (dilation, cout) per layer, in forward order."""
    n_layers = len(layer_cfgs)
    N, H, W = n_batch, height, width
    inv_count = 1.0 / float(N * H * W)

    def kernel(*refs):
        pos = 0
        x_ref = refs[pos]; pos += 1
        lrefs = []
        for _ in range(n_layers):
            lrefs.append(refs[pos:pos + 3])            # (A, gamma, beta)
            pos += 3
        red = {}
        for c in red_couts:
            red[c] = (refs[pos], refs[pos + 1])        # (reduce, broadcast)
            pos += 2
        o_ref = refs[pos]; pos += 1
        acc_refs = {}
        for wc in scratch_wcs:
            acc_refs[wc] = refs[pos]; pos += 1

        def conv_bn_relu(x_bf16, li):
            """x_bf16: (N*H, W*Cin_total) bf16 lane-packed activation."""
            d, cout = layer_cfgs[li]
            a_ref, g_ref, be_ref = lrefs[li]
            wc = W * cout
            acc_ref = acc_refs[wc]

            # Dilated 3x3 conv: 3 banded GEMMs (kx taps + W zero-padding live
            # inside the weights), M = N*H rows per dot.  H zero-padding is
            # implicit: shifted-row accumulation into the f32 scratch.
            acc_ref[...] = jnp.dot(x_bf16, a_ref[1],
                                   preferred_element_type=jnp.float32)
            y_up = jnp.dot(x_bf16, a_ref[0],           # contributes to row h+d
                           preferred_element_type=jnp.float32)
            y_dn = jnp.dot(x_bf16, a_ref[2],           # contributes to row h-d
                           preferred_element_type=jnp.float32)
            for n in range(N):                         # static per-image ranges
                r0 = n * H
                acc_ref[r0 + d:r0 + H, :] += y_up[r0:r0 + H - d, :]
                acc_ref[r0:r0 + H - d, :] += y_dn[r0 + d:r0 + H, :]

            pre = acc_ref[...]                         # (N*H, wc) f32

            # BatchNorm (batch statistics, single pass, biased variance).
            # Conv bias is omitted: it is cancelled by the mean subtraction.
            s_lane = jnp.sum(pre, axis=0, keepdims=True)          # (1, wc)
            q_lane = jnp.sum(pre * pre, axis=0, keepdims=True)    # (1, wc)
            r_mat, b_mat = red[cout]
            mean_c = jnp.dot(s_lane, r_mat[...],
                             preferred_element_type=jnp.float32) * inv_count
            ex2_c = jnp.dot(q_lane, r_mat[...],
                            preferred_element_type=jnp.float32) * inv_count
            var_c = ex2_c - mean_c * mean_c            # biased, as PyTorch BN fwd
            scale_c = g_ref[...] * jax.lax.rsqrt(var_c + BN_EPS)
            shift_c = be_ref[...] - mean_c * scale_c
            scale_l = jnp.dot(scale_c, b_mat[...],
                              preferred_element_type=jnp.float32)  # (1, wc)
            shift_l = jnp.dot(shift_c, b_mat[...],
                              preferred_element_type=jnp.float32)
            return jnp.maximum(pre * scale_l + shift_l, 0.0)       # f32

        x0 = x_ref[...]                                            # bf16
        hxin = conv_bn_relu(x0, 0).astype(jnp.bfloat16)
        hx1 = conv_bn_relu(hxin, 1).astype(jnp.bfloat16)
        hx2 = conv_bn_relu(hx1, 2).astype(jnp.bfloat16)
        hx3 = conv_bn_relu(hx2, 3).astype(jnp.bfloat16)
        hx4 = conv_bn_relu(hx3, 4).astype(jnp.bfloat16)
        # decoder: torch.cat fused as a lane concat + K-concatenated weights
        hx3d = conv_bn_relu(jnp.concatenate([hx4, hx3], axis=-1),
                            5).astype(jnp.bfloat16)
        hx2d = conv_bn_relu(jnp.concatenate([hx3d, hx2], axis=-1),
                            6).astype(jnp.bfloat16)
        hx1d = conv_bn_relu(jnp.concatenate([hx2d, hx1], axis=-1), 7)
        o_ref[...] = (hx1d + hxin.astype(jnp.float32)).astype(o_ref.dtype)

    return kernel


# ----------------------------------------------------------------------------
# Wrapper: banded weights, BN reduce/broadcast matrices, one pallas_call
# ----------------------------------------------------------------------------
def _banded_weights(w, cins, width, dilation):
    """Fold kx taps and W zero-padding of a dilated 3x3 conv into one
    (W*sum(Cin), W*Cout) bf16 GEMM operand per ky.  Multi-source weights
    (fused torch.cat) are concatenated along K."""
    W, d = width, dilation
    cout = int(w.shape[-1])
    kx = jnp.arange(3)
    xi = jnp.arange(W)
    band = (xi[None, :, None] == xi[None, None, :] + (kx[:, None, None] - 1) * d)
    band = band.astype(w.dtype)                                   # (3, xin, xout)
    mats, c0 = [], 0
    for ci in cins:
        wi = w[:, :, c0:c0 + ci, :]                               # (3,3,ci,Cout)
        c0 += ci
        a = jnp.einsum("kio,jkcf->jicof", band, wi)               # (3,W,ci,W,Cout)
        mats.append(a.reshape(3, W * ci, W * cout))
    return jnp.concatenate(mats, axis=1).astype(jnp.bfloat16)


def _reduce_bcast(width, cout):
    """Lane->channel reduce (W*C, C) and channel->lane broadcast (C, W*C)."""
    eye = jnp.eye(cout, dtype=jnp.float32)
    return jnp.tile(eye, (width, 1)), jnp.tile(eye, (1, width))


def rsu4f_forward(x_nhwc, params):
    N, H, W, Cin = x_nhwc.shape
    assert H > 8, "demo kernel assumes H > max dilation (8)"
    R = N * H
    x2 = x_nhwc.reshape(R, W * Cin).astype(jnp.bfloat16)          # lane-packed

    out_ch = int(params["in"][0].shape[-1])
    mid_ch = int(params["1"][0].shape[-1])
    layer_defs = [
        ("in", 1, (Cin,)),
        ("1", 1, (out_ch,)),
        ("2", 2, (mid_ch,)),
        ("3", 4, (mid_ch,)),
        ("4", 8, (mid_ch,)),
        ("3d", 4, (mid_ch, mid_ch)),
        ("2d", 2, (mid_ch, mid_ch)),
        ("1d", 1, (mid_ch, mid_ch)),
    ]

    args = [x2]
    in_specs = [pl.BlockSpec((R, W * Cin), lambda i: (0, 0))]
    cfgs = []
    for name, d, cins in layer_defs:
        w, _bias, gamma, beta = params[name]   # conv bias cancelled by BN mean
        cout = int(w.shape[-1])
        K = W * sum(cins)
        wc = W * cout
        args += [
            _banded_weights(w, cins, W, d),
            gamma.reshape(1, cout).astype(jnp.float32),
            beta.reshape(1, cout).astype(jnp.float32),
        ]
        in_specs += [
            pl.BlockSpec((3, K, wc), lambda i: (0, 0, 0)),
            pl.BlockSpec((1, cout), lambda i: (0, 0)),
            pl.BlockSpec((1, cout), lambda i: (0, 0)),
        ]
        cfgs.append((d, cout))

    red_couts = tuple(sorted({c for _, c in cfgs}))
    for c in red_couts:
        r_mat, b_mat = _reduce_bcast(W, c)
        args += [r_mat, b_mat]
        in_specs += [
            pl.BlockSpec((W * c, c), lambda i: (0, 0)),
            pl.BlockSpec((c, W * c), lambda i: (0, 0)),
        ]

    scratch_wcs = tuple(sorted({W * c for _, c in cfgs}))
    out_wc = W * cfgs[-1][1]

    kernel = _make_rsu4f_kernel(tuple(cfgs), red_couts, scratch_wcs, N, H, W)

    out = pl.pallas_call(
        kernel,
        out_shape=jax.ShapeDtypeStruct((R, out_wc), jnp.float32),
        grid=(1,),
        in_specs=in_specs,
        out_specs=pl.BlockSpec((R, out_wc), lambda i: (0, 0)),
        scratch_shapes=[pltpu.VMEM((R, wc), jnp.float32) for wc in scratch_wcs],
        compiler_params=pltpu.CompilerParams(
            dimension_semantics=("arbitrary",)),
    )(*args)
    return out.reshape(N, H, W, out_wc // W)                      # (N,H,W,out_ch)


# ----------------------------------------------------------------------------
# Pure-JAX reference (bf16-matched, for the correctness check)
# ----------------------------------------------------------------------------
def _round_bf16(x):
    return x.astype(jnp.bfloat16).astype(jnp.float32)


def conv_bn_relu_ref(x, w, b, gamma, beta, dilation):
    y = jax.lax.conv_general_dilated(
        x.astype(jnp.bfloat16), w.astype(jnp.bfloat16),
        window_strides=(1, 1),
        padding=[(dilation, dilation), (dilation, dilation)],
        rhs_dilation=(dilation, dilation),
        dimension_numbers=("NHWC", "HWIO", "NHWC"),
        preferred_element_type=jnp.float32,
    ) + b
    mean = jnp.mean(y, axis=(0, 1, 2))
    var = jnp.mean((y - mean) ** 2, axis=(0, 1, 2))
    y = (y - mean) * (gamma / jnp.sqrt(var + BN_EPS)) + beta
    return jnp.maximum(y, 0.0)


def rsu4f_ref(x_nhwc, p):
    r = _round_bf16                     # mirror the kernel's bf16 storage
    hxin = r(conv_bn_relu_ref(x_nhwc, *p["in"], 1))
    hx1 = r(conv_bn_relu_ref(hxin, *p["1"], 1))
    hx2 = r(conv_bn_relu_ref(hx1, *p["2"], 2))
    hx3 = r(conv_bn_relu_ref(hx2, *p["3"], 4))
    hx4 = r(conv_bn_relu_ref(hx3, *p["4"], 8))
    hx3d = r(conv_bn_relu_ref(jnp.concatenate([hx4, hx3], -1), *p["3d"], 4))
    hx2d = r(conv_bn_relu_ref(jnp.concatenate([hx3d, hx2], -1), *p["2d"], 2))
    hx1d = conv_bn_relu_ref(jnp.concatenate([hx2d, hx1], -1), *p["1d"], 1)
    return hx1d + hxin


# ----------------------------------------------------------------------------
# Deterministic parameter init (shapes match the nn.Module __init__)
# ----------------------------------------------------------------------------
def init_conv_params(key, cin, cout):
    k_w, k_b, k_g, k_be = jax.random.split(key, 4)
    fan_in = 3 * 3 * cin
    w = jax.random.normal(k_w, (3, 3, cin, cout), jnp.float32) / jnp.sqrt(fan_in)
    b = jax.random.normal(k_b, (cout,), jnp.float32) * 0.05
    gamma = 1.0 + 0.2 * jax.random.normal(k_g, (cout,), jnp.float32)
    beta = 0.1 * jax.random.normal(k_be, (cout,), jnp.float32)
    return (w, b, gamma, beta)


def init_rsu4f_params(key, in_ch, mid_ch, out_ch):
    names_shapes = [
        ("in", in_ch, out_ch), ("1", out_ch, mid_ch), ("2", mid_ch, mid_ch),
        ("3", mid_ch, mid_ch), ("4", mid_ch, mid_ch), ("3d", 2 * mid_ch, mid_ch),
        ("2d", 2 * mid_ch, mid_ch), ("1d", 2 * mid_ch, out_ch),
    ]
    keys = jax.random.split(key, len(names_shapes))
    return {name: init_conv_params(k, ci, co)
            for k, (name, ci, co) in zip(keys, names_shapes)}


if __name__ == "__main__":
    # RSU4F(in_channels=4, mid_ch=8, out_ch=4), input (2, 4, 16, 16) NCHW
    N, C_IN, H, W = 2, 4, 16, 16
    MID, OUT = 8, 4

    root = jax.random.PRNGKey(0)
    k_x, k_p = jax.random.split(root)

    x_nchw = jax.random.normal(k_x, (N, C_IN, H, W), jnp.float32)
    x_nhwc = jnp.transpose(x_nchw, (0, 2, 3, 1))   # boundary layout conversion

    params = init_rsu4f_params(k_p, C_IN, MID, OUT)

    fwd = jax.jit(rsu4f_forward)
    out = jax.block_until_ready(fwd(x_nhwc, params))

    ref = jax.block_until_ready(rsu4f_ref(x_nhwc, params))
    assert out.shape == ref.shape == (N, H, W, OUT)
    # bf16 activation/weight storage -> a few bf16 ulps accumulated over
    # 8 layers against the bf16-matched f32 reference.
    max_err = float(jnp.max(jnp.abs(out - ref)))
    assert jnp.allclose(out, ref, atol=2e-2, rtol=2e-2), max_err

    print("KERNEL_OK")
</pallas_src>

<mosaic_0001>
module attributes {stable_mosaic.version = 11 : i64} {
  func.func @kernel(%arg0: i32, %arg1: memref<32x64xbf16, #tpu.memory_space<vmem>>, %arg2: memref<3x64x64xbf16, #tpu.memory_space<vmem>>, %arg3: memref<1x4xf32, #tpu.memory_space<vmem>>, %arg4: memref<1x4xf32, #tpu.memory_space<vmem>>, %arg5: memref<3x64x128xbf16, #tpu.memory_space<vmem>>, %arg6: memref<1x8xf32, #tpu.memory_space<vmem>>, %arg7: memref<1x8xf32, #tpu.memory_space<vmem>>, %arg8: memref<3x128x128xbf16, #tpu.memory_space<vmem>>, %arg9: memref<1x8xf32, #tpu.memory_space<vmem>>, %arg10: memref<1x8xf32, #tpu.memory_space<vmem>>, %arg11: memref<3x128x128xbf16, #tpu.memory_space<vmem>>, %arg12: memref<1x8xf32, #tpu.memory_space<vmem>>, %arg13: memref<1x8xf32, #tpu.memory_space<vmem>>, %arg14: memref<3x128x128xbf16, #tpu.memory_space<vmem>>, %arg15: memref<1x8xf32, #tpu.memory_space<vmem>>, %arg16: memref<1x8xf32, #tpu.memory_space<vmem>>, %arg17: memref<3x256x128xbf16, #tpu.memory_space<vmem>>, %arg18: memref<1x8xf32, #tpu.memory_space<vmem>>, %arg19: memref<1x8xf32, #tpu.memory_space<vmem>>, %arg20: memref<3x256x128xbf16, #tpu.memory_space<vmem>>, %arg21: memref<1x8xf32, #tpu.memory_space<vmem>>, %arg22: memref<1x8xf32, #tpu.memory_space<vmem>>, %arg23: memref<3x256x64xbf16, #tpu.memory_space<vmem>>, %arg24: memref<1x4xf32, #tpu.memory_space<vmem>>, %arg25: memref<1x4xf32, #tpu.memory_space<vmem>>, %arg26: memref<64x4xf32, #tpu.memory_space<vmem>>, %arg27: memref<4x64xf32, #tpu.memory_space<vmem>>, %arg28: memref<128x8xf32, #tpu.memory_space<vmem>>, %arg29: memref<8x128xf32, #tpu.memory_space<vmem>>, %arg30: memref<32x64xf32, #tpu.memory_space<vmem>>, %arg31: memref<32x64xf32, #tpu.memory_space<vmem>>, %arg32: memref<32x128xf32, #tpu.memory_space<vmem>>) attributes {dimension_semantics = [#tpu.dimension_semantics<arbitrary>], iteration_bounds = array<i64: 1>, scalar_prefetch = 0 : i64, scratch_operands = 2 : i64, tpu.core_type = #tpu.core_type<tc>, window_params = [{pipeline_mode = #tpu.pipeline_mode<synchronous>, transform_indices = @transform_0, window_bounds = array<i64: 32, 64>}, {pipeline_mode = #tpu.pipeline_mode<synchronous>, transform_indices = @transform_1, window_bounds = array<i64: 3, 64, 64>}, {pipeline_mode = #tpu.pipeline_mode<synchronous>, transform_indices = @transform_2, window_bounds = array<i64: 1, 4>}, {pipeline_mode = #tpu.pipeline_mode<synchronous>, transform_indices = @transform_3, window_bounds = array<i64: 1, 4>}, {pipeline_mode = #tpu.pipeline_mode<synchronous>, transform_indices = @transform_4, window_bounds = array<i64: 3, 64, 128>}, {pipeline_mode = #tpu.pipeline_mode<synchronous>, transform_indices = @transform_5, window_bounds = array<i64: 1, 8>}, {pipeline_mode = #tpu.pipeline_mode<synchronous>, transform_indices = @transform_6, window_bounds = array<i64: 1, 8>}, {pipeline_mode = #tpu.pipeline_mode<synchronous>, transform_indices = @transform_7, window_bounds = array<i64: 3, 128, 128>}, {pipeline_mode = #tpu.pipeline_mode<synchronous>, transform_indices = @transform_8, window_bounds = array<i64: 1, 8>}, {pipeline_mode = #tpu.pipeline_mode<synchronous>, transform_indices = @transform_9, window_bounds = array<i64: 1, 8>}, {pipeline_mode = #tpu.pipeline_mode<synchronous>, transform_indices = @transform_10, window_bounds = array<i64: 3, 128, 128>}, {pipeline_mode = #tpu.pipeline_mode<synchronous>, transform_indices = @transform_11, window_bounds = array<i64: 1, 8>}, {pipeline_mode = #tpu.pipeline_mode<synchronous>, transform_indices = @transform_12, window_bounds = array<i64: 1, 8>}, {pipeline_mode = #tpu.pipeline_mode<synchronous>, transform_indices = @transform_13, window_bounds = array<i64: 3, 128, 128>}, {pipeline_mode = #tpu.pipeline_mode<synchronous>, transform_indices = @transform_14, window_bounds = array<i64: 1, 8>}, {pipeline_mode = #tpu.pipeline_mode<synchronous>, transform_indices = @transform_15, window_bounds = array<i64: 1, 8>}, {pipeline_mode = #tpu.pipeline_mode<synchronous>, transform_indices = @transform_16, window_bounds = array<i64: 3, 256, 128>}, {pipeline_mode = #tpu.pipeline_mode<synchronous>, transform_indices = @transform_17, window_bounds = array<i64: 1, 8>}, {pipeline_mode = #tpu.pipeline_mode<synchronous>, transform_indices = @transform_18, window_bounds = array<i64: 1, 8>}, {pipeline_mode = #tpu.pipeline_mode<synchronous>, transform_indices = @transform_19, window_bounds = array<i64: 3, 256, 128>}, {pipeline_mode = #tpu.pipeline_mode<synchronous>, transform_indices = @transform_20, window_bounds = array<i64: 1, 8>}, {pipeline_mode = #tpu.pipeline_mode<synchronous>, transform_indices = @transform_21, window_bounds = array<i64: 1, 8>}, {pipeline_mode = #tpu.pipeline_mode<synchronous>, transform_indices = @transform_22, window_bounds = array<i64: 3, 256, 64>}, {pipeline_mode = #tpu.pipeline_mode<synchronous>, transform_indices = @transform_23, window_bounds = array<i64: 1, 4>}, {pipeline_mode = #tpu.pipeline_mode<synchronous>, transform_indices = @transform_24, window_bounds = array<i64: 1, 4>}, {pipeline_mode = #tpu.pipeline_mode<synchronous>, transform_indices = @transform_25, window_bounds = array<i64: 64, 4>}, {pipeline_mode = #tpu.pipeline_mode<synchronous>, transform_indices = @transform_26, window_bounds = array<i64: 4, 64>}, {pipeline_mode = #tpu.pipeline_mode<synchronous>, transform_indices = @transform_27, window_bounds = array<i64: 128, 8>}, {pipeline_mode = #tpu.pipeline_mode<synchronous>, transform_indices = @transform_28, window_bounds = array<i64: 8, 128>}, {pipeline_mode = #tpu.pipeline_mode<synchronous>, transform_indices = @transform_29, window_bounds = array<i64: 32, 64>}]} {
    %c0 = arith.constant 0 : index
    %c0_0 = arith.constant 0 : index
    %0 = vector.load %arg1[%c0, %c0_0] : memref<32x64xbf16, #tpu.memory_space<vmem>>, vector<32x64xbf16>
    %c1 = arith.constant 1 : index
    %c0_1 = arith.constant 0 : index
    %c0_2 = arith.constant 0 : index
    %1 = vector.load %arg2[%c1, %c0_1, %c0_2] : memref<3x64x64xbf16, #tpu.memory_space<vmem>>, vector<1x64x64xbf16>
    %2 = vector.shape_cast %1 : vector<1x64x64xbf16> to vector<64x64xbf16>
    %cst = arith.constant dense<0.000000e+00> : vector<32x64xf32>
    %3 = tpu.matmul %0, %2, %cst {dimension_numbers = #tpu.dot_dimension_numbers<[1], [0], [0], [1], [0, 0, 1, 1], [], []>} : vector<32x64xbf16>, vector<64x64xbf16>, vector<32x64xf32> -> vector<32x64xf32>
    %c0_3 = arith.constant 0 : index
    %c0_4 = arith.constant 0 : index
    %4 = vector.load %arg31[%c0_3, %c0_4] : memref<32x64xf32, #tpu.memory_space<vmem>>, vector<32x64xf32>
    tpu.vector_store %arg31[%c0_3, %c0_4], %3 {strides = array<i32>} : memref<32x64xf32, #tpu.memory_space<vmem>>, vector<32x64xf32>,
    %c0_5 = arith.constant 0 : index
    %c0_6 = arith.constant 0 : index
    %c0_7 = arith.constant 0 : index
    %5 = vector.load %arg2[%c0_5, %c0_6, %c0_7] : memref<3x64x64xbf16, #tpu.memory_space<vmem>>, vector<1x64x64xbf16>
    %6 = vector.shape_cast %5 : vector<1x64x64xbf16> to vector<64x64xbf16>
    %cst_8 = arith.constant dense<0.000000e+00> : vector<32x64xf32>
    %7 = tpu.matmul %0, %6, %cst_8 {dimension_numbers = #tpu.dot_dimension_numbers<[1], [0], [0], [1], [0, 0, 1, 1], [], []>} : vector<32x64xbf16>, vector<64x64xbf16>, vector<32x64xf32> -> vector<32x64xf32>
    %c2 = arith.constant 2 : index
    %c0_9 = arith.constant 0 : index
    %c0_10 = arith.constant 0 : index
    %8 = vector.load %arg2[%c2, %c0_9, %c0_10] : memref<3x64x64xbf16, #tpu.memory_space<vmem>>, vector<1x64x64xbf16>
    %9 = vector.shape_cast %8 : vector<1x64x64xbf16> to vector<64x64xbf16>
    %cst_11 = arith.constant dense<0.000000e+00> : vector<32x64xf32>
    %10 = tpu.matmul %0, %9, %cst_11 {dimension_numbers = #tpu.dot_dimension_numbers<[1], [0], [0], [1], [0, 0, 1, 1], [], []>} : vector<32x64xbf16>, vector<64x64xbf16>, vector<32x64xf32> -> vector<32x64xf32>
    %c1_12 = arith.constant 1 : index
    %c0_13 = arith.constant 0 : index
    %11 = vector.load %arg31[%c1_12, %c0_13] : memref<32x64xf32, #tpu.memory_space<vmem>>, vector<15x64xf32>
    %12 = vector.extract_strided_slice %7 {offsets = [0, 0], sizes = [15, 64], strides = [1, 1]} : vector<32x64xf32> to vector<15x64xf32>
    %13 = arith.addf %11, %12 : vector<15x64xf32>
    %c1_14 = arith.constant 1 : index
    %c0_15 = arith.constant 0 : index
    %14 = vector.load %arg31[%c1_14, %c0_15] : memref<32x64xf32, #tpu.memory_space<vmem>>, vector<15x64xf32>
    tpu.vector_store %arg31[%c1_14, %c0_15], %13 {strides = array<i32>} : memref<32x64xf32, #tpu.memory_space<vmem>>, vector<15x64xf32>,
    %c0_16 = arith.constant 0 : index
    %c0_17 = arith.constant 0 : index
    %15 = vector.load %arg31[%c0_16, %c0_17] : memref<32x64xf32, #tpu.memory_space<vmem>>, vector<15x64xf32>
    %16 = vector.extract_strided_slice %10 {offsets = [1, 0], sizes = [15, 64], strides = [1, 1]} : vector<32x64xf32> to vector<15x64xf32>
    %17 = arith.addf %15, %16 : vector<15x64xf32>
    %c0_18 = arith.constant 0 : index
    %c0_19 = arith.constant 0 : index
    %18 = vector.load %arg31[%c0_18, %c0_19] : memref<32x64xf32, #tpu.memory_space<vmem>>, vector<15x64xf32>
    tpu.vector_store %arg31[%c0_18, %c0_19], %17 {strides = array<i32>} : memref<32x64xf32, #tpu.memory_space<vmem>>, vector<15x64xf32>,
    %c17 = arith.constant 17 : index
    %c0_20 = arith.constant 0 : index
    %19 = vector.load %arg31[%c17, %c0_20] : memref<32x64xf32, #tpu.memory_space<vmem>>, vector<15x64xf32>
    %20 = vector.extract_strided_slice %7 {offsets = [16, 0], sizes = [15, 64], strides = [1, 1]} : vector<32x64xf32> to vector<15x64xf32>
    %21 = arith.addf %19, %20 : vector<15x64xf32>
    %c17_21 = arith.constant 17 : index
    %c0_22 = arith.constant 0 : index
    %22 = vector.load %arg31[%c17_21, %c0_22] : memref<32x64xf32, #tpu.memory_space<vmem>>, vector<15x64xf32>
    tpu.vector_store %arg31[%c17_21, %c0_22], %21 {strides = array<i32>} : memref<32x64xf32, #tpu.memory_space<vmem>>, vector<15x64xf32>,
    %c16 = arith.constant 16 : index
    %c0_23 = arith.constant 0 : index
    %23 = vector.load %arg31[%c16, %c0_23] : memref<32x64xf32, #tpu.memory_space<vmem>>, vector<15x64xf32>
    %24 = vector.extract_strided_slice %10 {offsets = [17, 0], sizes = [15, 64], strides = [1, 1]} : vector<32x64xf32> to vector<15x64xf32>
    %25 = arith.addf %23, %24 : vector<15x64xf32>
    %c16_24 = arith.constant 16 : index
    %c0_25 = arith.constant 0 : index
    %26 = vector.load %arg31[%c16_24, %c0_25] : memref<32x64xf32, #tpu.memory_space<vmem>>, vector<15x64xf32>
    tpu.vector_store %arg31[%c16_24, %c0_25], %25 {strides = array<i32>} : memref<32x64xf32, #tpu.memory_space<vmem>>, vector<15x64xf32>,
    %c0_26 = arith.constant 0 : index
    %c0_27 = arith.constant 0 : index
    %27 = vector.load %arg31[%c0_26, %c0_27] : memref<32x64xf32, #tpu.memory_space<vmem>>, vector<32x64xf32>
    %cst_28 = arith.constant dense<0.000000e+00> : vector<64xf32>
    %28 = vector.multi_reduction <add>, %27, %cst_28 [0] : vector<32x64xf32> to vector<64xf32>
    %29 = vector.shape_cast %28 : vector<64xf32> to vector<1x64xf32>
    %30 = arith.mulf %27, %27 : vector<32x64xf32>
    %cst_29 = arith.constant dense<0.000000e+00> : vector<64xf32>
    %31 = vector.multi_reduction <add>, %30, %cst_29 [0] : vector<32x64xf32> to vector<64xf32>
    %32 = vector.shape_cast %31 : vector<64xf32> to vector<1x64xf32>
    %c0_30 = arith.constant 0 : index
    %c0_31 = arith.constant 0 : index
    %33 = vector.load %arg26[%c0_30, %c0_31] : memref<64x4xf32, #tpu.memory_space<vmem>>, vector<64x4xf32>
    %cst_32 = arith.constant dense<0.000000e+00> : vector<1x4xf32>
    %34 = tpu.matmul %29, %33, %cst_32 {dimension_numbers = #tpu.dot_dimension_numbers<[1], [0], [0], [1], [0, 0, 1, 1], [], []>} : vector<1x64xf32>, vector<64x4xf32>, vector<1x4xf32> -> vector<1x4xf32>
    %cst_33 = arith.constant 0.001953125 : f32
    %35 = vector.broadcast %cst_33 : f32 to vector<1x4xf32>
    %36 = arith.mulf %34, %35 : vector<1x4xf32>
    %c0_34 = arith.constant 0 : index
    %c0_35 = arith.constant 0 : index
    %37 = vector.load %arg26[%c0_34, %c0_35] : memref<64x4xf32, #tpu.memory_space<vmem>>, vector<64x4xf32>
    %cst_36 = arith.constant dense<0.000000e+00> : vector<1x4xf32>
    %38 = tpu.matmul %32, %37, %cst_36 {dimension_numbers = #tpu.dot_dimension_numbers<[1], [0], [0], [1], [0, 0, 1, 1], [], []>} : vector<1x64xf32>, vector<64x4xf32>, vector<1x4xf32> -> vector<1x4xf32>
    %cst_37 = arith.constant 0.001953125 : f32
    %39 = vector.broadcast %cst_37 : f32 to vector<1x4xf32>
    %40 = arith.mulf %38, %39 : vector<1x4xf32>
    %41 = arith.mulf %36, %36 : vector<1x4xf32>
    %42 = arith.subf %40, %41 : vector<1x4xf32>
    %c0_38 = arith.constant 0 : index
    %c0_39 = arith.constant 0 : index
    %43 = vector.load %arg3[%c0_38, %c0_39] : memref<1x4xf32, #tpu.memory_space<vmem>>, vector<1x4xf32>
    %cst_40 = arith.constant 9.99999974E-6 : f32
    %44 = vector.broadcast %cst_40 : f32 to vector<1x4xf32>
    %45 = arith.addf %42, %44 : vector<1x4xf32>
    %46 = math.rsqrt %45 : vector<1x4xf32>
    %47 = arith.mulf %43, %46 : vector<1x4xf32>
    %c0_41 = arith.constant 0 : index
    %c0_42 = arith.constant 0 : index
    %48 = vector.load %arg4[%c0_41, %c0_42] : memref<1x4xf32, #tpu.memory_space<vmem>>, vector<1x4xf32>
    %49 = arith.mulf %36, %47 : vector<1x4xf32>
    %50 = arith.subf %48, %49 : vector<1x4xf32>
    %c0_43 = arith.constant 0 : index
    %c0_44 = arith.constant 0 : index
    %51 = vector.load %arg27[%c0_43, %c0_44] : memref<4x64xf32, #tpu.memory_space<vmem>>, vector<4x64xf32>
    %cst_45 = arith.constant dense<0.000000e+00> : vector<1x64xf32>
    %52 = tpu.matmul %47, %51, %cst_45 {dimension_numbers = #tpu.dot_dimension_numbers<[1], [0], [0], [1], [0, 0, 1, 1], [], []>} : vector<1x4xf32>, vector<4x64xf32>, vector<1x64xf32> -> vector<1x64xf32>
    %c0_46 = arith.constant 0 : index
    %c0_47 = arith.constant 0 : index
    %53 = vector.load %arg27[%c0_46, %c0_47] : memref<4x64xf32, #tpu.memory_space<vmem>>, vector<4x64xf32>
    %cst_48 = arith.constant dense<0.000000e+00> : vector<1x64xf32>
    %54 = tpu.matmul %50, %53, %cst_48 {dimension_numbers = #tpu.dot_dimension_numbers<[1], [0], [0], [1], [0, 0, 1, 1], [], []>} : vector<1x4xf32>, vector<4x64xf32>, vector<1x64xf32> -> vector<1x64xf32>
    %55 = vector.broadcast %52 : vector<1x64xf32> to vector<32x64xf32>
    %56 = arith.mulf %27, %55 : vector<32x64xf32>
    %57 = vector.broadcast %54 : vector<1x64xf32> to vector<32x64xf32>
    %58 = arith.addf %56, %57 : vector<32x64xf32>
    %cst_49 = arith.constant 0.000000e+00 : f32
    %59 = vector.broadcast %cst_49 : f32 to vector<32x64xf32>
    %60 = arith.maximumf %58, %59 : vector<32x64xf32>
    %61 = arith.truncf %60 : vector<32x64xf32> to vector<32x64xbf16>
    %c1_50 = arith.constant 1 : index
    %c0_51 = arith.constant 0 : index
    %c0_52 = arith.constant 0 : index
    %62 = vector.load %arg5[%c1_50, %c0_51, %c0_52] : memref<3x64x128xbf16, #tpu.memory_space<vmem>>, vector<1x64x128xbf16>
    %63 = vector.shape_cast %62 : vector<1x64x128xbf16> to vector<64x128xbf16>
    %cst_53 = arith.constant dense<0.000000e+00> : vector<32x128xf32>
    %64 = tpu.matmul %61, %63, %cst_53 {dimension_numbers = #tpu.dot_dimension_numbers<[1], [0], [0], [1], [0, 0, 1, 1], [], []>} : vector<32x64xbf16>, vector<64x128xbf16>, vector<32x128xf32> -> vector<32x128xf32>
    %c0_54 = arith.constant 0 : index
    %c0_55 = arith.constant 0 : index
    %65 = vector.load %arg32[%c0_54, %c0_55] : memref<32x128xf32, #tpu.memory_space<vmem>>, vector<32x128xf32>
    tpu.vector_store %arg32[%c0_54, %c0_55], %64 {strides = array<i32>} : memref<32x128xf32, #tpu.memory_space<vmem>>, vector<32x128xf32>,
    %c0_56 = arith.constant 0 : index
    %c0_57 = arith.constant 0 : index
    %c0_58 = arith.constant 0 : index
    %66 = vector.load %arg5[%c0_56, %c0_57, %c0_58] : memref<3x64x128xbf16, #tpu.memory_space<vmem>>, vector<1x64x128xbf16>
    %67 = vector.shape_cast %66 : vector<1x64x128xbf16> to vector<64x128xbf16>
    %cst_59 = arith.constant dense<0.000000e+00> : vector<32x128xf32>
    %68 = tpu.matmul %61, %67, %cst_59 {dimension_numbers = #tpu.dot_dimension_numbers<[1], [0], [0], [1], [0, 0, 1, 1], [], []>} : vector<32x64xbf16>, vector<64x128xbf16>, vector<32x128xf32> -> vector<32x128xf32>
    %c2_60 = arith.constant 2 : index
    %c0_61 = arith.constant 0 : index
    %c0_62 = arith.constant 0 : index
    %69 = vector.load %arg5[%c2_60, %c0_61, %c0_62] : memref<3x64x128xbf16, #tpu.memory_space<vmem>>, vector<1x64x128xbf16>
    %70 = vector.shape_cast %69 : vector<1x64x128xbf16> to vector<64x128xbf16>
    %cst_63 = arith.constant dense<0.000000e+00> : vector<32x128xf32>
    %71 = tpu.matmul %61, %70, %cst_63 {dimension_numbers = #tpu.dot_dimension_numbers<[1], [0], [0], [1], [0, 0, 1, 1], [], []>} : vector<32x64xbf16>, vector<64x128xbf16>, vector<32x128xf32> -> vector<32x128xf32>
    %c1_64 = arith.constant 1 : index
    %c0_65 = arith.constant 0 : index
    %72 = vector.load %arg32[%c1_64, %c0_65] : memref<32x128xf32, #tpu.memory_space<vmem>>, vector<15x128xf32>
    %73 = vector.extract_strided_slice %68 {offsets = [0, 0], sizes = [15, 128], strides = [1, 1]} : vector<32x128xf32> to vector<15x128xf32>
    %74 = arith.addf %72, %73 : vector<15x128xf32>
    %c1_66 = arith.constant 1 : index
    %c0_67 = arith.constant 0 : index
    %75 = vector.load %arg32[%c1_66, %c0_67] : memref<32x128xf32, #tpu.memory_space<vmem>>, vector<15x128xf32>
    tpu.vector_store %arg32[%c1_66, %c0_67], %74 {strides = array<i32>} : memref<32x128xf32, #tpu.memory_space<vmem>>, vector<15x128xf32>,
    %c0_68 = arith.constant 0 : index
    %c0_69 = arith.constant 0 : index
    %76 = vector.load %arg32[%c0_68, %c0_69] : memref<32x128xf32, #tpu.memory_space<vmem>>, vector<15x128xf32>
    %77 = vector.extract_strided_slice %71 {offsets = [1, 0], sizes = [15, 128], strides = [1, 1]} : vector<32x128xf32> to vector<15x128xf32>
    %78 = arith.addf %76, %77 : vector<15x128xf32>
    %c0_70 = arith.constant 0 : index
    %c0_71 = arith.constant 0 : index
    %79 = vector.load %arg32[%c0_70, %c0_71] : memref<32x128xf32, #tpu.memory_space<vmem>>, vector<15x128xf32>
    tpu.vector_store %arg32[%c0_70, %c0_71], %78 {strides = array<i32>} : memref<32x128xf32, #tpu.memory_space<vmem>>, vector<15x128xf32>,
    %c17_72 = arith.constant 17 : index
    %c0_73 = arith.constant 0 : index
    %80 = vector.load %arg32[%c17_72, %c0_73] : memref<32x128xf32, #tpu.memory_space<vmem>>, vector<15x128xf32>
    %81 = vector.extract_strided_slice %68 {offsets = [16, 0], sizes = [15, 128], strides = [1, 1]} : vector<32x128xf32> to vector<15x128xf32>
    %82 = arith.addf %80, %81 : vector<15x128xf32>
    %c17_74 = arith.constant 17 : index
    %c0_75 = arith.constant 0 : index
    %83 = vector.load %arg32[%c17_74, %c0_75] : memref<32x128xf32, #tpu.memory_space<vmem>>, vector<15x128xf32>
    tpu.vector_store %arg32[%c17_74, %c0_75], %82 {strides = array<i32>} : memref<32x128xf32, #tpu.memory_space<vmem>>, vector<15x128xf32>,
    %c16_76 = arith.constant 16 : index
    %c0_77 = arith.constant 0 : index
    %84 = vector.load %arg32[%c16_76, %c0_77] : memref<32x128xf32, #tpu.memory_space<vmem>>, vector<15x128xf32>
    %85 = vector.extract_strided_slice %71 {offsets = [17, 0], sizes = [15, 128], strides = [1, 1]} : vector<32x128xf32> to vector<15x128xf32>
    %86 = arith.addf %84, %85 : vector<15x128xf32>
    %c16_78 = arith.constant 16 : index
    %c0_79 = arith.constant 0 : index
    %87 = vector.load %arg32[%c16_78, %c0_79] : memref<32x128xf32, #tpu.memory_space<vmem>>, vector<15x128xf32>
    tpu.vector_store %arg32[%c16_78, %c0_79], %86 {strides = array<i32>} : memref<32x128xf32, #tpu.memory_space<vmem>>, vector<15x128xf32>,
    %c0_80 = arith.constant 0 : index
    %c0_81 = arith.constant 0 : index
    %88 = vector.load %arg32[%c0_80, %c0_81] : memref<32x128xf32, #tpu.memory_space<vmem>>, vector<32x128xf32>
    %cst_82 = arith.constant dense<0.000000e+00> : vector<128xf32>
    %89 = vector.multi_reduction <add>, %88, %cst_82 [0] : vector<32x128xf32> to vector<128xf32>
    %90 = vector.shape_cast %89 : vector<128xf32> to vector<1x128xf32>
    %91 = arith.mulf %88, %88 : vector<32x128xf32>
    %cst_83 = arith.constant dense<0.000000e+00> : vector<128xf32>
    %92 = vector.multi_reduction <add>, %91, %cst_83 [0] : vector<32x128xf32> to vector<128xf32>
    %93 = vector.shape_cast %92 : vector<128xf32> to vector<1x128xf32>
    %c0_84 = arith.constant 0 : index
    %c0_85 = arith.constant 0 : index
    %94 = vector.load %arg28[%c0_84, %c0_85] : memref<128x8xf32, #tpu.memory_space<vmem>>, vector<128x8xf32>
    %cst_86 = arith.constant dense<0.000000e+00> : vector<1x8xf32>
    %95 = tpu.matmul %90, %94, %cst_86 {dimension_numbers = #tpu.dot_dimension_numbers<[1], [0], [0], [1], [0, 0, 1, 1], [], []>} : vector<1x128xf32>, vector<128x8xf32>, vector<1x8xf32> -> vector<1x8xf32>
    %cst_87 = arith.constant 0.001953125 : f32
    %96 = vector.broadcast %cst_87 : f32 to vector<1x8xf32>
    %97 = arith.mulf %95, %96 : vector<1x8xf32>
    %c0_88 = arith.constant 0 : index
    %c0_89 = arith.constant 0 : index
    %98 = vector.load %arg28[%c0_88, %c0_89] : memref<128x8xf32, #tpu.memory_space<vmem>>, vector<128x8xf32>
    %cst_90 = arith.constant dense<0.000000e+00> : vector<1x8xf32>
    %99 = tpu.matmul %93, %98, %cst_90 {dimension_numbers = #tpu.dot_dimension_numbers<[1], [0], [0], [1], [0, 0, 1, 1], [], []>} : vector<1x128xf32>, vector<128x8xf32>, vector<1x8xf32> -> vector<1x8xf32>
    %cst_91 = arith.constant 0.001953125 : f32
    %100 = vector.broadcast %cst_91 : f32 to vector<1x8xf32>
    %101 = arith.mulf %99, %100 : vector<1x8xf32>
    %102 = arith.mulf %97, %97 : vector<1x8xf32>
    %103 = arith.subf %101, %102 : vector<1x8xf32>
    %c0_92 = arith.constant 0 : index
    %c0_93 = arith.constant 0 : index
    %104 = vector.load %arg6[%c0_92, %c0_93] : memref<1x8xf32, #tpu.memory_space<vmem>>, vector<1x8xf32>
    %cst_94 = arith.constant 9.99999974E-6 : f32
    %105 = vector.broadcast %cst_94 : f32 to vector<1x8xf32>
    %106 = arith.addf %103, %105 : vector<1x8xf32>
    %107 = math.rsqrt %106 : vector<1x8xf32>
    %108 = arith.mulf %104, %107 : vector<1x8xf32>
    %c0_95 = arith.constant 0 : index
    %c0_96 = arith.constant 0 : index
    %109 = vector.load %arg7[%c0_95, %c0_96] : memref<1x8xf32, #tpu.memory_space<vmem>>, vector<1x8xf32>
    %110 = arith.mulf %97, %108 : vector<1x8xf32>
    %111 = arith.subf %109, %110 : vector<1x8xf32>
    %c0_97 = arith.constant 0 : index
    %c0_98 = arith.constant 0 : index
    %112 = vector.load %arg29[%c0_97, %c0_98] : memref<8x128xf32, #tpu.memory_space<vmem>>, vector<8x128xf32>
    %cst_99 = arith.constant dense<0.000000e+00> : vector<1x128xf32>
    %113 = tpu.matmul %108, %112, %cst_99 {dimension_numbers = #tpu.dot_dimension_numbers<[1], [0], [0], [1], [0, 0, 1, 1], [], []>} : vector<1x8xf32>, vector<8x128xf32>, vector<1x128xf32> -> vector<1x128xf32>
    %c0_100 = arith.constant 0 : index
    %c0_101 = arith.constant 0 : index
    %114 = vector.load %arg29[%c0_100, %c0_101] : memref<8x128xf32, #tpu.memory_space<vmem>>, vector<8x128xf32>
    %cst_102 = arith.constant dense<0.000000e+00> : vector<1x128xf32>
    %115 = tpu.matmul %111, %114, %cst_102 {dimension_numbers = #tpu.dot_dimension_numbers<[1], [0], [0], [1], [0, 0, 1, 1], [], []>} : vector<1x8xf32>, vector<8x128xf32>, vector<1x128xf32> -> vector<1x128xf32>
    %116 = vector.broadcast %113 : vector<1x128xf32> to vector<32x128xf32>
    %117 = arith.mulf %88, %116 : vector<32x128xf32>
    %118 = vector.broadcast %115 : vector<1x128xf32> to vector<32x128xf32>
    %119 = arith.addf %117, %118 : vector<32x128xf32>
    %cst_103 = arith.constant 0.000000e+00 : f32
    %120 = vector.broadcast %cst_103 : f32 to vector<32x128xf32>
    %121 = arith.maximumf %119, %120 : vector<32x128xf32>
    %122 = arith.truncf %121 : vector<32x128xf32> to vector<32x128xbf16>
    %c1_104 = arith.constant 1 : index
    %c0_105 = arith.constant 0 : index
    %c0_106 = arith.constant 0 : index
    %123 = vector.load %arg8[%c1_104, %c0_105, %c0_106] : memref<3x128x128xbf16, #tpu.memory_space<vmem>>, vector<1x128x128xbf16>
    %124 = vector.shape_cast %123 : vector<1x128x128xbf16> to vector<128x128xbf16>
    %cst_107 = arith.constant dense<0.000000e+00> : vector<32x128xf32>
    %125 = tpu.matmul %122, %124, %cst_107 {dimension_numbers = #tpu.dot_dimension_numbers<[1], [0], [0], [1], [0, 0, 1, 1], [], []>} : vector<32x128xbf16>, vector<128x128xbf16>, vector<32x128xf32> -> vector<32x128xf32>
    %c0_108 = arith.constant 0 : index
    %c0_109 = arith.constant 0 : index
    %126 = vector.load %arg32[%c0_108, %c0_109] : memref<32x128xf32, #tpu.memory_space<vmem>>, vector<32x128xf32>
    tpu.vector_store %arg32[%c0_108, %c0_109], %125 {strides = array<i32>} : memref<32x128xf32, #tpu.memory_space<vmem>>, vector<32x128xf32>,
    %c0_110 = arith.constant 0 : index
    %c0_111 = arith.constant 0 : index
    %c0_112 = arith.constant 0 : index
    %127 = vector.load %arg8[%c0_110, %c0_111, %c0_112] : memref<3x128x128xbf16, #tpu.memory_space<vmem>>, vector<1x128x128xbf16>
    %128 = vector.shape_cast %127 : vector<1x128x128xbf16> to vector<128x128xbf16>
    %cst_113 = arith.constant dense<0.000000e+00> : vector<32x128xf32>
    %129 = tpu.matmul %122, %128, %cst_113 {dimension_numbers = #tpu.dot_dimension_numbers<[1], [0], [0], [1], [0, 0, 1, 1], [], []>} : vector<32x128xbf16>, vector<128x128xbf16>, vector<32x128xf32> -> vector<32x128xf32>
    %c2_114 = arith.constant 2 : index
    %c0_115 = arith.constant 0 : index
    %c0_116 = arith.constant 0 : index
    %130 = vector.load %arg8[%c2_114, %c0_115, %c0_116] : memref<3x128x128xbf16, #tpu.memory_space<vmem>>, vector<1x128x128xbf16>
    %131 = vector.shape_cast %130 : vector<1x128x128xbf16> to vector<128x128xbf16>
    %cst_117 = arith.constant dense<0.000000e+00> : vector<32x128xf32>
    %132 = tpu.matmul %122, %131, %cst_117 {dimension_numbers = #tpu.dot_dimension_numbers<[1], [0], [0], [1], [0, 0, 1, 1], [], []>} : vector<32x128xbf16>, vector<128x128xbf16>, vector<32x128xf32> -> vector<32x128xf32>
    %c2_118 = arith.constant 2 : index
    %c0_119 = arith.constant 0 : index
    %133 = vector.load %arg32[%c2_118, %c0_119] : memref<32x128xf32, #tpu.memory_space<vmem>>, vector<14x128xf32>
    %134 = vector.extract_strided_slice %129 {offsets = [0, 0], sizes = [14, 128], strides = [1, 1]} : vector<32x128xf32> to vector<14x128xf32>
    %135 = arith.addf %133, %134 : vector<14x128xf32>
    %c2_120 = arith.constant 2 : index
    %c0_121 = arith.constant 0 : index
    %136 = vector.load %arg32[%c2_120, %c0_121] : memref<32x128xf32, #tpu.memory_space<vmem>>, vector<14x128xf32>
    tpu.vector_store %arg32[%c2_120, %c0_121], %135 {strides = array<i32>} : memref<32x128xf32, #tpu.memory_space<vmem>>, vector<14x128xf32>,
    %c0_122 = arith.constant 0 : index
    %c0_123 = arith.constant 0 : index
    %137 = vector.load %arg32[%c0_122, %c0_123] : memref<32x128xf32, #tpu.memory_space<vmem>>, vector<14x128xf32>
    %138 = vector.extract_strided_slice %132 {offsets = [2, 0], sizes = [14, 128], strides = [1, 1]} : vector<32x128xf32> to vector<14x128xf32>
    %139 = arith.addf %137, %138 : vector<14x128xf32>
    %c0_124 = arith.constant 0 : index
    %c0_125 = arith.constant 0 : index
    %140 = vector.load %arg32[%c0_124, %c0_125] : memref<32x128xf32, #tpu.memory_space<vmem>>, vector<14x128xf32>
    tpu.vector_store %arg32[%c0_124, %c0_125], %139 {strides = array<i32>} : memref<32x128xf32, #tpu.memory_space<vmem>>, vector<14x128xf32>,
    %c18 = arith.constant 18 : index
    %c0_126 = arith.constant 0 : index
    %141 = vector.load %arg32[%c18, %c0_126] : memref<32x128xf32, #tpu.memory_space<vmem>>, vector<14x128xf32>
    %142 = vector.extract_strided_slice %129 {offsets = [16, 0], sizes = [14, 128], strides = [1, 1]} : vector<32x128xf32> to vector<14x128xf32>
    %143 = arith.addf %141, %142 : vector<14x128xf32>
    %c18_127 = arith.constant 18 : index
    %c0_128 = arith.constant 0 : index
    %144 = vector.load %arg32[%c18_127, %c0_128] : memref<32x128xf32, #tpu.memory_space<vmem>>, vector<14x128xf32>
    tpu.vector_store %arg32[%c18_127, %c0_128], %143 {strides = array<i32>} : memref<32x128xf32, #tpu.memory_space<vmem>>, vector<14x128xf32>,
    %c16_129 = arith.constant 16 : index
    %c0_130 = arith.constant 0 : index
    %145 = vector.load %arg32[%c16_129, %c0_130] : memref<32x128xf32, #tpu.memory_space<vmem>>, vector<14x128xf32>
    %146 = vector.extract_strided_slice %132 {offsets = [18, 0], sizes = [14, 128], strides = [1, 1]} : vector<32x128xf32> to vector<14x128xf32>
    %147 = arith.addf %145, %146 : vector<14x128xf32>
    %c16_131 = arith.constant 16 : index
    %c0_132 = arith.constant 0 : index
    %148 = vector.load %arg32[%c16_131, %c0_132] : memref<32x128xf32, #tpu.memory_space<vmem>>, vector<14x128xf32>
    tpu.vector_store %arg32[%c16_131, %c0_132], %147 {strides = array<i32>} : memref<32x128xf32, #tpu.memory_space<vmem>>, vector<14x128xf32>,
    %c0_133 = arith.constant 0 : index
    %c0_134 = arith.constant 0 : index
    %149 = vector.load %arg32[%c0_133, %c0_134] : memref<32x128xf32, #tpu.memory_space<vmem>>, vector<32x128xf32>
    %cst_135 = arith.constant dense<0.000000e+00> : vector<128xf32>
    %150 = vector.multi_reduction <add>, %149, %cst_135 [0] : vector<32x128xf32> to vector<128xf32>
    %151 = vector.shape_cast %150 : vector<128xf32> to vector<1x128xf32>
    %152 = arith.mulf %149, %149 : vector<32x128xf32>
    %cst_136 = arith.constant dense<0.000000e+00> : vector<128xf32>
    %153 = vector.multi_reduction <add>, %152, %cst_136 [0] : vector<32x128xf32> to vector<128xf32>
    %154 = vector.shape_cast %153 : vector<128xf32> to vector<1x128xf32>
    %c0_137 = arith.constant 0 : index
    %c0_138 = arith.constant 0 : index
    %155 = vector.load %arg28[%c0_137, %c0_138] : memref<128x8xf32, #tpu.memory_space<vmem>>, vector<128x8xf32>
    %cst_139 = arith.constant dense<0.000000e+00> : vector<1x8xf32>
    %156 = tpu.matmul %151, %155, %cst_139 {dimension_numbers = #tpu.dot_dimension_numbers<[1], [0], [0], [1], [0, 0, 1, 1], [], []>} : vector<1x128xf32>, vector<128x8xf32>, vector<1x8xf32> -> vector<1x8xf32>
    %cst_140 = arith.constant 0.001953125 : f32
    %157 = vector.broadcast %cst_140 : f32 to vector<1x8xf32>
    %158 = arith.mulf %156, %157 : vector<1x8xf32>
    %c0_141 = arith.constant 0 : index
    %c0_142 = arith.constant 0 : index
    %159 = vector.load %arg28[%c0_141, %c0_142] : memref<128x8xf32, #tpu.memory_space<vmem>>, vector<128x8xf32>
    %cst_143 = arith.constant dense<0.000000e+00> : vector<1x8xf32>
    %160 = tpu.matmul %154, %159, %cst_143 {dimension_numbers = #tpu.dot_dimension_numbers<[1], [0], [0], [1], [0, 0, 1, 1], [], []>} : vector<1x128xf32>, vector<128x8xf32>, vector<1x8xf32> -> vector<1x8xf32>
    %cst_144 = arith.constant 0.001953125 : f32
    %161 = vector.broadcast %cst_144 : f32 to vector<1x8xf32>
    %162 = arith.mulf %160, %161 : vector<1x8xf32>
    %163 = arith.mulf %158, %158 : vector<1x8xf32>
    %164 = arith.subf %162, %163 : vector<1x8xf32>
    %c0_145 = arith.constant 0 : index
    %c0_146 = arith.constant 0 : index
    %165 = vector.load %arg9[%c0_145, %c0_146] : memref<1x8xf32, #tpu.memory_space<vmem>>, vector<1x8xf32>
    %cst_147 = arith.constant 9.99999974E-6 : f32
    %166 = vector.broadcast %cst_147 : f32 to vector<1x8xf32>
    %167 = arith.addf %164, %166 : vector<1x8xf32>
    %168 = math.rsqrt %167 : vector<1x8xf32>
    %169 = arith.mulf %165, %168 : vector<1x8xf32>
    %c0_148 = arith.constant 0 : index
    %c0_149 = arith.constant 0 : index
    %170 = vector.load %arg10[%c0_148, %c0_149] : memref<1x8xf32, #tpu.memory_space<vmem>>, vector<1x8xf32>
    %171 = arith.mulf %158, %169 : vector<1x8xf32>
    %172 = arith.subf %170, %171 : vector<1x8xf32>
    %c0_150 = arith.constant 0 : index
    %c0_151 = arith.constant 0 : index
    %173 = vector.load %arg29[%c0_150, %c0_151] : memref<8x128xf32, #tpu.memory_space<vmem>>, vector<8x128xf32>
    %cst_152 = arith.constant dense<0.000000e+00> : vector<1x128xf32>
    %174 = tpu.matmul %169, %173, %cst_152 {dimension_numbers = #tpu.dot_dimension_numbers<[1], [0], [0], [1], [0, 0, 1, 1], [], []>} : vector<1x8xf32>, vector<8x128xf32>, vector<1x128xf32> -> vector<1x128xf32>
    %c0_153 = arith.constant 0 : index
    %c0_154 = arith.constant 0 : index
    %175 = vector.load %arg29[%c0_153, %c0_154] : memref<8x128xf32, #tpu.memory_space<vmem>>, vector<8x128xf32>
    %cst_155 = arith.constant dense<0.000000e+00> : vector<1x128xf32>
    %176 = tpu.matmul %172, %175, %cst_155 {dimension_numbers = #tpu.dot_dimension_numbers<[1], [0], [0], [1], [0, 0, 1, 1], [], []>} : vector<1x8xf32>, vector<8x128xf32>, vector<1x128xf32> -> vector<1x128xf32>
    %177 = vector.broadcast %174 : vector<1x128xf32> to vector<32x128xf32>
    %178 = arith.mulf %149, %177 : vector<32x128xf32>
    %179 = vector.broadcast %176 : vector<1x128xf32> to vector<32x128xf32>
    %180 = arith.addf %178, %179 : vector<32x128xf32>
    %cst_156 = arith.constant 0.000000e+00 : f32
    %181 = vector.broadcast %cst_156 : f32 to vector<32x128xf32>
    %182 = arith.maximumf %180, %181 : vector<32x128xf32>
    %183 = arith.truncf %182 : vector<32x128xf32> to vector<32x128xbf16>
    %c1_157 = arith.constant 1 : index
    %c0_158 = arith.constant 0 : index
    %c0_159 = arith.constant 0 : index
    %184 = vector.load %arg11[%c1_157, %c0_158, %c0_159] : memref<3x128x128xbf16, #tpu.memory_space<vmem>>, vector<1x128x128xbf16>
    %185 = vector.shape_cast %184 : vector<1x128x128xbf16> to vector<128x128xbf16>
    %cst_160 = arith.constant dense<0.000000e+00> : vector<32x128xf32>
    %186 = tpu.matmul %183, %185, %cst_160 {dimension_numbers = #tpu.dot_dimension_numbers<[1], [0], [0], [1], [0, 0, 1, 1], [], []>} : vector<32x128xbf16>, vector<128x128xbf16>, vector<32x128xf32> -> vector<32x128xf32>
    %c0_161 = arith.constant 0 : index
    %c0_162 = arith.constant 0 : index
    %187 = vector.load %arg32[%c0_161, %c0_162] : memref<32x128xf32, #tpu.memory_space<vmem>>, vector<32x128xf32>
    tpu.vector_store %arg32[%c0_161, %c0_162], %186 {strides = array<i32>} : memref<32x128xf32, #tpu.memory_space<vmem>>, vector<32x128xf32>,
    %c0_163 = arith.constant 0 : index
    %c0_164 = arith.constant 0 : index
    %c0_165 = arith.constant 0 : index
    %188 = vector.load %arg11[%c0_163, %c0_164, %c0_165] : memref<3x128x128xbf16, #tpu.memory_space<vmem>>, vector<1x128x128xbf16>
    %189 = vector.shape_cast %188 : vector<1x128x128xbf16> to vector<128x128xbf16>
    %cst_166 = arith.constant dense<0.000000e+00> : vector<32x128xf32>
    %190 = tpu.matmul %183, %189, %cst_166 {dimension_numbers = #tpu.dot_dimension_numbers<[1], [0], [0], [1], [0, 0, 1, 1], [], []>} : vector<32x128xbf16>, vector<128x128xbf16>, vector<32x128xf32> -> vector<32x128xf32>
    %c2_167 = arith.constant 2 : index
    %c0_168 = arith.constant 0 : index
    %c0_169 = arith.constant 0 : index
    %191 = vector.load %arg11[%c2_167, %c0_168, %c0_169] : memref<3x128x128xbf16, #tpu.memory_space<vmem>>, vector<1x128x128xbf16>
    %192 = vector.shape_cast %191 : vector<1x128x128xbf16> to vector<128x128xbf16>
    %cst_170 = arith.constant dense<0.000000e+00> : vector<32x128xf32>
    %193 = tpu.matmul %183, %192, %cst_170 {dimension_numbers = #tpu.dot_dimension_numbers<[1], [0], [0], [1], [0, 0, 1, 1], [], []>} : vector<32x128xbf16>, vector<128x128xbf16>, vector<32x128xf32> -> vector<32x128xf32>
    %c4 = arith.constant 4 : index
    %c0_171 = arith.constant 0 : index
    %194 = vector.load %arg32[%c4, %c0_171] : memref<32x128xf32, #tpu.memory_space<vmem>>, vector<12x128xf32>
    %195 = vector.extract_strided_slice %190 {offsets = [0, 0], sizes = [12, 128], strides = [1, 1]} : vector<32x128xf32> to vector<12x128xf32>
    %196 = arith.addf %194, %195 : vector<12x128xf32>
    %c4_172 = arith.constant 4 : index
    %c0_173 = arith.constant 0 : index
    %197 = vector.load %arg32[%c4_172, %c0_173] : memref<32x128xf32, #tpu.memory_space<vmem>>, vector<12x128xf32>
    tpu.vector_store %arg32[%c4_172, %c0_173], %196 {strides = array<i32>} : memref<32x128xf32, #tpu.memory_space<vmem>>, vector<12x128xf32>,
    %c0_174 = arith.constant 0 : index
    %c0_175 = arith.constant 0 : index
    %198 = vector.load %arg32[%c0_174, %c0_175] : memref<32x128xf32, #tpu.memory_space<vmem>>, vector<12x128xf32>
    %199 = vector.extract_strided_slice %193 {offsets = [4, 0], sizes = [12, 128], strides = [1, 1]} : vector<32x128xf32> to vector<12x128xf32>
    %200 = arith.addf %198, %199 : vector<12x128xf32>
    %c0_176 = arith.constant 0 : index
    %c0_177 = arith.constant 0 : index
    %201 = vector.load %arg32[%c0_176, %c0_177] : memref<32x128xf32, #tpu.memory_space<vmem>>, vector<12x128xf32>
    tpu.vector_store %arg32[%c0_176, %c0_177], %200 {strides = array<i32>} : memref<32x128xf32, #tpu.memory_space<vmem>>, vector<12x128xf32>,
    %c20 = arith.constant 20 : index
    %c0_178 = arith.constant 0 : index
    %202 = vector.load %arg32[%c20, %c0_178] : memref<32x128xf32, #tpu.memory_space<vmem>>, vector<12x128xf32>
    %203 = vector.extract_strided_slice %190 {offsets = [16, 0], sizes = [12, 128], strides = [1, 1]} : vector<32x128xf32> to vector<12x128xf32>
    %204 = arith.addf %202, %203 : vector<12x128xf32>
    %c20_179 = arith.constant 20 : index
    %c0_180 = arith.constant 0 : index
    %205 = vector.load %arg32[%c20_179, %c0_180] : memref<32x128xf32, #tpu.memory_space<vmem>>, vector<12x128xf32>
    tpu.vector_store %arg32[%c20_179, %c0_180], %204 {strides = array<i32>} : memref<32x128xf32, #tpu.memory_space<vmem>>, vector<12x128xf32>,
    %c16_181 = arith.constant 16 : index
    %c0_182 = arith.constant 0 : index
    %206 = vector.load %arg32[%c16_181, %c0_182] : memref<32x128xf32, #tpu.memory_space<vmem>>, vector<12x128xf32>
    %207 = vector.extract_strided_slice %193 {offsets = [20, 0], sizes = [12, 128], strides = [1, 1]} : vector<32x128xf32> to vector<12x128xf32>
    %208 = arith.addf %206, %207 : vector<12x128xf32>
    %c16_183 = arith.constant 16 : index
    %c0_184 = arith.constant 0 : index
    %209 = vector.load %arg32[%c16_183, %c0_184] : memref<32x128xf32, #tpu.memory_space<vmem>>, vector<12x128xf32>
    tpu.vector_store %arg32[%c16_183, %c0_184], %208 {strides = array<i32>} : memref<32x128xf32, #tpu.memory_space<vmem>>, vector<12x128xf32>,
    %c0_185 = arith.constant 0 : index
    %c0_186 = arith.constant 0 : index
    %210 = vector.load %arg32[%c0_185, %c0_186] : memref<32x128xf32, #tpu.memory_space<vmem>>, vector<32x128xf32>
    %cst_187 = arith.constant dense<0.000000e+00> : vector<128xf32>
    %211 = vector.multi_reduction <add>, %210, %cst_187 [0] : vector<32x128xf32> to vector<128xf32>
    %212 = vector.shape_cast %211 : vector<128xf32> to vector<1x128xf32>
    %213 = arith.mulf %210, %210 : vector<32x128xf32>
    %cst_188 = arith.constant dense<0.000000e+00> : vector<128xf32>
    %214 = vector.multi_reduction <add>, %213, %cst_188 [0] : vector<32x128xf32> to vector<128xf32>
    %215 = vector.shape_cast %214 : vector<128xf32> to vector<1x128xf32>
    %c0_189 = arith.constant 0 : index
    %c0_190 = arith.constant 0 : index
    %216 = vector.load %arg28[%c0_189, %c0_190] : memref<128x8xf32, #tpu.memory_space<vmem>>, vector<128x8xf32>
    %cst_191 = arith.constant dense<0.000000e+00> : vector<1x8xf32>
    %217 = tpu.matmul %212, %216, %cst_191 {dimension_numbers = #tpu.dot_dimension_numbers<[1], [0], [0], [1], [0, 0, 1, 1], [], []>} : vector<1x128xf32>, vector<128x8xf32>, vector<1x8xf32> -> vector<1x8xf32>
    %cst_192 = arith.constant 0.001953125 : f32
    %218 = vector.broadcast %cst_192 : f32 to vector<1x8xf32>
    %219 = arith.mulf %217, %218 : vector<1x8xf32>
    %c0_193 = arith.constant 0 : index
    %c0_194 = arith.constant 0 : index
    %220 = vector.load %arg28[%c0_193, %c0_194] : memref<128x8xf32, #tpu.memory_space<vmem>>, vector<128x8xf32>
    %cst_195 = arith.constant dense<0.000000e+00> : vector<1x8xf32>
    %221 = tpu.matmul %215, %220, %cst_195 {dimension_numbers = #tpu.dot_dimension_numbers<[1], [0], [0], [1], [0, 0, 1, 1], [], []>} : vector<1x128xf32>, vector<128x8xf32>, vector<1x8xf32> -> vector<1x8xf32>
    %cst_196 = arith.constant 0.001953125 : f32
    %222 = vector.broadcast %cst_196 : f32 to vector<1x8xf32>
    %223 = arith.mulf %221, %222 : vector<1x8xf32>
    %224 = arith.mulf %219, %219 : vector<1x8xf32>
    %225 = arith.subf %223, %224 : vector<1x8xf32>
    %c0_197 = arith.constant 0 : index
    %c0_198 = arith.constant 0 : index
    %226 = vector.load %arg12[%c0_197, %c0_198] : memref<1x8xf32, #tpu.memory_space<vmem>>, vector<1x8xf32>
    %cst_199 = arith.constant 9.99999974E-6 : f32
    %227 = vector.broadcast %cst_199 : f32 to vector<1x8xf32>
    %228 = arith.addf %225, %227 : vector<1x8xf32>
    %229 = math.rsqrt %228 : vector<1x8xf32>
    %230 = arith.mulf %226, %229 : vector<1x8xf32>
    %c0_200 = arith.constant 0 : index
    %c0_201 = arith.constant 0 : index
    %231 = vector.load %arg13[%c0_200, %c0_201] : memref<1x8xf32, #tpu.memory_space<vmem>>, vector<1x8xf32>
    %232 = arith.mulf %219, %230 : vector<1x8xf32>
    %233 = arith.subf %231, %232 : vector<1x8xf32>
    %c0_202 = arith.constant 0 : index
    %c0_203 = arith.constant 0 : index
    %234 = vector.load %arg29[%c0_202, %c0_203] : memref<8x128xf32, #tpu.memory_space<vmem>>, vector<8x128xf32>
    %cst_204 = arith.constant dense<0.000000e+00> : vector<1x128xf32>
    %235 = tpu.matmul %230, %234, %cst_204 {dimension_numbers = #tpu.dot_dimension_numbers<[1], [0], [0], [1], [0, 0, 1, 1], [], []>} : vector<1x8xf32>, vector<8x128xf32>, vector<1x128xf32> -> vector<1x128xf32>
    %c0_205 = arith.constant 0 : index
    %c0_206 = arith.constant 0 : index
    %236 = vector.load %arg29[%c0_205, %c0_206] : memref<8x128xf32, #tpu.memory_space<vmem>>, vector<8x128xf32>
    %cst_207 = arith.constant dense<0.000000e+00> : vector<1x128xf32>
    %237 = tpu.matmul %233, %236, %cst_207 {dimension_numbers = #tpu.dot_dimension_numbers<[1], [0], [0], [1], [0, 0, 1, 1], [], []>} : vector<1x8xf32>, vector<8x128xf32>, vector<1x128xf32> -> vector<1x128xf32>
    %238 = vector.broadcast %235 : vector<1x128xf32> to vector<32x128xf32>
    %239 = arith.mulf %210, %238 : vector<32x128xf32>
    %240 = vector.broadcast %237 : vector<1x128xf32> to vector<32x128xf32>
    %241 = arith.addf %239, %240 : vector<32x128xf32>
    %cst_208 = arith.constant 0.000000e+00 : f32
    %242 = vector.broadcast %cst_208 : f32 to vector<32x128xf32>
    %243 = arith.maximumf %241, %242 : vector<32x128xf32>
    %244 = arith.truncf %243 : vector<32x128xf32> to vector<32x128xbf16>
    %c1_209 = arith.constant 1 : index
    %c0_210 = arith.constant 0 : index
    %c0_211 = arith.constant 0 : index
    %245 = vector.load %arg14[%c1_209, %c0_210, %c0_211] : memref<3x128x128xbf16, #tpu.memory_space<vmem>>, vector<1x128x128xbf16>
    %246 = vector.shape_cast %245 : vector<1x128x128xbf16> to vector<128x128xbf16>
    %cst_212 = arith.constant dense<0.000000e+00> : vector<32x128xf32>
    %247 = tpu.matmul %244, %246, %cst_212 {dimension_numbers = #tpu.dot_dimension_numbers<[1], [0], [0], [1], [0, 0, 1, 1], [], []>} : vector<32x128xbf16>, vector<128x128xbf16>, vector<32x128xf32> -> vector<32x128xf32>
    %c0_213 = arith.constant 0 : index
    %c0_214 = arith.constant 0 : index
    %248 = vector.load %arg32[%c0_213, %c0_214] : memref<32x128xf32, #tpu.memory_space<vmem>>, vector<32x128xf32>
    tpu.vector_store %arg32[%c0_213, %c0_214], %247 {strides = array<i32>} : memref<32x128xf32, #tpu.memory_space<vmem>>, vector<32x128xf32>,
    %c0_215 = arith.constant 0 : index
    %c0_216 = arith.constant 0 : index
    %c0_217 = arith.constant 0 : index
    %249 = vector.load %arg14[%c0_215, %c0_216, %c0_217] : memref<3x128x128xbf16, #tpu.memory_space<vmem>>, vector<1x128x128xbf16>
    %250 = vector.shape_cast %249 : vector<1x128x128xbf16> to vector<128x128xbf16>
    %cst_218 = arith.constant dense<0.000000e+00> : vector<32x128xf32>
    %251 = tpu.matmul %244, %250, %cst_218 {dimension_numbers = #tpu.dot_dimension_numbers<[1], [0], [0], [1], [0, 0, 1, 1], [], []>} : vector<32x128xbf16>, vector<128x128xbf16>, vector<32x128xf32> -> vector<32x128xf32>
    %c2_219 = arith.constant 2 : index
    %c0_220 = arith.constant 0 : index
    %c0_221 = arith.constant 0 : index
    %252 = vector.load %arg14[%c2_219, %c0_220, %c0_221] : memref<3x128x128xbf16, #tpu.memory_space<vmem>>, vector<1x128x128xbf16>
    %253 = vector.shape_cast %252 : vector<1x128x128xbf16> to vector<128x128xbf16>
    %cst_222 = arith.constant dense<0.000000e+00> : vector<32x128xf32>
    %254 = tpu.matmul %244, %253, %cst_222 {dimension_numbers = #tpu.dot_dimension_numbers<[1], [0], [0], [1], [0, 0, 1, 1], [], []>} : vector<32x128xbf16>, vector<128x128xbf16>, vector<32x128xf32> -> vector<32x128xf32>
    %c8 = arith.constant 8 : index
    %c0_223 = arith.constant 0 : index
    %255 = vector.load %arg32[%c8, %c0_223] : memref<32x128xf32, #tpu.memory_space<vmem>>, vector<8x128xf32>
    %256 = vector.extract_strided_slice %251 {offsets = [0, 0], sizes = [8, 128], strides = [1, 1]} : vector<32x128xf32> to vector<8x128xf32>
    %257 = arith.addf %255, %256 : vector<8x128xf32>
    %c8_224 = arith.constant 8 : index
    %c0_225 = arith.constant 0 : index
    %258 = vector.load %arg32[%c8_224, %c0_225] : memref<32x128xf32, #tpu.memory_space<vmem>>, vector<8x128xf32>
    tpu.vector_store %arg32[%c8_224, %c0_225], %257 {strides = array<i32>} : memref<32x128xf32, #tpu.memory_space<vmem>>, vector<8x128xf32>,
    %c0_226 = arith.constant 0 : index
    %c0_227 = arith.constant 0 : index
    %259 = vector.load %arg32[%c0_226, %c0_227] : memref<32x128xf32, #tpu.memory_space<vmem>>, vector<8x128xf32>
    %260 = vector.extract_strided_slice %254 {offsets = [8, 0], sizes = [8, 128], strides = [1, 1]} : vector<32x128xf32> to vector<8x128xf32>
    %261 = arith.addf %259, %260 : vector<8x128xf32>
    %c0_228 = arith.constant 0 : index
    %c0_229 = arith.constant 0 : index
    %262 = vector.load %arg32[%c0_228, %c0_229] : memref<32x128xf32, #tpu.memory_space<vmem>>, vector<8x128xf32>
    tpu.vector_store %arg32[%c0_228, %c0_229], %261 {strides = array<i32>} : memref<32x128xf32, #tpu.memory_space<vmem>>, vector<8x128xf32>,
    %c24 = arith.constant 24 : index
    %c0_230 = arith.constant 0 : index
    %263 = vector.load %arg32[%c24, %c0_230] : memref<32x128xf32, #tpu.memory_space<vmem>>, vector<8x128xf32>
    %264 = vector.extract_strided_slice %251 {offsets = [16, 0], sizes = [8, 128], strides = [1, 1]} : vector<32x128xf32> to vector<8x128xf32>
    %265 = arith.addf %263, %264 : vector<8x128xf32>
    %c24_231 = arith.constant 24 : index
    %c0_232 = arith.constant 0 : index
    %266 = vector.load %arg32[%c24_231, %c0_232] : memref<32x128xf32, #tpu.memory_space<vmem>>, vector<8x128xf32>
    tpu.vector_store %arg32[%c24_231, %c0_232], %265 {strides = array<i32>} : memref<32x128xf32, #tpu.memory_space<vmem>>, vector<8x128xf32>,
    %c16_233 = arith.constant 16 : index
    %c0_234 = arith.constant 0 : index
    %267 = vector.load %arg32[%c16_233, %c0_234] : memref<32x128xf32, #tpu.memory_space<vmem>>, vector<8x128xf32>
    %268 = vector.extract_strided_slice %254 {offsets = [24, 0], sizes = [8, 128], strides = [1, 1]} : vector<32x128xf32> to vector<8x128xf32>
    %269 = arith.addf %267, %268 : vector<8x128xf32>
    %c16_235 = arith.constant 16 : index
    %c0_236 = arith.constant 0 : index
    %270 = vector.load %arg32[%c16_235, %c0_236] : memref<32x128xf32, #tpu.memory_space<vmem>>, vector<8x128xf32>
    tpu.vector_store %arg32[%c16_235, %c0_236], %269 {strides = array<i32>} : memref<32x128xf32, #tpu.memory_space<vmem>>, vector<8x128xf32>,
    %c0_237 = arith.constant 0 : index
    %c0_238 = arith.constant 0 : index
    %271 = vector.load %arg32[%c0_237, %c0_238] : memref<32x128xf32, #tpu.memory_space<vmem>>, vector<32x128xf32>
    %cst_239 = arith.constant dense<0.000000e+00> : vector<128xf32>
    %272 = vector.multi_reduction <add>, %271, %cst_239 [0] : vector<32x128xf32> to vector<128xf32>
    %273 = vector.shape_cast %272 : vector<128xf32> to vector<1x128xf32>
    %274 = arith.mulf %271, %271 : vector<32x128xf32>
    %cst_240 = arith.constant dense<0.000000e+00> : vector<128xf32>
    %275 = vector.multi_reduction <add>, %274, %cst_240 [0] : vector<32x128xf32> to vector<128xf32>
    %276 = vector.shape_cast %275 : vector<128xf32> to vector<1x128xf32>
    %c0_241 = arith.constant 0 : index
    %c0_242 = arith.constant 0 : index
    %277 = vector.load %arg28[%c0_241, %c0_242] : memref<128x8xf32, #tpu.memory_space<vmem>>, vector<128x8xf32>
    %cst_243 = arith.constant dense<0.000000e+00> : vector<1x8xf32>
    %278 = tpu.matmul %273, %277, %cst_243 {dimension_numbers = #tpu.dot_dimension_numbers<[1], [0], [0], [1], [0, 0, 1, 1], [], []>} : vector<1x128xf32>, vector<128x8xf32>, vector<1x8xf32> -> vector<1x8xf32>
    %cst_244 = arith.constant 0.001953125 : f32
    %279 = vector.broadcast %cst_244 : f32 to vector<1x8xf32>
    %280 = arith.mulf %278, %279 : vector<1x8xf32>
    %c0_245 = arith.constant 0 : index
    %c0_246 = arith.constant 0 : index
    %281 = vector.load %arg28[%c0_245, %c0_246] : memref<128x8xf32, #tpu.memory_space<vmem>>, vector<128x8xf32>
    %cst_247 = arith.constant dense<0.000000e+00> : vector<1x8xf32>
    %282 = tpu.matmul %276, %281, %cst_247 {dimension_numbers = #tpu.dot_dimension_numbers<[1], [0], [0], [1], [0, 0, 1, 1], [], []>} : vector<1x128xf32>, vector<128x8xf32>, vector<1x8xf32> -> vector<1x8xf32>
    %cst_248 = arith.constant 0.001953125 : f32
    %283 = vector.broadcast %cst_248 : f32 to vector<1x8xf32>
    %284 = arith.mulf %282, %283 : vector<1x8xf32>
    %285 = arith.mulf %280, %280 : vector<1x8xf32>
    %286 = arith.subf %284, %285 : vector<1x8xf32>
    %c0_249 = arith.constant 0 : index
    %c0_250 = arith.constant 0 : index
    %287 = vector.load %arg15[%c0_249, %c0_250] : memref<1x8xf32, #tpu.memory_space<vmem>>, vector<1x8xf32>
    %cst_251 = arith.constant 9.99999974E-6 : f32
    %288 = vector.broadcast %cst_251 : f32 to vector<1x8xf32>
    %289 = arith.addf %286, %288 : vector<1x8xf32>
    %290 = math.rsqrt %289 : vector<1x8xf32>
    %291 = arith.mulf %287, %290 : vector<1x8xf32>
    %c0_252 = arith.constant 0 : index
    %c0_253 = arith.constant 0 : index
    %292 = vector.load %arg16[%c0_252, %c0_253] : memref<1x8xf32, #tpu.memory_space<vmem>>, vector<1x8xf32>
    %293 = arith.mulf %280, %291 : vector<1x8xf32>
    %294 = arith.subf %292, %293 : vector<1x8xf32>
    %c0_254 = arith.constant 0 : index
    %c0_255 = arith.constant 0 : index
    %295 = vector.load %arg29[%c0_254, %c0_255] : memref<8x128xf32, #tpu.memory_space<vmem>>, vector<8x128xf32>
    %cst_256 = arith.constant dense<0.000000e+00> : vector<1x128xf32>
    %296 = tpu.matmul %291, %295, %cst_256 {dimension_numbers = #tpu.dot_dimension_numbers<[1], [0], [0], [1], [0, 0, 1, 1], [], []>} : vector<1x8xf32>, vector<8x128xf32>, vector<1x128xf32> -> vector<1x128xf32>
    %c0_257 = arith.constant 0 : index
    %c0_258 = arith.constant 0 : index
    %297 = vector.load %arg29[%c0_257, %c0_258] : memref<8x128xf32, #tpu.memory_space<vmem>>, vector<8x128xf32>
    %cst_259 = arith.constant dense<0.000000e+00> : vector<1x128xf32>
    %298 = tpu.matmul %294, %297, %cst_259 {dimension_numbers = #tpu.dot_dimension_numbers<[1], [0], [0], [1], [0, 0, 1, 1], [], []>} : vector<1x8xf32>, vector<8x128xf32>, vector<1x128xf32> -> vector<1x128xf32>
    %299 = vector.broadcast %296 : vector<1x128xf32> to vector<32x128xf32>
    %300 = arith.mulf %271, %299 : vector<32x128xf32>
    %301 = vector.broadcast %298 : vector<1x128xf32> to vector<32x128xf32>
    %302 = arith.addf %300, %301 : vector<32x128xf32>
    %cst_260 = arith.constant 0.000000e+00 : f32
    %303 = vector.broadcast %cst_260 : f32 to vector<32x128xf32>
    %304 = arith.maximumf %302, %303 : vector<32x128xf32>
    %305 = arith.truncf %304 : vector<32x128xf32> to vector<32x128xbf16>
    %306 = tpu.concatenate %305, %244 in 1 : vector<32x128xbf16>, vector<32x128xbf16> -> vector<32x256xbf16>
    %c1_261 = arith.constant 1 : index
    %c0_262 = arith.constant 0 : index
    %c0_263 = arith.constant 0 : index
    %307 = vector.load %arg17[%c1_261, %c0_262, %c0_263] : memref<3x256x128xbf16, #tpu.memory_space<vmem>>, vector<1x256x128xbf16>
    %308 = vector.shape_cast %307 : vector<1x256x128xbf16> to vector<256x128xbf16>
    %cst_264 = arith.constant dense<0.000000e+00> : vector<32x128xf32>
    %309 = tpu.matmul %306, %308, %cst_264 {dimension_numbers = #tpu.dot_dimension_numbers<[1], [0], [0], [1], [0, 0, 1, 1], [], []>} : vector<32x256xbf16>, vector<256x128xbf16>, vector<32x128xf32> -> vector<32x128xf32>
    %c0_265 = arith.constant 0 : index
    %c0_266 = arith.constant 0 : index
    %310 = vector.load %arg32[%c0_265, %c0_266] : memref<32x128xf32, #tpu.memory_space<vmem>>, vector<32x128xf32>
    tpu.vector_store %arg32[%c0_265, %c0_266], %309 {strides = array<i32>} : memref<32x128xf32, #tpu.memory_space<vmem>>, vector<32x128xf32>,
    %c0_267 = arith.constant 0 : index
    %c0_268 = arith.constant 0 : index
    %c0_269 = arith.constant 0 : index
    %311 = vector.load %arg17[%c0_267, %c0_268, %c0_269] : memref<3x256x128xbf16, #tpu.memory_space<vmem>>, vector<1x256x128xbf16>
    %312 = vector.shape_cast %311 : vector<1x256x128xbf16> to vector<256x128xbf16>
    %cst_270 = arith.constant dense<0.000000e+00> : vector<32x128xf32>
    %313 = tpu.matmul %306, %312, %cst_270 {dimension_numbers = #tpu.dot_dimension_numbers<[1], [0], [0], [1], [0, 0, 1, 1], [], []>} : vector<32x256xbf16>, vector<256x128xbf16>, vector<32x128xf32> -> vector<32x128xf32>
    %c2_271 = arith.constant 2 : index
    %c0_272 = arith.constant 0 : index
    %c0_273 = arith.constant 0 : index
    %314 = vector.load %arg17[%c2_271, %c0_272, %c0_273] : memref<3x256x128xbf16, #tpu.memory_space<vmem>>, vector<1x256x128xbf16>
    %315 = vector.shape_cast %314 : vector<1x256x128xbf16> to vector<256x128xbf16>
    %cst_274 = arith.constant dense<0.000000e+00> : vector<32x128xf32>
    %316 = tpu.matmul %306, %315, %cst_274 {dimension_numbers = #tpu.dot_dimension_numbers<[1], [0], [0], [1], [0, 0, 1, 1], [], []>} : vector<32x256xbf16>, vector<256x128xbf16>, vector<32x128xf32> -> vector<32x128xf32>
    %c4_275 = arith.constant 4 : index
    %c0_276 = arith.constant 0 : index
    %317 = vector.load %arg32[%c4_275, %c0_276] : memref<32x128xf32, #tpu.memory_space<vmem>>, vector<12x128xf32>
    %318 = vector.extract_strided_slice %313 {offsets = [0, 0], sizes = [12, 128], strides = [1, 1]} : vector<32x128xf32> to vector<12x128xf32>
    %319 = arith.addf %317, %318 : vector<12x128xf32>
    %c4_277 = arith.constant 4 : index
    %c0_278 = arith.constant 0 : index
    %320 = vector.load %arg32[%c4_277, %c0_278] : memref<32x128xf32, #tpu.memory_space<vmem>>, vector<12x128xf32>
    tpu.vector_store %arg32[%c4_277, %c0_278], %319 {strides = array<i32>} : memref<32x128xf32, #tpu.memory_space<vmem>>, vector<12x128xf32>,
    %c0_279 = arith.constant 0 : index
    %c0_280 = arith.constant 0 : index
    %321 = vector.load %arg32[%c0_279, %c0_280] : memref<32x128xf32, #tpu.memory_space<vmem>>, vector<12x128xf32>
    %322 = vector.extract_strided_slice %316 {offsets = [4, 0], sizes = [12, 128], strides = [1, 1]} : vector<32x128xf32> to vector<12x128xf32>
    %323 = arith.addf %321, %322 : vector<12x128xf32>
    %c0_281 = arith.constant 0 : index
    %c0_282 = arith.constant 0 : index
    %324 = vector.load %arg32[%c0_281, %c0_282] : memref<32x128xf32, #tpu.memory_space<vmem>>, vector<12x128xf32>
    tpu.vector_store %arg32[%c0_281, %c0_282], %323 {strides = array<i32>} : memref<32x128xf32, #tpu.memory_space<vmem>>, vector<12x128xf32>,
    %c20_283 = arith.constant 20 : index
    %c0_284 = arith.constant 0 : index
    %325 = vector.load %arg32[%c20_283, %c0_284] : memref<32x128xf32, #tpu.memory_space<vmem>>, vector<12x128xf32>
    %326 = vector.extract_strided_slice %313 {offsets = [16, 0], sizes = [12, 128], strides = [1, 1]} : vector<32x128xf32> to vector<12x128xf32>
    %327 = arith.addf %325, %326 : vector<12x128xf32>
    %c20_285 = arith.constant 20 : index
    %c0_286 = arith.constant 0 : index
    %328 = vector.load %arg32[%c20_285, %c0_286] : memref<32x128xf32, #tpu.memory_space<vmem>>, vector<12x128xf32>
    tpu.vector_store %arg32[%c20_285, %c0_286], %327 {strides = array<i32>} : memref<32x128xf32, #tpu.memory_space<vmem>>, vector<12x128xf32>,
    %c16_287 = arith.constant 16 : index
    %c0_288 = arith.constant 0 : index
    %329 = vector.load %arg32[%c16_287, %c0_288] : memref<32x128xf32, #tpu.memory_space<vmem>>, vector<12x128xf32>
    %330 = vector.extract_strided_slice %316 {offsets = [20, 0], sizes = [12, 128], strides = [1, 1]} : vector<32x128xf32> to vector<12x128xf32>
    %331 = arith.addf %329, %330 : vector<12x128xf32>
    %c16_289 = arith.constant 16 : index
    %c0_290 = arith.constant 0 : index
    %332 = vector.load %arg32[%c16_289, %c0_290] : memref<32x128xf32, #tpu.memory_space<vmem>>, vector<12x128xf32>
    tpu.vector_store %arg32[%c16_289, %c0_290], %331 {strides = array<i32>} : memref<32x128xf32, #tpu.memory_space<vmem>>, vector<12x128xf32>,
    %c0_291 = arith.constant 0 : index
    %c0_292 = arith.constant 0 : index
    %333 = vector.load %arg32[%c0_291, %c0_292] : memref<32x128xf32, #tpu.memory_space<vmem>>, vector<32x128xf32>
    %cst_293 = arith.constant dense<0.000000e+00> : vector<128xf32>
    %334 = vector.multi_reduction <add>, %333, %cst_293 [0] : vector<32x128xf32> to vector<128xf32>
    %335 = vector.shape_cast %334 : vector<128xf32> to vector<1x128xf32>
    %336 = arith.mulf %333, %333 : vector<32x128xf32>
    %cst_294 = arith.constant dense<0.000000e+00> : vector<128xf32>
    %337 = vector.multi_reduction <add>, %336, %cst_294 [0] : vector<32x128xf32> to vector<128xf32>
    %338 = vector.shape_cast %337 : vector<128xf32> to vector<1x128xf32>
    %c0_295 = arith.constant 0 : index
    %c0_296 = arith.constant 0 : index
    %339 = vector.load %arg28[%c0_295, %c0_296] : memref<128x8xf32, #tpu.memory_space<vmem>>, vector<128x8xf32>
    %cst_297 = arith.constant dense<0.000000e+00> : vector<1x8xf32>
    %340 = tpu.matmul %335, %339, %cst_297 {dimension_numbers = #tpu.dot_dimension_numbers<[1], [0], [0], [1], [0, 0, 1, 1], [], []>} : vector<1x128xf32>, vector<128x8xf32>, vector<1x8xf32> -> vector<1x8xf32>
    %cst_298 = arith.constant 0.001953125 : f32
    %341 = vector.broadcast %cst_298 : f32 to vector<1x8xf32>
    %342 = arith.mulf %340, %341 : vector<1x8xf32>
    %c0_299 = arith.constant 0 : index
    %c0_300 = arith.constant 0 : index
    %343 = vector.load %arg28[%c0_299, %c0_300] : memref<128x8xf32, #tpu.memory_space<vmem>>, vector<128x8xf32>
    %cst_301 = arith.constant dense<0.000000e+00> : vector<1x8xf32>
    %344 = tpu.matmul %338, %343, %cst_301 {dimension_numbers = #tpu.dot_dimension_numbers<[1], [0], [0], [1], [0, 0, 1, 1], [], []>} : vector<1x128xf32>, vector<128x8xf32>, vector<1x8xf32> -> vector<1x8xf32>
    %cst_302 = arith.constant 0.001953125 : f32
    %345 = vector.broadcast %cst_302 : f32 to vector<1x8xf32>
    %346 = arith.mulf %344, %345 : vector<1x8xf32>
    %347 = arith.mulf %342, %342 : vector<1x8xf32>
    %348 = arith.subf %346, %347 : vector<1x8xf32>
    %c0_303 = arith.constant 0 : index
    %c0_304 = arith.constant 0 : index
    %349 = vector.load %arg18[%c0_303, %c0_304] : memref<1x8xf32, #tpu.memory_space<vmem>>, vector<1x8xf32>
    %cst_305 = arith.constant 9.99999974E-6 : f32
    %350 = vector.broadcast %cst_305 : f32 to vector<1x8xf32>
    %351 = arith.addf %348, %350 : vector<1x8xf32>
    %352 = math.rsqrt %351 : vector<1x8xf32>
    %353 = arith.mulf %349, %352 : vector<1x8xf32>
    %c0_306 = arith.constant 0 : index
    %c0_307 = arith.constant 0 : index
    %354 = vector.load %arg19[%c0_306, %c0_307] : memref<1x8xf32, #tpu.memory_space<vmem>>, vector<1x8xf32>
    %355 = arith.mulf %342, %353 : vector<1x8xf32>
    %356 = arith.subf %354, %355 : vector<1x8xf32>
    %c0_308 = arith.constant 0 : index
    %c0_309 = arith.constant 0 : index
    %357 = vector.load %arg29[%c0_308, %c0_309] : memref<8x128xf32, #tpu.memory_space<vmem>>, vector<8x128xf32>
    %cst_310 = arith.constant dense<0.000000e+00> : vector<1x128xf32>
    %358 = tpu.matmul %353, %357, %cst_310 {dimension_numbers = #tpu.dot_dimension_numbers<[1], [0], [0], [1], [0, 0, 1, 1], [], []>} : vector<1x8xf32>, vector<8x128xf32>, vector<1x128xf32> -> vector<1x128xf32>
    %c0_311 = arith.constant 0 : index
    %c0_312 = arith.constant 0 : index
    %359 = vector.load %arg29[%c0_311, %c0_312] : memref<8x128xf32, #tpu.memory_space<vmem>>, vector<8x128xf32>
    %cst_313 = arith.constant dense<0.000000e+00> : vector<1x128xf32>
    %360 = tpu.matmul %356, %359, %cst_313 {dimension_numbers = #tpu.dot_dimension_numbers<[1], [0], [0], [1], [0, 0, 1, 1], [], []>} : vector<1x8xf32>, vector<8x128xf32>, vector<1x128xf32> -> vector<1x128xf32>
    %361 = vector.broadcast %358 : vector<1x128xf32> to vector<32x128xf32>
    %362 = arith.mulf %333, %361 : vector<32x128xf32>
    %363 = vector.broadcast %360 : vector<1x128xf32> to vector<32x128xf32>
    %364 = arith.addf %362, %363 : vector<32x128xf32>
    %cst_314 = arith.constant 0.000000e+00 : f32
    %365 = vector.broadcast %cst_314 : f32 to vector<32x128xf32>
    %366 = arith.maximumf %364, %365 : vector<32x128xf32>
    %367 = arith.truncf %366 : vector<32x128xf32> to vector<32x128xbf16>
    %368 = tpu.concatenate %367, %183 in 1 : vector<32x128xbf16>, vector<32x128xbf16> -> vector<32x256xbf16>
    %c1_315 = arith.constant 1 : index
    %c0_316 = arith.constant 0 : index
    %c0_317 = arith.constant 0 : index
    %369 = vector.load %arg20[%c1_315, %c0_316, %c0_317] : memref<3x256x128xbf16, #tpu.memory_space<vmem>>, vector<1x256x128xbf16>
    %370 = vector.shape_cast %369 : vector<1x256x128xbf16> to vector<256x128xbf16>
    %cst_318 = arith.constant dense<0.000000e+00> : vector<32x128xf32>
    %371 = tpu.matmul %368, %370, %cst_318 {dimension_numbers = #tpu.dot_dimension_numbers<[1], [0], [0], [1], [0, 0, 1, 1], [], []>} : vector<32x256xbf16>, vector<256x128xbf16>, vector<32x128xf32> -> vector<32x128xf32>
    %c0_319 = arith.constant 0 : index
    %c0_320 = arith.constant 0 : index
    %372 = vector.load %arg32[%c0_319, %c0_320] : memref<32x128xf32, #tpu.memory_space<vmem>>, vector<32x128xf32>
    tpu.vector_store %arg32[%c0_319, %c0_320], %371 {strides = array<i32>} : memref<32x128xf32, #tpu.memory_space<vmem>>, vector<32x128xf32>,
    %c0_321 = arith.constant 0 : index
    %c0_322 = arith.constant 0 : index
    %c0_323 = arith.constant 0 : index
    %373 = vector.load %arg20[%c0_321, %c0_322, %c0_323] : memref<3x256x128xbf16, #tpu.memory_space<vmem>>, vector<1x256x128xbf16>
    %374 = vector.shape_cast %373 : vector<1x256x128xbf16> to vector<256x128xbf16>
    %cst_324 = arith.constant dense<0.000000e+00> : vector<32x128xf32>
    %375 = tpu.matmul %368, %374, %cst_324 {dimension_numbers = #tpu.dot_dimension_numbers<[1], [0], [0], [1], [0, 0, 1, 1], [], []>} : vector<32x256xbf16>, vector<256x128xbf16>, vector<32x128xf32> -> vector<32x128xf32>
    %c2_325 = arith.constant 2 : index
    %c0_326 = arith.constant 0 : index
    %c0_327 = arith.constant 0 : index
    %376 = vector.load %arg20[%c2_325, %c0_326, %c0_327] : memref<3x256x128xbf16, #tpu.memory_space<vmem>>, vector<1x256x128xbf16>
    %377 = vector.shape_cast %376 : vector<1x256x128xbf16> to vector<256x128xbf16>
    %cst_328 = arith.constant dense<0.000000e+00> : vector<32x128xf32>
    %378 = tpu.matmul %368, %377, %cst_328 {dimension_numbers = #tpu.dot_dimension_numbers<[1], [0], [0], [1], [0, 0, 1, 1], [], []>} : vector<32x256xbf16>, vector<256x128xbf16>, vector<32x128xf32> -> vector<32x128xf32>
    %c2_329 = arith.constant 2 : index
    %c0_330 = arith.constant 0 : index
    %379 = vector.load %arg32[%c2_329, %c0_330] : memref<32x128xf32, #tpu.memory_space<vmem>>, vector<14x128xf32>
    %380 = vector.extract_strided_slice %375 {offsets = [0, 0], sizes = [14, 128], strides = [1, 1]} : vector<32x128xf32> to vector<14x128xf32>
    %381 = arith.addf %379, %380 : vector<14x128xf32>
    %c2_331 = arith.constant 2 : index
    %c0_332 = arith.constant 0 : index
    %382 = vector.load %arg32[%c2_331, %c0_332] : memref<32x128xf32, #tpu.memory_space<vmem>>, vector<14x128xf32>
    tpu.vector_store %arg32[%c2_331, %c0_332], %381 {strides = array<i32>} : memref<32x128xf32, #tpu.memory_space<vmem>>, vector<14x128xf32>,
    %c0_333 = arith.constant 0 : index
    %c0_334 = arith.constant 0 : index
    %383 = vector.load %arg32[%c0_333, %c0_334] : memref<32x128xf32, #tpu.memory_space<vmem>>, vector<14x128xf32>
    %384 = vector.extract_strided_slice %378 {offsets = [2, 0], sizes = [14, 128], strides = [1, 1]} : vector<32x128xf32> to vector<14x128xf32>
    %385 = arith.addf %383, %384 : vector<14x128xf32>
    %c0_335 = arith.constant 0 : index
    %c0_336 = arith.constant 0 : index
    %386 = vector.load %arg32[%c0_335, %c0_336] : memref<32x128xf32, #tpu.memory_space<vmem>>, vector<14x128xf32>
    tpu.vector_store %arg32[%c0_335, %c0_336], %385 {strides = array<i32>} : memref<32x128xf32, #tpu.memory_space<vmem>>, vector<14x128xf32>,
    %c18_337 = arith.constant 18 : index
    %c0_338 = arith.constant 0 : index
    %387 = vector.load %arg32[%c18_337, %c0_338] : memref<32x128xf32, #tpu.memory_space<vmem>>, vector<14x128xf32>
    %388 = vector.extract_strided_slice %375 {offsets = [16, 0], sizes = [14, 128], strides = [1, 1]} : vector<32x128xf32> to vector<14x128xf32>
    %389 = arith.addf %387, %388 : vector<14x128xf32>
    %c18_339 = arith.constant 18 : index
    %c0_340 = arith.constant 0 : index
    %390 = vector.load %arg32[%c18_339, %c0_340] : memref<32x128xf32, #tpu.memory_space<vmem>>, vector<14x128xf32>
    tpu.vector_store %arg32[%c18_339, %c0_340], %389 {strides = array<i32>} : memref<32x128xf32, #tpu.memory_space<vmem>>, vector<14x128xf32>,
    %c16_341 = arith.constant 16 : index
    %c0_342 = arith.constant 0 : index
    %391 = vector.load %arg32[%c16_341, %c0_342] : memref<32x128xf32, #tpu.memory_space<vmem>>, vector<14x128xf32>
    %392 = vector.extract_strided_slice %378 {offsets = [18, 0], sizes = [14, 128], strides = [1, 1]} : vector<32x128xf32> to vector<14x128xf32>
    %393 = arith.addf %391, %392 : vector<14x128xf32>
    %c16_343 = arith.constant 16 : index
    %c0_344 = arith.constant 0 : index
    %394 = vector.load %arg32[%c16_343, %c0_344] : memref<32x128xf32, #tpu.memory_space<vmem>>, vector<14x128xf32>
    tpu.vector_store %arg32[%c16_343, %c0_344], %393 {strides = array<i32>} : memref<32x128xf32, #tpu.memory_space<vmem>>, vector<14x128xf32>,
    %c0_345 = arith.constant 0 : index
    %c0_346 = arith.constant 0 : index
    %395 = vector.load %arg32[%c0_345, %c0_346] : memref<32x128xf32, #tpu.memory_space<vmem>>, vector<32x128xf32>
    %cst_347 = arith.constant dense<0.000000e+00> : vector<128xf32>
    %396 = vector.multi_reduction <add>, %395, %cst_347 [0] : vector<32x128xf32> to vector<128xf32>
    %397 = vector.shape_cast %396 : vector<128xf32> to vector<1x128xf32>
    %398 = arith.mulf %395, %395 : vector<32x128xf32>
    %cst_348 = arith.constant dense<0.000000e+00> : vector<128xf32>
    %399 = vector.multi_reduction <add>, %398, %cst_348 [0] : vector<32x128xf32> to vector<128xf32>
    %400 = vector.shape_cast %399 : vector<128xf32> to vector<1x128xf32>
    %c0_349 = arith.constant 0 : index
    %c0_350 = arith.constant 0 : index
    %401 = vector.load %arg28[%c0_349, %c0_350] : memref<128x8xf32, #tpu.memory_space<vmem>>, vector<128x8xf32>
    %cst_351 = arith.constant dense<0.000000e+00> : vector<1x8xf32>
    %402 = tpu.matmul %397, %401, %cst_351 {dimension_numbers = #tpu.dot_dimension_numbers<[1], [0], [0], [1], [0, 0, 1, 1], [], []>} : vector<1x128xf32>, vector<128x8xf32>, vector<1x8xf32> -> vector<1x8xf32>
    %cst_352 = arith.constant 0.001953125 : f32
    %403 = vector.broadcast %cst_352 : f32 to vector<1x8xf32>
    %404 = arith.mulf %402, %403 : vector<1x8xf32>
    %c0_353 = arith.constant 0 : index
    %c0_354 = arith.constant 0 : index
    %405 = vector.load %arg28[%c0_353, %c0_354] : memref<128x8xf32, #tpu.memory_space<vmem>>, vector<128x8xf32>
    %cst_355 = arith.constant dense<0.000000e+00> : vector<1x8xf32>
    %406 = tpu.matmul %400, %405, %cst_355 {dimension_numbers = #tpu.dot_dimension_numbers<[1], [0], [0], [1], [0, 0, 1, 1], [], []>} : vector<1x128xf32>, vector<128x8xf32>, vector<1x8xf32> -> vector<1x8xf32>
    %cst_356 = arith.constant 0.001953125 : f32
    %407 = vector.broadcast %cst_356 : f32 to vector<1x8xf32>
    %408 = arith.mulf %406, %407 : vector<1x8xf32>
    %409 = arith.mulf %404, %404 : vector<1x8xf32>
    %410 = arith.subf %408, %409 : vector<1x8xf32>
    %c0_357 = arith.constant 0 : index
    %c0_358 = arith.constant 0 : index
    %411 = vector.load %arg21[%c0_357, %c0_358] : memref<1x8xf32, #tpu.memory_space<vmem>>, vector<1x8xf32>
    %cst_359 = arith.constant 9.99999974E-6 : f32
    %412 = vector.broadcast %cst_359 : f32 to vector<1x8xf32>
    %413 = arith.addf %410, %412 : vector<1x8xf32>
    %414 = math.rsqrt %413 : vector<1x8xf32>
    %415 = arith.mulf %411, %414 : vector<1x8xf32>
    %c0_360 = arith.constant 0 : index
    %c0_361 = arith.constant 0 : index
    %416 = vector.load %arg22[%c0_360, %c0_361] : memref<1x8xf32, #tpu.memory_space<vmem>>, vector<1x8xf32>
    %417 = arith.mulf %404, %415 : vector<1x8xf32>
    %418 = arith.subf %416, %417 : vector<1x8xf32>
    %c0_362 = arith.constant 0 : index
    %c0_363 = arith.constant 0 : index
    %419 = vector.load %arg29[%c0_362, %c0_363] : memref<8x128xf32, #tpu.memory_space<vmem>>, vector<8x128xf32>
    %cst_364 = arith.constant dense<0.000000e+00> : vector<1x128xf32>
    %420 = tpu.matmul %415, %419, %cst_364 {dimension_numbers = #tpu.dot_dimension_numbers<[1], [0], [0], [1], [0, 0, 1, 1], [], []>} : vector<1x8xf32>, vector<8x128xf32>, vector<1x128xf32> -> vector<1x128xf32>
    %c0_365 = arith.constant 0 : index
    %c0_366 = arith.constant 0 : index
    %421 = vector.load %arg29[%c0_365, %c0_366] : memref<8x128xf32, #tpu.memory_space<vmem>>, vector<8x128xf32>
    %cst_367 = arith.constant dense<0.000000e+00> : vector<1x128xf32>
    %422 = tpu.matmul %418, %421, %cst_367 {dimension_numbers = #tpu.dot_dimension_numbers<[1], [0], [0], [1], [0, 0, 1, 1], [], []>} : vector<1x8xf32>, vector<8x128xf32>, vector<1x128xf32> -> vector<1x128xf32>
    %423 = vector.broadcast %420 : vector<1x128xf32> to vector<32x128xf32>
    %424 = arith.mulf %395, %423 : vector<32x128xf32>
    %425 = vector.broadcast %422 : vector<1x128xf32> to vector<32x128xf32>
    %426 = arith.addf %424, %425 : vector<32x128xf32>
    %cst_368 = arith.constant 0.000000e+00 : f32
    %427 = vector.broadcast %cst_368 : f32 to vector<32x128xf32>
    %428 = arith.maximumf %426, %427 : vector<32x128xf32>
    %429 = arith.truncf %428 : vector<32x128xf32> to vector<32x128xbf16>
    %430 = tpu.concatenate %429, %122 in 1 : vector<32x128xbf16>, vector<32x128xbf16> -> vector<32x256xbf16>
    %c1_369 = arith.constant 1 : index
    %c0_370 = arith.constant 0 : index
    %c0_371 = arith.constant 0 : index
    %431 = vector.load %arg23[%c1_369, %c0_370, %c0_371] : memref<3x256x64xbf16, #tpu.memory_space<vmem>>, vector<1x256x64xbf16>
    %432 = vector.shape_cast %431 : vector<1x256x64xbf16> to vector<256x64xbf16>
    %cst_372 = arith.constant dense<0.000000e+00> : vector<32x64xf32>
    %433 = tpu.matmul %430, %432, %cst_372 {dimension_numbers = #tpu.dot_dimension_numbers<[1], [0], [0], [1], [0, 0, 1, 1], [], []>} : vector<32x256xbf16>, vector<256x64xbf16>, vector<32x64xf32> -> vector<32x64xf32>
    %c0_373 = arith.constant 0 : index
    %c0_374 = arith.constant 0 : index
    %434 = vector.load %arg31[%c0_373, %c0_374] : memref<32x64xf32, #tpu.memory_space<vmem>>, vector<32x64xf32>
    tpu.vector_store %arg31[%c0_373, %c0_374], %433 {strides = array<i32>} : memref<32x64xf32, #tpu.memory_space<vmem>>, vector<32x64xf32>,
    %c0_375 = arith.constant 0 : index
    %c0_376 = arith.constant 0 : index
    %c0_377 = arith.constant 0 : index
    %435 = vector.load %arg23[%c0_375, %c0_376, %c0_377] : memref<3x256x64xbf16, #tpu.memory_space<vmem>>, vector<1x256x64xbf16>
    %436 = vector.shape_cast %435 : vector<1x256x64xbf16> to vector<256x64xbf16>
    %cst_378 = arith.constant dense<0.000000e+00> : vector<32x64xf32>
    %437 = tpu.matmul %430, %436, %cst_378 {dimension_numbers = #tpu.dot_dimension_numbers<[1], [0], [0], [1], [0, 0, 1, 1], [], []>} : vector<32x256xbf16>, vector<256x64xbf16>, vector<32x64xf32> -> vector<32x64xf32>
    %c2_379 = arith.constant 2 : index
    %c0_380 = arith.constant 0 : index
    %c0_381 = arith.constant 0 : index
    %438 = vector.load %arg23[%c2_379, %c0_380, %c0_381] : memref<3x256x64xbf16, #tpu.memory_space<vmem>>, vector<1x256x64xbf16>
    %439 = vector.shape_cast %438 : vector<1x256x64xbf16> to vector<256x64xbf16>
    %cst_382 = arith.constant dense<0.000000e+00> : vector<32x64xf32>
    %440 = tpu.matmul %430, %439, %cst_382 {dimension_numbers = #tpu.dot_dimension_numbers<[1], [0], [0], [1], [0, 0, 1, 1], [], []>} : vector<32x256xbf16>, vector<256x64xbf16>, vector<32x64xf32> -> vector<32x64xf32>
    %c1_383 = arith.constant 1 : index
    %c0_384 = arith.constant 0 : index
    %441 = vector.load %arg31[%c1_383, %c0_384] : memref<32x64xf32, #tpu.memory_space<vmem>>, vector<15x64xf32>
    %442 = vector.extract_strided_slice %437 {offsets = [0, 0], sizes = [15, 64], strides = [1, 1]} : vector<32x64xf32> to vector<15x64xf32>
    %443 = arith.addf %441, %442 : vector<15x64xf32>
    %c1_385 = arith.constant 1 : index
    %c0_386 = arith.constant 0 : index
    %444 = vector.load %arg31[%c1_385, %c0_386] : memref<32x64xf32, #tpu.memory_space<vmem>>, vector<15x64xf32>
    tpu.vector_store %arg31[%c1_385, %c0_386], %443 {strides = array<i32>} : memref<32x64xf32, #tpu.memory_space<vmem>>, vector<15x64xf32>,
    %c0_387 = arith.constant 0 : index
    %c0_388 = arith.constant 0 : index
    %445 = vector.load %arg31[%c0_387, %c0_388] : memref<32x64xf32, #tpu.memory_space<vmem>>, vector<15x64xf32>
    %446 = vector.extract_strided_slice %440 {offsets = [1, 0], sizes = [15, 64], strides = [1, 1]} : vector<32x64xf32> to vector<15x64xf32>
    %447 = arith.addf %445, %446 : vector<15x64xf32>
    %c0_389 = arith.constant 0 : index
    %c0_390 = arith.constant 0 : index
    %448 = vector.load %arg31[%c0_389, %c0_390] : memref<32x64xf32, #tpu.memory_space<vmem>>, vector<15x64xf32>
    tpu.vector_store %arg31[%c0_389, %c0_390], %447 {strides = array<i32>} : memref<32x64xf32, #tpu.memory_space<vmem>>, vector<15x64xf32>,
    %c17_391 = arith.constant 17 : index
    %c0_392 = arith.constant 0 : index
    %449 = vector.load %arg31[%c17_391, %c0_392] : memref<32x64xf32, #tpu.memory_space<vmem>>, vector<15x64xf32>
    %450 = vector.extract_strided_slice %437 {offsets = [16, 0], sizes = [15, 64], strides = [1, 1]} : vector<32x64xf32> to vector<15x64xf32>
    %451 = arith.addf %449, %450 : vector<15x64xf32>
    %c17_393 = arith.constant 17 : index
    %c0_394 = arith.constant 0 : index
    %452 = vector.load %arg31[%c17_393, %c0_394] : memref<32x64xf32, #tpu.memory_space<vmem>>, vector<15x64xf32>
    tpu.vector_store %arg31[%c17_393, %c0_394], %451 {strides = array<i32>} : memref<32x64xf32, #tpu.memory_space<vmem>>, vector<15x64xf32>,
    %c16_395 = arith.constant 16 : index
    %c0_396 = arith.constant 0 : index
    %453 = vector.load %arg31[%c16_395, %c0_396] : memref<32x64xf32, #tpu.memory_space<vmem>>, vector<15x64xf32>
    %454 = vector.extract_strided_slice %440 {offsets = [17, 0], sizes = [15, 64], strides = [1, 1]} : vector<32x64xf32> to vector<15x64xf32>
    %455 = arith.addf %453, %454 : vector<15x64xf32>
    %c16_397 = arith.constant 16 : index
    %c0_398 = arith.constant 0 : index
    %456 = vector.load %arg31[%c16_397, %c0_398] : memref<32x64xf32, #tpu.memory_space<vmem>>, vector<15x64xf32>
    tpu.vector_store %arg31[%c16_397, %c0_398], %455 {strides = array<i32>} : memref<32x64xf32, #tpu.memory_space<vmem>>, vector<15x64xf32>,
    %c0_399 = arith.constant 0 : index
    %c0_400 = arith.constant 0 : index
    %457 = vector.load %arg31[%c0_399, %c0_400] : memref<32x64xf32, #tpu.memory_space<vmem>>, vector<32x64xf32>
    %cst_401 = arith.constant dense<0.000000e+00> : vector<64xf32>
    %458 = vector.multi_reduction <add>, %457, %cst_401 [0] : vector<32x64xf32> to vector<64xf32>
    %459 = vector.shape_cast %458 : vector<64xf32> to vector<1x64xf32>
    %460 = arith.mulf %457, %457 : vector<32x64xf32>
    %cst_402 = arith.constant dense<0.000000e+00> : vector<64xf32>
    %461 = vector.multi_reduction <add>, %460, %cst_402 [0] : vector<32x64xf32> to vector<64xf32>
    %462 = vector.shape_cast %461 : vector<64xf32> to vector<1x64xf32>
    %c0_403 = arith.constant 0 : index
    %c0_404 = arith.constant 0 : index
    %463 = vector.load %arg26[%c0_403, %c0_404] : memref<64x4xf32, #tpu.memory_space<vmem>>, vector<64x4xf32>
    %cst_405 = arith.constant dense<0.000000e+00> : vector<1x4xf32>
    %464 = tpu.matmul %459, %463, %cst_405 {dimension_numbers = #tpu.dot_dimension_numbers<[1], [0], [0], [1], [0, 0, 1, 1], [], []>} : vector<1x64xf32>, vector<64x4xf32>, vector<1x4xf32> -> vector<1x4xf32>
    %cst_406 = arith.constant 0.001953125 : f32
    %465 = vector.broadcast %cst_406 : f32 to vector<1x4xf32>
    %466 = arith.mulf %464, %465 : vector<1x4xf32>
    %c0_407 = arith.constant 0 : index
    %c0_408 = arith.constant 0 : index
    %467 = vector.load %arg26[%c0_407, %c0_408] : memref<64x4xf32, #tpu.memory_space<vmem>>, vector<64x4xf32>
    %cst_409 = arith.constant dense<0.000000e+00> : vector<1x4xf32>
    %468 = tpu.matmul %462, %467, %cst_409 {dimension_numbers = #tpu.dot_dimension_numbers<[1], [0], [0], [1], [0, 0, 1, 1], [], []>} : vector<1x64xf32>, vector<64x4xf32>, vector<1x4xf32> -> vector<1x4xf32>
    %cst_410 = arith.constant 0.001953125 : f32
    %469 = vector.broadcast %cst_410 : f32 to vector<1x4xf32>
    %470 = arith.mulf %468, %469 : vector<1x4xf32>
    %471 = arith.mulf %466, %466 : vector<1x4xf32>
    %472 = arith.subf %470, %471 : vector<1x4xf32>
    %c0_411 = arith.constant 0 : index
    %c0_412 = arith.constant 0 : index
    %473 = vector.load %arg24[%c0_411, %c0_412] : memref<1x4xf32, #tpu.memory_space<vmem>>, vector<1x4xf32>
    %cst_413 = arith.constant 9.99999974E-6 : f32
    %474 = vector.broadcast %cst_413 : f32 to vector<1x4xf32>
    %475 = arith.addf %472, %474 : vector<1x4xf32>
    %476 = math.rsqrt %475 : vector<1x4xf32>
    %477 = arith.mulf %473, %476 : vector<1x4xf32>
    %c0_414 = arith.constant 0 : index
    %c0_415 = arith.constant 0 : index
    %478 = vector.load %arg25[%c0_414, %c0_415] : memref<1x4xf32, #tpu.memory_space<vmem>>, vector<1x4xf32>
    %479 = arith.mulf %466, %477 : vector<1x4xf32>
    %480 = arith.subf %478, %479 : vector<1x4xf32>
    %c0_416 = arith.constant 0 : index
    %c0_417 = arith.constant 0 : index
    %481 = vector.load %arg27[%c0_416, %c0_417] : memref<4x64xf32, #tpu.memory_space<vmem>>, vector<4x64xf32>
    %cst_418 = arith.constant dense<0.000000e+00> : vector<1x64xf32>
    %482 = tpu.matmul %477, %481, %cst_418 {dimension_numbers = #tpu.dot_dimension_numbers<[1], [0], [0], [1], [0, 0, 1, 1], [], []>} : vector<1x4xf32>, vector<4x64xf32>, vector<1x64xf32> -> vector<1x64xf32>
    %c0_419 = arith.constant 0 : index
    %c0_420 = arith.constant 0 : index
    %483 = vector.load %arg27[%c0_419, %c0_420] : memref<4x64xf32, #tpu.memory_space<vmem>>, vector<4x64xf32>
    %cst_421 = arith.constant dense<0.000000e+00> : vector<1x64xf32>
    %484 = tpu.matmul %480, %483, %cst_421 {dimension_numbers = #tpu.dot_dimension_numbers<[1], [0], [0], [1], [0, 0, 1, 1], [], []>} : vector<1x4xf32>, vector<4x64xf32>, vector<1x64xf32> -> vector<1x64xf32>
    %485 = vector.broadcast %482 : vector<1x64xf32> to vector<32x64xf32>
    %486 = arith.mulf %457, %485 : vector<32x64xf32>
    %487 = vector.broadcast %484 : vector<1x64xf32> to vector<32x64xf32>
    %488 = arith.addf %486, %487 : vector<32x64xf32>
    %cst_422 = arith.constant 0.000000e+00 : f32
    %489 = vector.broadcast %cst_422 : f32 to vector<32x64xf32>
    %490 = arith.maximumf %488, %489 : vector<32x64xf32>
    %491 = arith.extf %61 : vector<32x64xbf16> to vector<32x64xf32>
    %492 = arith.addf %490, %491 : vector<32x64xf32>
    %c0_423 = arith.constant 0 : index
    %c0_424 = arith.constant 0 : index
    %493 = vector.load %arg30[%c0_423, %c0_424] : memref<32x64xf32, #tpu.memory_space<vmem>>, vector<32x64xf32>
    tpu.vector_store %arg30[%c0_423, %c0_424], %492 {strides = array<i32>} : memref<32x64xf32, #tpu.memory_space<vmem>>, vector<32x64xf32>,
    return
  }
  func.func @transform_0(%arg0: i32) -> (i32, i32) {
    %c0_i32 = arith.constant 0 : i32
    %c0_i32_0 = arith.constant 0 : i32
    %c0_i32_1 = arith.constant 0 : i32
    return %c0_i32, %c0_i32_0 : i32, i32
  }
  func.func @transform_1(%arg0: i32) -> (i32, i32, i32) {
    %c0_i32 = arith.constant 0 : i32
    %c0_i32_0 = arith.constant 0 : i32
    %c0_i32_1 = arith.constant 0 : i32
    %c0_i32_2 = arith.constant 0 : i32
    return %c0_i32, %c0_i32_0, %c0_i32_1 : i32, i32, i32
  }
  func.func @transform_2(%arg0: i32) -> (i32, i32) {
    %c0_i32 = arith.constant 0 : i32
    %c0_i32_0 = arith.constant 0 : i32
    %c0_i32_1 = arith.constant 0 : i32
    return %c0_i32, %c0_i32_0 : i32, i32
  }
  func.func @transform_3(%arg0: i32) -> (i32, i32) {
    %c0_i32 = arith.constant 0 : i32
    %c0_i32_0 = arith.constant 0 : i32
    %c0_i32_1 = arith.constant 0 : i32
    return %c0_i32, %c0_i32_0 : i32, i32
  }
  func.func @transform_4(%arg0: i32) -> (i32, i32, i32) {
    %c0_i32 = arith.constant 0 : i32
    %c0_i32_0 = arith.constant 0 : i32
    %c0_i32_1 = arith.constant 0 : i32
    %c0_i32_2 = arith.constant 0 : i32
    return %c0_i32, %c0_i32_0, %c0_i32_1 : i32, i32, i32
  }
  func.func @transform_5(%arg0: i32) -> (i32, i32) {
    %c0_i32 = arith.constant 0 : i32
    %c0_i32_0 = arith.constant 0 : i32
    %c0_i32_1 = arith.constant 0 : i32
    return %c0_i32, %c0_i32_0 : i32, i32
  }
  func.func @transform_6(%arg0: i32) -> (i32, i32) {
    %c0_i32 = arith.constant 0 : i32
    %c0_i32_0 = arith.constant 0 : i32
    %c0_i32_1 = arith.constant 0 : i32
    return %c0_i32, %c0_i32_0 : i32, i32
  }
  func.func @transform_7(%arg0: i32) -> (i32, i32, i32) {
    %c0_i32 = arith.constant 0 : i32
    %c0_i32_0 = arith.constant 0 : i32
    %c0_i32_1 = arith.constant 0 : i32
    %c0_i32_2 = arith.constant 0 : i32
    return %c0_i32, %c0_i32_0, %c0_i32_1 : i32, i32, i32
  }
  func.func @transform_8(%arg0: i32) -> (i32, i32) {
    %c0_i32 = arith.constant 0 : i32
    %c0_i32_0 = arith.constant 0 : i32
    %c0_i32_1 = arith.constant 0 : i32
    return %c0_i32, %c0_i32_0 : i32, i32
  }
  func.func @transform_9(%arg0: i32) -> (i32, i32) {
    %c0_i32 = arith.constant 0 : i32
    %c0_i32_0 = arith.constant 0 : i32
    %c0_i32_1 = arith.constant 0 : i32
    return %c0_i32, %c0_i32_0 : i32, i32
  }
  func.func @transform_10(%arg0: i32) -> (i32, i32, i32) {
    %c0_i32 = arith.constant 0 : i32
    %c0_i32_0 = arith.constant 0 : i32
    %c0_i32_1 = arith.constant 0 : i32
    %c0_i32_2 = arith.constant 0 : i32
    return %c0_i32, %c0_i32_0, %c0_i32_1 : i32, i32, i32
  }
  func.func @transform_11(%arg0: i32) -> (i32, i32) {
    %c0_i32 = arith.constant 0 : i32
    %c0_i32_0 = arith.constant 0 : i32
    %c0_i32_1 = arith.constant 0 : i32
    return %c0_i32, %c0_i32_0 : i32, i32
  }
  func.func @transform_12(%arg0: i32) -> (i32, i32) {
    %c0_i32 = arith.constant 0 : i32
    %c0_i32_0 = arith.constant 0 : i32
    %c0_i32_1 = arith.constant 0 : i32
    return %c0_i32, %c0_i32_0 : i32, i32
  }
  func.func @transform_13(%arg0: i32) -> (i32, i32, i32) {
    %c0_i32 = arith.constant 0 : i32
    %c0_i32_0 = arith.constant 0 : i32
    %c0_i32_1 = arith.constant 0 : i32
    %c0_i32_2 = arith.constant 0 : i32
    return %c0_i32, %c0_i32_0, %c0_i32_1 : i32, i32, i32
  }
  func.func @transform_14(%arg0: i32) -> (i32, i32) {
    %c0_i32 = arith.constant 0 : i32
    %c0_i32_0 = arith.constant 0 : i32
    %c0_i32_1 = arith.constant 0 : i32
    return %c0_i32, %c0_i32_0 : i32, i32
  }
  func.func @transform_15(%arg0: i32) -> (i32, i32) {
    %c0_i32 = arith.constant 0 : i32
    %c0_i32_0 = arith.constant 0 : i32
    %c0_i32_1 = arith.constant 0 : i32
    return %c0_i32, %c0_i32_0 : i32, i32
  }
  func.func @transform_16(%arg0: i32) -> (i32, i32, i32) {
    %c0_i32 = arith.constant 0 : i32
    %c0_i32_0 = arith.constant 0 : i32
    %c0_i32_1 = arith.constant 0 : i32
    %c0_i32_2 = arith.constant 0 : i32
    return %c0_i32, %c0_i32_0, %c0_i32_1 : i32, i32, i32
  }
  func.func @transform_17(%arg0: i32) -> (i32, i32) {
    %c0_i32 = arith.constant 0 : i32
    %c0_i32_0 = arith.constant 0 : i32
    %c0_i32_1 = arith.constant 0 : i32
    return %c0_i32, %c0_i32_0 : i32, i32
  }
  func.func @transform_18(%arg0: i32) -> (i32, i32) {
    %c0_i32 = arith.constant 0 : i32
    %c0_i32_0 = arith.constant 0 : i32
    %c0_i32_1 = arith.constant 0 : i32
    return %c0_i32, %c0_i32_0 : i32, i32
  }
  func.func @transform_19(%arg0: i32) -> (i32, i32, i32) {
    %c0_i32 = arith.constant 0 : i32
    %c0_i32_0 = arith.constant 0 : i32
    %c0_i32_1 = arith.constant 0 : i32
    %c0_i32_2 = arith.constant 0 : i32
    return %c0_i32, %c0_i32_0, %c0_i32_1 : i32, i32, i32
  }
  func.func @transform_20(%arg0: i32) -> (i32, i32) {
    %c0_i32 = arith.constant 0 : i32
    %c0_i32_0 = arith.constant 0 : i32
    %c0_i32_1 = arith.constant 0 : i32
    return %c0_i32, %c0_i32_0 : i32, i32
  }
  func.func @transform_21(%arg0: i32) -> (i32, i32) {
    %c0_i32 = arith.constant 0 : i32
    %c0_i32_0 = arith.constant 0 : i32
    %c0_i32_1 = arith.constant 0 : i32
    return %c0_i32, %c0_i32_0 : i32, i32
  }
  func.func @transform_22(%arg0: i32) -> (i32, i32, i32) {
    %c0_i32 = arith.constant 0 : i32
    %c0_i32_0 = arith.constant 0 : i32
    %c0_i32_1 = arith.constant 0 : i32
    %c0_i32_2 = arith.constant 0 : i32
    return %c0_i32, %c0_i32_0, %c0_i32_1 : i32, i32, i32
  }
  func.func @transform_23(%arg0: i32) -> (i32, i32) {
    %c0_i32 = arith.constant 0 : i32
    %c0_i32_0 = arith.constant 0 : i32
    %c0_i32_1 = arith.constant 0 : i32
    return %c0_i32, %c0_i32_0 : i32, i32
  }
  func.func @transform_24(%arg0: i32) -> (i32, i32) {
    %c0_i32 = arith.constant 0 : i32
    %c0_i32_0 = arith.constant 0 : i32
    %c0_i32_1 = arith.constant 0 : i32
    return %c0_i32, %c0_i32_0 : i32, i32
  }
  func.func @transform_25(%arg0: i32) -> (i32, i32) {
    %c0_i32 = arith.constant 0 : i32
    %c0_i32_0 = arith.constant 0 : i32
    %c0_i32_1 = arith.constant 0 : i32
    return %c0_i32, %c0_i32_0 : i32, i32
  }
  func.func @transform_26(%arg0: i32) -> (i32, i32) {
    %c0_i32 = arith.constant 0 : i32
    %c0_i32_0 = arith.constant 0 : i32
    %c0_i32_1 = arith.constant 0 : i32
    return %c0_i32, %c0_i32_0 : i32, i32
  }
  func.func @transform_27(%arg0: i32) -> (i32, i32) {
    %c0_i32 = arith.constant 0 : i32
    %c0_i32_0 = arith.constant 0 : i32
    %c0_i32_1 = arith.constant 0 : i32
    return %c0_i32, %c0_i32_0 : i32, i32
  }
  func.func @transform_28(%arg0: i32) -> (i32, i32) {
    %c0_i32 = arith.constant 0 : i32
    %c0_i32_0 = arith.constant 0 : i32
    %c0_i32_1 = arith.constant 0 : i32
    return %c0_i32, %c0_i32_0 : i32, i32
  }
  func.func @transform_29(%arg0: i32) -> (i32, i32) {
    %c0_i32 = arith.constant 0 : i32
    %c0_i32_0 = arith.constant 0 : i32
    %c0_i32_1 = arith.constant 0 : i32
    return %c0_i32, %c0_i32_0 : i32, i32
  }
}

</mosaic_0001>

<bundles_post_ra>
// kernel: tile.29
= control target key start
LH: loop header
LB: loop body
LE: loop exit
PB: predicated region body
PF: predicated region fallthrough
CT: control target
= control target key end

     0   :  { %vm6_vm0 = vcmask 1043458   ;;  %s11_s6 = smov 3  ;;  %s14_s7 = smov 12  ;;  %vm8_vm1 = vcmask 31744   ;;  %vm20_vm2 = vcmask 523744   ;;  %vm32_vm3 = vcmask 490944   ;;  %s383_s0 = inlined_call_operand.vmem [shape: f32[4,16,4], index: 0, kind: input, shape index: {}]   ;;  %s384_s1 = inlined_call_operand.vmem [shape: f32[4,64], index: 1, kind: output, shape index: {}]  }
   0x1   :  { %v198_v0 = vld [vmem:[%s383_s0 + $0xf] ss:$16 sm:%s11_s6]   ;;  %s35_s12 = smov 3  ;;  %s38_s15 = smov 12  ;;  %vm44_vm4 = vcmask 458144   ;;  %vm56_vm5 = vcmask 425344  }
   0x2   :  { %v199_v1 = vld [vmem:[%s383_s0 + $0xf] ss:$16 sm:%s14_s7]   ;;  %v202_v3 = vld [vmem:[%s383_s0 + $0xd] ss:$16 sm:%s35_s12]   ;;  %s243_s16 = smov 60   ;;  %s23_s19 = smov 3 }
   0x3   :  { %v17_v2 = vsel %vm6_vm0, %v199_v1, %v198_v0  ;;  %v203_v4 = vld [vmem:[%s383_s0 + $0xd] ss:$16 sm:%s38_s15]   ;;  %s26_s20 = smov 12  ;;  %v200_v6 = vld [vmem:[%s383_s0 + $0xe] ss:$16 sm:%s23_s19]   ;;  %s47_s25 = smov 3 }
   0x4   :  { %18 = vrot.lane.b32.xlu0 %v17_v2, %s243_s16  ;;  %v41_v5 = vsel %vm6_vm0, %v203_v4, %v202_v3  ;;  %v201_v7 = vld [vmem:[%s383_s0 + $0xe] ss:$16 sm:%s26_s20]   ;;  %s244_s26 = smov 52   ;;  %s50_s29 = smov 12  ;;  %vm68_vm6 = vcmask 392544   ;;  %vm80_vm7 = vcmask 359744  }
   0x5   :  { %42 = vrot.lane.b32.xlu1 %v41_v5, %s244_s26  ;;  %v29_v8 = vsel %vm6_vm0, %v201_v7, %v200_v6  ;;  %v204_v9 = vld [vmem:[%s383_s0 + $0xc] ss:$16 sm:%s47_s25]   ;;  %s59_s3 = smov 3  ;;  %s62_s4 = smov 12  ;;  %vm92_vm8 = vcmask 326944   ;;  %vm104_vm9 = vcmask 294144  }
   0x6   :  { %v205_v10 = vld [vmem:[%s383_s0 + $0xc] ss:$16 sm:%s50_s29]   ;;  %s245_s5 = smov 56   ;;  %v206_v12 = vld [vmem:[%s383_s0 + $0xb] ss:$16 sm:%s59_s3]   ;;  %s71_s8 = smov 3 }
   0x7   :  { %v53_v11 = vsel %vm6_vm0, %v205_v10, %v204_v9  ;;  %v207_v13 = vld [vmem:[%s383_s0 + $0xb] ss:$16 sm:%s62_s4]   ;;  %v208_v14 = vld [vmem:[%s383_s0 + $0xa] ss:$16 sm:%s71_s8]   ;;  %s74_s13 = smov 12  ;;  %s246_s14 = smov 48  }
   0x8   :  { %30 = vrot.lane.b32.xlu0 %v29_v8, %s245_s5  ;;  %v65_v15 = vsel %vm6_vm0, %v207_v13, %v206_v12  ;;  %v209_v16 = vld [vmem:[%s383_s0 + $0xa] ss:$16 sm:%s74_s13]   ;;  %s83_s17 = smov 3  ;;  %s86_s18 = smov 12  ;;  %vm116_vm10 = vcmask 261344   ;;  %vm128_vm11 = vcmask 228544  }
   0x9   :  { %54 = vrot.lane.b32.xlu1 %v53_v11, %s246_s14  ;;  %v77_v17 = vsel %vm6_vm0, %v209_v16, %v208_v14  ;;  %v210_v18 = vld [vmem:[%s383_s0 + $0x9] ss:$16 sm:%s83_s17]   ;;  %s95_s23 = smov 3  ;;  %s247_s24 = smov 44   ;;  %vm140_vm12 = vcmask 195744   ;;  %vm152_vm13 = vcmask 162944  }
   0xa   :  { %v211_v19 = vld [vmem:[%s383_s0 + $0x9] ss:$16 sm:%s86_s18]   ;;  %v212_v20 = vld [vmem:[%s383_s0 + $0x8] ss:$16 sm:%s95_s23]   ;;  %s98_s27 = smov 12  ;;  %s107_s30 = smov 3 }
   0xb   :  { %v89_v21 = vsel %vm6_vm0, %v211_v19, %v210_v18  ;;  %v213_v22 = vld [vmem:[%s383_s0 + $0x8] ss:$16 sm:%s98_s27]   ;;  %s110_s2 = smov 12  ;;  %s248_s3 = smov 40   ;;  %v214_v23 = vld [vmem:[%s383_s0 + $0x7] ss:$16 sm:%s107_s30]  }
   0xc   :  { %66 = vrot.lane.b32.xlu0 %v65_v15, %s247_s24  ;;  %s119_s6 = smov 3  ;;  %v101_v24 = vsel %vm6_vm0, %v213_v22, %v212_v20  ;;  %v215_v25 = vld [vmem:[%s383_s0 + $0x7] ss:$16 sm:%s110_s2]   ;;  %s122_s11 = smov 12  ;;  %vm164_vm14 = vcmask 130144   ;;  %vm176_vm15 = vcmask 97344  }
   0xd   :  { %78 = vrot.lane.b32.xlu1 %v77_v17, %s248_s3  ;;  %v216_v26 = vld [vmem:[%s383_s0 + $0x6] ss:$16 sm:%s119_s6]   ;;  %s249_s12 = smov 36   ;;  %s131_s15 = smov 3  ;;  %v113_v28 = vsel %vm6_vm0, %v215_v25, %v214_v23 }
   0xe   :  { %v217_v27 = vld [vmem:[%s383_s0 + $0x6] ss:$16 sm:%s122_s11]   ;;  %s134_s16 = smov 12  ;;  %v218_v29 = vld [vmem:[%s383_s0 + $0x5] ss:$16 sm:%s131_s15]   ;;  %s143_s19 = smov 3 }
   0xf   :  { %s250_s20 = smov 32   ;;  %v219_v30 = vld [vmem:[%s383_s0 + $0x5] ss:$16 sm:%s134_s16]   ;;  %s146_s23 = smov 12  ;;  %v125_v31 = vsel %vm6_vm0, %v217_v27, %v216_v26  ;;  %v220_v32 = vld [vmem:[%s383_s0 + $0x4] ss:$16 sm:%s143_s19]  }
  0x10   :  { %90 = vrot.lane.b32.xlu0 %v89_v21, %s249_s12  ;;  %s155_s26 = smov 3  ;;  %s158_s27 = smov 12  ;;  %v221_v33 = vld [vmem:[%s383_s0 + $0x4] ss:$16 sm:%s146_s23]   ;;  %v137_v34 = vsel %vm6_vm0, %v219_v30, %v218_v29 }
  0x11   :  { %102 = vrot.lane.b32.xlu1 %v101_v24, %s250_s20  ;;  %s251_s28 = smov 28   ;;  %s167_s2 = smov 3  ;;  %v222_v35 = vld [vmem:[%s383_s0 + $0x3] ss:$16 sm:%s155_s26]   ;;  %v149_v37 = vsel %vm6_vm0, %v221_v33, %v220_v32 }
  0x12   :  { %s170_s5 = smov 12  ;;  %s252_s6 = smov 24   ;;  %v223_v36 = vld [vmem:[%s383_s0 + $0x3] ss:$16 sm:%s158_s27]   ;;  %v224_v38 = vld [vmem:[%s383_s0 + $0x2] ss:$16 sm:%s167_s2]  }
  0x13   :  { %s179_s9 = smov 3  ;;  %v225_v39 = vld [vmem:[%s383_s0 + $0x2] ss:$16 sm:%s170_s5]   ;;  %s182_s14 = smov 12  ;;  %v161_v41 = vsel %vm6_vm0, %v223_v36, %v222_v35 }
  0x14   :  { %114 = vrot.lane.b32.xlu0 %v113_v28, %s251_s28  ;;  %s2_s15 = smov 3  ;;  %s253_s16 = smov 20   ;;  %v226_v42 = vld [vmem:[%s383_s0 + $0x1] ss:$16 sm:%s179_s9]   ;;  %v173_v46 = vsel %vm6_vm0, %v225_v39, %v224_v38 }
  0x15   :  { %126 = vrot.lane.b32.xlu1 %v125_v31, %s252_s6  ;;  %v3_v40 = vld [vmem:[%s383_s0] ss:$16 sm:%s2_s15]   ;;  %s4_s19 = smov 12  ;;  %s254_s24 = smov 16  }
  0x16   :  { %v5_v43 = vld [vmem:[%s383_s0] ss:$16 sm:%s4_s19]   ;;  %v227_v44 = vld [vmem:[%s383_s0 + $0x1] ss:$16 sm:%s182_s14]   ;;  %s255_s0 = smov 12   ;;  %s256_s27 = smov 8  }
  0x17   :  { %v7_v45 = vsel %vm6_vm0, %v5_v43, %v3_v40  ;;  %v185_v47 = vsel %vm6_vm0, %v227_v44, %v226_v42  ;;  %s257_s28 = smov 4   ;;  %vm188_vm0 = vcmask 64544  }
  0x18   :  { %138 = vrot.lane.b32.xlu0 %v137_v34, %s253_s16  ;;  %9 = vst.msk [vmem:[#allocation0] sm:$0xf] %vm8_vm1, %v7_v45  }
  0x19   :  { %150 = vrot.lane.b32.xlu1 %v149_v37, %s254_s24 }
  0x1c   :  { %162 = vrot.lane.b32.xlu0 %v161_v41, %s255_s0 }
  0x1d   :  { %174 = vrot.lane.b32.xlu1 %v173_v46, %s256_s27 }
  0x20   :  { %186 = vrot.lane.b32.xlu0 %v185_v47, %s257_s28 }
  0x76   :  { %v19_v48 = vpop.permute.xlu0 %18  }
  0x77   :  { %21 = vst.msk [vmem:[#allocation0] sm:$0xf] %vm20_vm2, %v19_v48   ;;  %v43_v49 = vpop.permute.xlu1 %42  }
  0x7a   :  { %v31_v50 = vpop.permute.xlu0 %30  }
  0x7b   :  { %33 = vst.msk [vmem:[#allocation0] sm:$0xf] %vm32_vm3, %v31_v50   ;;  %v55_v51 = vpop.permute.xlu1 %54  }
  0x7c   :  { %45 = vst.msk [vmem:[#allocation0] sm:$0xf] %vm44_vm4, %v43_v49  }
  0x7d   :  { %57 = vst.msk [vmem:[#allocation0] sm:$0xf] %vm56_vm5, %v55_v51  }
  0x7e   :  { %v67_v52 = vpop.permute.xlu0 %66  }
  0x7f   :  { %69 = vst.msk [vmem:[#allocation0] sm:$0xf] %vm68_vm6, %v67_v52   ;;  %v79_v53 = vpop.permute.xlu1 %78  }
  0x80   :  { %81 = vst.msk [vmem:[#allocation0] sm:$0xf] %vm80_vm7, %v79_v53  }
  0x82   :  { %v91_v54 = vpop.permute.xlu0 %90  }
  0x83   :  { %93 = vst.msk [vmem:[#allocation0] sm:$0xf] %vm92_vm8, %v91_v54   ;;  %v103_v55 = vpop.permute.xlu1 %102  }
  0x84   :  { %105 = vst.msk [vmem:[#allocation0] sm:$0xf] %vm104_vm9, %v103_v55  }
  0x86   :  { %v115_v56 = vpop.permute.xlu0 %114  }
  0x87   :  { %117 = vst.msk [vmem:[#allocation0] sm:$0xf] %vm116_vm10, %v115_v56   ;;  %v127_v57 = vpop.permute.xlu1 %126  }
  0x88   :  { %129 = vst.msk [vmem:[#allocation0] sm:$0xf] %vm128_vm11, %v127_v57  }
  0x8a   :  { %v139_v58 = vpop.permute.xlu0 %138  }
  0x8b   :  { %141 = vst.msk [vmem:[#allocation0] sm:$0xf] %vm140_vm12, %v139_v58   ;;  %v151_v59 = vpop.permute.xlu1 %150  }
  0x8c   :  { %153 = vst.msk [vmem:[#allocation0] sm:$0xf] %vm152_vm13, %v151_v59  }
  0x8e   :  { %v163_v60 = vpop.permute.xlu0 %162  }
  0x8f   :  { %165 = vst.msk [vmem:[#allocation0] sm:$0xf] %vm164_vm14, %v163_v60   ;;  %v175_v61 = vpop.permute.xlu1 %174  }
  0x90   :  { %177 = vst.msk [vmem:[#allocation0] sm:$0xf] %vm176_vm15, %v175_v61  }
  0x92   :  { %v187_v62 = vpop.permute.xlu0 %186  }
  0x93   :  { %189 = vst.msk [vmem:[#allocation0] sm:$0xf] %vm188_vm0, %v187_v62  }
  0x9a   :  { %v194_v63 = vld [vmem:[#allocation0] sm:$0xf] }
  0x9b   :  { %197 = vst [vmem:[%s384_s1] sm:$0xf] %v194_v63 }

// kernel: tile.39
= control target key start
LH: loop header
LB: loop body
LE: loop exit
PB: predicated region body
PF: predicated region fallthrough
CT: control target
= control target key end

     0   :  { %vm6_vm0 = vcmask 1043458   ;;  %vm10_vm1 = vcmask 1045508   ;;  %vm14_vm2 = vcmask 1047558   ;;  %s19_s6 = smov 3  ;;  %s22_s7 = smov 12  ;;  %vm16_vm3 = vcmask 64512   ;;  %s736_s0 = inlined_call_operand.vmem [shape: f32[8,16,8], index: 0, kind: input, shape index: {}]   ;;  %s737_s1 = inlined_call_operand.vmem [shape: f32[8,128], index: 1, kind: output, shape index: {}]  }
   0x1   :  { %v348_v0 = vld [vmem:[%s736_s0 + $0xf] ss:$16 sm:%s19_s6]   ;;  %s27_s12 = smov 48  ;;  %s32_s13 = smov 192  ;;  %vm38_vm4 = vcmask 1048512   ;;  %vm60_vm5 = vcmask 982912  }
   0x2   :  { %v349_v1 = vld [vmem:[%s736_s0 + $0xf] ss:$16 sm:%s22_s7]   ;;  %s63_s18 = smov 3  ;;  %s66_s21 = smov 12  ;;  %vm82_vm6 = vcmask 917312   ;;  %vm104_vm7 = vcmask 851712  }
   0x3   :  { %v25_v2 = vsel %vm6_vm0, %v349_v1, %v348_v0  ;;  %v350_v3 = vld [vmem:[%s736_s0 + $0xf] ss:$16 sm:%s27_s12]   ;;  %v356_v6 = vld [vmem:[%s736_s0 + $0xd] ss:$16 sm:%s63_s18]   ;;  %s71_s22 = smov 48  ;;  %s76_s27 = smov 192 }
   0x4   :  { %v351_v4 = vld [vmem:[%s736_s0 + $0xf] ss:$16 sm:%s32_s13]   ;;  %v30_v5 = vsel %vm10_vm1, %v350_v3, %v25_v2  ;;  %v357_v8 = vld [vmem:[%s736_s0 + $0xd] ss:$16 sm:%s66_s21]   ;;  %s423_s28 = smov 120   ;;  %s41_s2 = smov 3 }
   0x5   :  { %v35_v7 = vsel %vm14_vm2, %v351_v4, %v30_v5  ;;  %v358_v9 = vld [vmem:[%s736_s0 + $0xd] ss:$16 sm:%s71_s22]   ;;  %v69_v10 = vsel %vm6_vm0, %v357_v8, %v356_v6  ;;  %s44_s3 = smov 12  ;;  %v352_v13 = vld [vmem:[%s736_s0 + $0xe] ss:$16 sm:%s41_s2]   ;;  %s49_s8 = smov 48 }
   0x6   :  { %36 = vrot.lane.b32.xlu0 %v35_v7, %s423_s28  ;;  %v359_v11 = vld [vmem:[%s736_s0 + $0xd] ss:$16 sm:%s76_s27]   ;;  %v74_v12 = vsel %vm10_vm1, %v358_v9, %v69_v10  ;;  %s54_s9 = smov 192  ;;  %s85_s14 = smov 3  ;;  %vm126_vm8 = vcmask 786112   ;;  %vm148_vm9 = vcmask 720512  }
   0x7   :  { %v353_v14 = vld [vmem:[%s736_s0 + $0xe] ss:$16 sm:%s44_s3]   ;;  %v79_v15 = vsel %vm14_vm2, %v359_v11, %v74_v12  ;;  %s424_s15 = smov 104   ;;  %v360_v20 = vld [vmem:[%s736_s0 + $0xc] ss:$16 sm:%s85_s14]   ;;  %s88_s18 = smov 12 }
   0x8   :  { %v47_v16 = vsel %vm6_vm0, %v353_v14, %v352_v13  ;;  %v354_v17 = vld [vmem:[%s736_s0 + $0xe] ss:$16 sm:%s49_s8]   ;;  %80 = vrot.lane.b32.xlu1 %v79_v15, %s424_s15  ;;  %s93_s19 = smov 48  ;;  %s98_s24 = smov 192  ;;  %vm170_vm10 = vcmask 654912   ;;  %vm192_vm11 = vcmask 589312  }
   0x9   :  { %v355_v18 = vld [vmem:[%s736_s0 + $0xe] ss:$16 sm:%s54_s9]   ;;  %v52_v19 = vsel %vm10_vm1, %v354_v17, %v47_v16  ;;  %v361_v22 = vld [vmem:[%s736_s0 + $0xc] ss:$16 sm:%s88_s18]   ;;  %s425_s25 = smov 112   ;;  %s107_s28 = smov 3 }
   0xa   :  { %v57_v21 = vsel %vm14_vm2, %v355_v18, %v52_v19  ;;  %v362_v23 = vld [vmem:[%s736_s0 + $0xc] ss:$16 sm:%s93_s19]   ;;  %v91_v24 = vsel %vm6_vm0, %v361_v22, %v360_v20  ;;  %s110_s29 = smov 12  ;;  %v364_v27 = vld [vmem:[%s736_s0 + $0xb] ss:$16 sm:%s107_s28]   ;;  %s115_s5 = smov 48 }
   0xb   :  { %58 = vrot.lane.b32.xlu0 %v57_v21, %s425_s25  ;;  %v363_v25 = vld [vmem:[%s736_s0 + $0xc] ss:$16 sm:%s98_s24]   ;;  %v96_v26 = vsel %vm10_vm1, %v362_v23, %v91_v24  ;;  %s120_s6 = smov 192  ;;  %s129_s11 = smov 3  ;;  %vm214_vm12 = vcmask 523712   ;;  %vm236_vm13 = vcmask 458112  }
   0xc   :  { %v365_v28 = vld [vmem:[%s736_s0 + $0xb] ss:$16 sm:%s110_s29]   ;;  %v101_v29 = vsel %vm14_vm2, %v363_v25, %v96_v26  ;;  %s426_s12 = smov 96   ;;  %v368_v34 = vld [vmem:[%s736_s0 + $0xa] ss:$16 sm:%s129_s11]   ;;  %s132_s15 = smov 12 }
   0xd   :  { %v113_v30 = vsel %vm6_vm0, %v365_v28, %v364_v27  ;;  %v366_v31 = vld [vmem:[%s736_s0 + $0xb] ss:$16 sm:%s115_s5]   ;;  %102 = vrot.lane.b32.xlu1 %v101_v29, %s426_s12  ;;  %s137_s16 = smov 48  ;;  %s142_s21 = smov 192  ;;  %vm258_vm14 = vcmask 392512   ;;  %vm280_vm15 = vcmask 326912  }
   0xe   :  { %v367_v32 = vld [vmem:[%s736_s0 + $0xb] ss:$16 sm:%s120_s6]   ;;  %v118_v33 = vsel %vm10_vm1, %v366_v31, %v113_v30  ;;  %v369_v36 = vld [vmem:[%s736_s0 + $0xa] ss:$16 sm:%s132_s15]   ;;  %s427_s22 = smov 88   ;;  %s151_s25 = smov 3 }
   0xf   :  { %v123_v35 = vsel %vm14_vm2, %v367_v32, %v118_v33  ;;  %v370_v37 = vld [vmem:[%s736_s0 + $0xa] ss:$16 sm:%s137_s16]   ;;  %v135_v38 = vsel %vm6_vm0, %v369_v36, %v368_v34  ;;  %s154_s26 = smov 12  ;;  %v372_v41 = vld [vmem:[%s736_s0 + $0x9] ss:$16 sm:%s151_s25]   ;;  %s159_s2 = smov 48 }
  0x10   :  { %124 = vrot.lane.b32.xlu0 %v123_v35, %s427_s22  ;;  %v371_v39 = vld [vmem:[%s736_s0 + $0xa] ss:$16 sm:%s142_s21]   ;;  %v140_v40 = vsel %vm10_vm1, %v370_v37, %v135_v38  ;;  %s164_s3 = smov 192  ;;  %s173_s8 = smov 3 }
  0x11   :  { %v373_v42 = vld [vmem:[%s736_s0 + $0x9] ss:$16 sm:%s154_s26]   ;;  %v145_v43 = vsel %vm14_vm2, %v371_v39, %v140_v40  ;;  %s428_s9 = smov 80   ;;  %v376_v48 = vld [vmem:[%s736_s0 + $0x8] ss:$16 sm:%s173_s8]   ;;  %s176_s12 = smov 12 }
  0x12   :  { %v157_v44 = vsel %vm6_vm0, %v373_v42, %v372_v41  ;;  %v374_v45 = vld [vmem:[%s736_s0 + $0x9] ss:$16 sm:%s159_s2]   ;;  %146 = vrot.lane.b32.xlu1 %v145_v43, %s428_s9  ;;  %s181_s13 = smov 48  ;;  %s186_s18 = smov 192 }
  0x13   :  { %v375_v46 = vld [vmem:[%s736_s0 + $0x9] ss:$16 sm:%s164_s3]   ;;  %v162_v47 = vsel %vm10_vm1, %v374_v45, %v157_v44  ;;  %v377_v50 = vld [vmem:[%s736_s0 + $0x8] ss:$16 sm:%s176_s12]   ;;  %s429_s19 = smov 72   ;;  %s195_s22 = smov 3 }
  0x14   :  { %v167_v49 = vsel %vm14_vm2, %v375_v46, %v162_v47  ;;  %v378_v51 = vld [vmem:[%s736_s0 + $0x8] ss:$16 sm:%s181_s13]   ;;  %v179_v52 = vsel %vm6_vm0, %v377_v50, %v376_v48  ;;  %s198_s23 = smov 12  ;;  %v380_v55 = vld [vmem:[%s736_s0 + $0x7] ss:$16 sm:%s195_s22]   ;;  %s203_s28 = smov 48 }
  0x15   :  { %168 = vrot.lane.b32.xlu0 %v167_v49, %s429_s19  ;;  %v379_v53 = vld [vmem:[%s736_s0 + $0x8] ss:$16 sm:%s186_s18]   ;;  %v184_v54 = vsel %vm10_vm1, %v378_v51, %v179_v52  ;;  %s208_s29 = smov 192  ;;  %s217_s5 = smov 3 }
  0x16   :  { %v381_v56 = vld [vmem:[%s736_s0 + $0x7] ss:$16 sm:%s198_s23]   ;;  %v189_v57 = vsel %vm14_vm2, %v379_v53, %v184_v54  ;;  %s430_s6 = smov 64   ;;  %v384_v62 = vld [vmem:[%s736_s0 + $0x6] ss:$16 sm:%s217_s5]   ;;  %s220_s9 = smov 12 }
  0x17   :  { %v201_v58 = vsel %vm6_vm0, %v381_v56, %v380_v55  ;;  %v382_v59 = vld [vmem:[%s736_s0 + $0x7] ss:$16 sm:%s203_s28]   ;;  %190 = vrot.lane.b32.xlu1 %v189_v57, %s430_s6  ;;  %s225_s10 = smov 48  ;;  %s230_s15 = smov 192 }
  0x18   :  { %v383_v60 = vld [vmem:[%s736_s0 + $0x7] ss:$16 sm:%s208_s29]   ;;  %v206_v61 = vsel %vm10_vm1, %v382_v59, %v201_v58  ;;  %v385_v0 = vld [vmem:[%s736_s0 + $0x6] ss:$16 sm:%s220_s9]   ;;  %s431_s16 = smov 56   ;;  %s239_s19 = smov 3 }
  0x19   :  { %v211_v63 = vsel %vm14_vm2, %v383_v60, %v206_v61  ;;  %v386_v1 = vld [vmem:[%s736_s0 + $0x6] ss:$16 sm:%s225_s10]   ;;  %v223_v2 = vsel %vm6_vm0, %v385_v0, %v384_v62  ;;  %s242_s20 = smov 12  ;;  %v388_v5 = vld [vmem:[%s736_s0 + $0x5] ss:$16 sm:%s239_s19]   ;;  %s247_s25 = smov 48 }
  0x1a   :  { %212 = vrot.lane.b32.xlu0 %v211_v63, %s431_s16  ;;  %v387_v3 = vld [vmem:[%s736_s0 + $0x6] ss:$16 sm:%s230_s15]   ;;  %v228_v4 = vsel %vm10_vm1, %v386_v1, %v223_v2  ;;  %s252_s26 = smov 192  ;;  %s261_s2 = smov 3 }
  0x1b   :  { %v389_v6 = vld [vmem:[%s736_s0 + $0x5] ss:$16 sm:%s242_s20]   ;;  %v233_v7 = vsel %vm14_vm2, %v387_v3, %v228_v4  ;;  %s432_s3 = smov 48   ;;  %v392_v12 = vld [vmem:[%s736_s0 + $0x4] ss:$16 sm:%s261_s2]   ;;  %s264_s6 = smov 12 }
  0x1c   :  { %v245_v8 = vsel %vm6_vm0, %v389_v6, %v388_v5  ;;  %v390_v9 = vld [vmem:[%s736_s0 + $0x5] ss:$16 sm:%s247_s25]   ;;  %234 = vrot.lane.b32.xlu1 %v233_v7, %s432_s3  ;;  %s269_s7 = smov 48  ;;  %s274_s12 = smov 192 }
  0x1d   :  { %v391_v10 = vld [vmem:[%s736_s0 + $0x5] ss:$16 sm:%s252_s26]   ;;  %v250_v11 = vsel %vm10_vm1, %v390_v9, %v245_v8  ;;  %v393_v14 = vld [vmem:[%s736_s0 + $0x4] ss:$16 sm:%s264_s6]   ;;  %s433_s13 = smov 40   ;;  %s283_s16 = smov 3 }
  0x1e   :  { %v255_v13 = vsel %vm14_vm2, %v391_v10, %v250_v11  ;;  %v394_v15 = vld [vmem:[%s736_s0 + $0x4] ss:$16 sm:%s269_s7]   ;;  %v267_v16 = vsel %vm6_vm0, %v393_v14, %v392_v12  ;;  %s286_s17 = smov 12  ;;  %v396_v19 = vld [vmem:[%s736_s0 + $0x3] ss:$16 sm:%s283_s16]   ;;  %s291_s22 = smov 48 }
  0x1f   :  { %256 = vrot.lane.b32.xlu0 %v255_v13, %s433_s13  ;;  %v395_v17 = vld [vmem:[%s736_s0 + $0x4] ss:$16 sm:%s274_s12]   ;;  %v272_v18 = vsel %vm10_vm1, %v394_v15, %v267_v16  ;;  %s296_s23 = smov 192  ;;  %s305_s28 = smov 3 }
  0x20   :  { %v397_v20 = vld [vmem:[%s736_s0 + $0x3] ss:$16 sm:%s286_s17]   ;;  %v277_v21 = vsel %vm14_vm2, %v395_v17, %v272_v18  ;;  %s434_s29 = smov 32   ;;  %v400_v26 = vld [vmem:[%s736_s0 + $0x2] ss:$16 sm:%s305_s28]   ;;  %s308_s3 = smov 12 }
  0x21   :  { %v289_v22 = vsel %vm6_vm0, %v397_v20, %v396_v19  ;;  %v398_v23 = vld [vmem:[%s736_s0 + $0x3] ss:$16 sm:%s291_s22]   ;;  %278 = vrot.lane.b32.xlu1 %v277_v21, %s434_s29  ;;  %s313_s4 = smov 48  ;;  %s318_s9 = smov 192 }
  0x22   :  { %v399_v24 = vld [vmem:[%s736_s0 + $0x3] ss:$16 sm:%s296_s23]   ;;  %v294_v25 = vsel %vm10_vm1, %v398_v23, %v289_v22  ;;  %v401_v28 = vld [vmem:[%s736_s0 + $0x2] ss:$16 sm:%s308_s3]   ;;  %s435_s10 = smov 24   ;;  %s327_s13 = smov 3 }
  0x23   :  { %v299_v27 = vsel %vm14_vm2, %v399_v24, %v294_v25  ;;  %v402_v29 = vld [vmem:[%s736_s0 + $0x2] ss:$16 sm:%s313_s4]   ;;  %v311_v30 = vsel %vm6_vm0, %v401_v28, %v400_v26  ;;  %s330_s14 = smov 12  ;;  %v404_v33 = vld [vmem:[%s736_s0 + $0x1] ss:$16 sm:%s327_s13]   ;;  %s335_s19 = smov 48 }
  0x24   :  { %300 = vrot.lane.b32.xlu0 %v299_v27, %s435_s10  ;;  %v403_v31 = vld [vmem:[%s736_s0 + $0x2] ss:$16 sm:%s318_s9]   ;;  %v316_v32 = vsel %vm10_vm1, %v402_v29, %v311_v30  ;;  %s340_s20 = smov 192  ;;  %s2_s25 = smov 3 }
  0x25   :  { %v405_v34 = vld [vmem:[%s736_s0 + $0x1] ss:$16 sm:%s330_s14]   ;;  %v321_v35 = vsel %vm14_vm2, %v403_v31, %v316_v32  ;;  %s436_s26 = smov 16   ;;  %s4_s27 = smov 12  ;;  %v3_v40 = vld [vmem:[%s736_s0] ss:$16 sm:%s2_s25]  }
  0x26   :  { %v333_v36 = vsel %vm6_vm0, %v405_v34, %v404_v33  ;;  %v406_v37 = vld [vmem:[%s736_s0 + $0x1] ss:$16 sm:%s335_s19]   ;;  %322 = vrot.lane.b32.xlu1 %v321_v35, %s436_s26  ;;  %s8_s28 = smov 48  ;;  %s12_s2 = smov 192 }
  0x27   :  { %v407_v38 = vld [vmem:[%s736_s0 + $0x1] ss:$16 sm:%s340_s20]   ;;  %v338_v39 = vsel %vm10_vm1, %v406_v37, %v333_v36  ;;  %v5_v42 = vld [vmem:[%s736_s0] ss:$16 sm:%s4_s27]   ;;  %s437_s7 = smov 8  }
  0x28   :  { %v343_v41 = vsel %vm14_vm2, %v407_v38, %v338_v39  ;;  %v9_v43 = vld [vmem:[%s736_s0] ss:$16 sm:%s8_s28]   ;;  %v7_v44 = vsel %vm6_vm0, %v5_v42, %v3_v40  ;;  %vm302_vm0 = vcmask 261312  }
  0x29   :  { %344 = vrot.lane.b32.xlu0 %v343_v41, %s437_s7  ;;  %v13_v45 = vld [vmem:[%s736_s0] ss:$16 sm:%s12_s2]   ;;  %v11_v46 = vsel %vm10_vm1, %v9_v43, %v7_v44  ;;  %vm324_vm1 = vcmask 195712  }
  0x2a   :  { %v15_v47 = vsel %vm14_vm2, %v13_v45, %v11_v46  ;;  %vm346_vm2 = vcmask 130112  }
  0x2b   :  { %17 = vst.msk [vmem:[%s737_s1] sm:$0xff] %vm16_vm3, %v15_v47  }
  0x78   :  { %v37_v48 = vpop.permute.xlu0 %36  }
  0x79   :  { %39 = vst.msk [vmem:[%s737_s1] sm:$0xff] %vm38_vm4, %v37_v48  }
  0x7a   :  { %v81_v49 = vpop.permute.xlu1 %80  }
  0x7d   :  { %v59_v50 = vpop.permute.xlu0 %58  }
  0x7e   :  { %61 = vst.msk [vmem:[%s737_s1] sm:$0xff] %vm60_vm5, %v59_v50  }
  0x7f   :  { %83 = vst.msk [vmem:[%s737_s1] sm:$0xff] %vm82_vm6, %v81_v49   ;;  %v103_v51 = vpop.permute.xlu1 %102  }
  0x80   :  { %105 = vst.msk [vmem:[%s737_s1] sm:$0xff] %vm104_vm7, %v103_v51  }
  0x82   :  { %v125_v52 = vpop.permute.xlu0 %124  }
  0x83   :  { %127 = vst.msk [vmem:[%s737_s1] sm:$0xff] %vm126_vm8, %v125_v52  }
  0x84   :  { %v147_v53 = vpop.permute.xlu1 %146  }
  0x85   :  { %149 = vst.msk [vmem:[%s737_s1] sm:$0xff] %vm148_vm9, %v147_v53  }
  0x87   :  { %v169_v54 = vpop.permute.xlu0 %168  }
  0x88   :  { %171 = vst.msk [vmem:[%s737_s1] sm:$0xff] %vm170_vm10, %v169_v54  }
  0x89   :  { %v191_v55 = vpop.permute.xlu1 %190  }
  0x8a   :  { %193 = vst.msk [vmem:[%s737_s1] sm:$0xff] %vm192_vm11, %v191_v55  }
  0x8c   :  { %v213_v56 = vpop.permute.xlu0 %212  }
  0x8d   :  { %215 = vst.msk [vmem:[%s737_s1] sm:$0xff] %vm214_vm12, %v213_v56  }
  0x8e   :  { %v235_v57 = vpop.permute.xlu1 %234  }
  0x8f   :  { %237 = vst.msk [vmem:[%s737_s1] sm:$0xff] %vm236_vm13, %v235_v57  }
  0x91   :  { %v257_v58 = vpop.permute.xlu0 %256  }
  0x92   :  { %259 = vst.msk [vmem:[%s737_s1] sm:$0xff] %vm258_vm14, %v257_v58  }
  0x93   :  { %v279_v59 = vpop.permute.xlu1 %278  }
  0x94   :  { %281 = vst.msk [vmem:[%s737_s1] sm:$0xff] %vm280_vm15, %v279_v59  }
  0x96   :  { %v301_v60 = vpop.permute.xlu0 %300  }
  0x97   :  { %303 = vst.msk [vmem:[%s737_s1] sm:$0xff] %vm302_vm0, %v301_v60  }
  0x98   :  { %v323_v61 = vpop.permute.xlu1 %322  }
  0x99   :  { %325 = vst.msk [vmem:[%s737_s1] sm:$0xff] %vm324_vm1, %v323_v61  }
  0x9b   :  { %v345_v62 = vpop.permute.xlu0 %344  }
  0x9c   :  { %347 = vst.msk [vmem:[%s737_s1] sm:$0xff] %vm346_vm2, %v345_v62  }

// kernel: rsu4f_forward.1
= control target key start
LH: loop header
LB: loop body
LE: loop exit
PB: predicated region body
PF: predicated region fallthrough
CT: control target
= control target key end

     0   :  { %s8896_s3 = smov 1   ;;  %vm170_vm0 = vcmask 523264   ;;  %s8897_s10 = smov 7   ;;  %v8902_v14 = vmov 0.0   ;;  %vm8904_vm1 = vmmov 0   ;;  %vm398_vm2 = vcmask 522240   ;;  %s10337_s0 = inlined_call_operand.smem [shape: u32[30], index: -1, kind: input, shape index: {}] }
   0x1   :  { %s8935_s6 = sld [smem:[%s10337_s0 + %s8896_s3]]   ;;  %s8898_s14 = smov 10   ;;  %vm404_vm3 = vcmask 1046528   ;;  %vm637_vm4 = vcmask 1043456   ;;  %vm633_vm5 = vcmask 31744   ;;  %vm1293_vm6 = vcmask 64512  }
   0x2   :  { %s1_s9 = sld [smem:[%s10337_s0]]   ;;  %s8899_s18 = smov 13   ;;  %vm1817_vm7 = vcmask 1045504  }
   0x3   :  { %s8950_s13 = sld [smem:[%s10337_s0 + %s8897_s10]]   ;;  %s8900_s22 = smov 16  }
   0x4   :  { %s8965_s17 = sld [smem:[%s10337_s0 + %s8898_s14]]   ;;  %s8901_s26 = smov 19  }
   0x5   :  { %s8971_s21 = sld [smem:[%s10337_s0 + %s8899_s18]]   ;;  %s8903_s30 = smov 25  }
   0x6   :  { %s8976_s25 = sld [smem:[%s10337_s0 + %s8900_s22]]   ;;  %s8905_s4 = smov 22  }
   0x7   :  { %v8638_v0 = vld [vmem:[%s8935_s6 + $0x38] sm:$0xff]   ;;  %v8640_v2 = vld [vmem:[%s8935_s6 + $0x30] sm:$0xff]   ;;  %v8642_v4 = vld [vmem:[%s8935_s6 + $0x28] sm:$0xff]   ;;  %s8981_s29 = sld [smem:[%s10337_s0 + %s8901_s26]]   ;;  %s8906_s8 = smov 26  }
   0x8   :  { %v8639_v1 = vld [vmem:[%s8935_s6 + $0x18] sm:$0xff]   ;;  %7779 = vmatprep.subr.bf16.mxu0 %v8638_v0  ;;  %v8641_v3 = vld [vmem:[%s8935_s6 + $0x10] sm:$0xff]   ;;  %v8643_v5 = vld [vmem:[%s8935_s6 + $0x8] sm:$0xff]   ;;  %s8987_s3 = sld [smem:[%s10337_s0 + %s8903_s30]]   ;;  %s8907_s12 = smov 4  }
   0x9   :  { %7780 = vmatpush3.bf16.msra.mxu0 %v8638_v0  ;;  %7791 = vmatprep.subr.bf16.mxu1 %v8639_v1  ;;  %v8644_v6 = vld [vmem:[%s8935_s6 + $0x20] sm:$0xff]   ;;  %v8648_v9 = vld [vmem:[%s8935_s6 + $0x58] sm:$0xff]   ;;  %v8647_v10 = vld [vmem:[%s1_s9 + $0x8] sm:$0xff]   ;;  %s9009_s7 = sld [smem:[%s10337_s0 + %s8905_s4]]   ;;  %s8908_s18 = smov 2  }
   0xa   :  { %7781 = vmatprep.subr.bf16.mxu0 %v8640_v2  ;;  %7792 = vmatpush3.bf16.msra.mxu1 %v8639_v1  ;;  %v8645_v7 = vld [vmem:[%s1_s9] sm:$0xff]   ;;  %v8649_v11 = vld [vmem:[%s8935_s6 + $0x50] sm:$0xff]   ;;  %v8650_v12 = vld [vmem:[%s8935_s6 + $0x48] sm:$0xff]   ;;  %s9071_s11 = sld [smem:[%s10337_s0 + %s8906_s8]]   ;;  %s8909_s23 = smov 3  }
   0xb   :  { %7793 = vmatprep.subr.bf16.mxu1 %v8641_v3  ;;  %v8646_v8 = vld [vmem:[%s8935_s6] sm:$0xff]   ;;  %7787 = vmatprep.mubr.msk.bf16.mxu0 %vm170_vm0, %v8645_v7  ;;  %s9079_s16 = sld [smem:[%s10337_s0 + %s8907_s12]]   ;;  %s8910_s28 = smov 27  }
   0xc   :  { %7799 = vmatprep.mubr.msk.bf16.mxu1 %vm170_vm0, %v8645_v7  ;;  %v8651_v13 = vld [vmem:[%s8935_s6 + $0x40] sm:$0xff]   ;;  %s6503_s22 = sld [smem:[%s10337_s0 + %s8908_s18]]   ;;  %s8911_s4 = smov 28  }
   0xd   :  { %7782 = vmatpush3.bf16.msra.mxu0 %v8640_v2  ;;  %s6504_s27 = sld [smem:[%s10337_s0 + %s8909_s23]]   ;;  %s8912_s9 = smov 5  }
   0xe   :  { %7783 = vmatprep.subr.bf16.mxu0 %v8642_v4  ;;  %7794 = vmatpush3.bf16.msra.mxu1 %v8641_v3  ;;  %v474_v15 = vld [vmem:[%s8987_s3 + $0x38] sm:$0xff]  ;;  %v473_v16 = vld [vmem:[%s8987_s3 + $0x30] sm:$0xff]  ;;  %v472_v17 = vld [vmem:[%s8987_s3 + $0x28] sm:$0xff]  ;;  %s9137_s2 = sld [smem:[%s10337_s0 + %s8910_s28]]   ;;  %s8913_s15 = smov 6  }
   0xf   :  { %7795 = vmatprep.subr.bf16.mxu1 %v8643_v5  ;;  %v471_v18 = vld [vmem:[%s8987_s3 + $0x20] sm:$0xff]  ;;  %v470_v19 = vld [vmem:[%s8987_s3 + $0x18] sm:$0xff]  ;;  %v469_v20 = vld [vmem:[%s8987_s3 + $0x10] sm:$0xff]  ;;  %s9277_s8 = sld [smem:[%s10337_s0 + %s8911_s4]]   ;;  %s8915_s24 = smov 9  }
  0x10   :  { %v468_v21 = vld [vmem:[%s8987_s3 + $0x8] sm:$0xff]  ;;  %v467_v22 = vld [vmem:[%s8987_s3] sm:$0xff]  ;;  %s6506_s14 = sld [smem:[%s10337_s0 + %s8912_s9]]   ;;  %s8917_s5 = smov 12  }
  0x11   :  { %7784 = vmatpush3.bf16.msra.mxu0 %v8642_v4  ;;  %s6507_s19 = sld [smem:[%s10337_s0 + %s8913_s15]]   ;;  %s8923_s30 = smov 21  }
  0x12   :  { %7785 = vmatprep.subr.bf16.mxu0 %v8644_v6  ;;  %7796 = vmatpush3.bf16.msra.mxu1 %v8643_v5  ;;  %s6510_s28 = sld [smem:[%s10337_s0 + %s8915_s24]]  }
  0x13   :  { %7797 = vmatprep.subr.bf16.mxu1 %v8646_v8  ;;  %s6513_s10 = sld [smem:[%s10337_s0 + %s8917_s5]]  }
  0x14   :  { %s6522_s5 = sld [smem:[%s10337_s0 + %s8923_s30]]  }
  0x15   :  { %7786 = vmatpush3.bf16.msra.mxu0 %v8644_v6 }
  0x16   :  { %7798 = vmatpush3.bf16.msra.mxu1 %v8646_v8  ;;  %7803 = vmatprep.subr.bf16.mxu0 %v8648_v9 }
  0x17   :  { %7815 = vmatprep.subr.mxu1 %v8902_v14 }
  0x18   :  { %7788 = vmatmul.mubr.msk.bf16.vlgmr.msra.gmra.mxu0 %vm170_vm0, %v8647_v10 }
  0x19   :  { %7804 = vmatpush3.bf16.msra.mxu0 %v8648_v9  ;;  %7800 = vmatmul.mubr.msk.bf16.vlgmr.msra.gmra.mxu1 %vm170_vm0, %v8647_v10 }
  0x1a   :  { %7805 = vmatprep.subr.bf16.mxu0 %v8649_v11  ;;  %7811 = vmatprep.mubr.msk.bf16.mxu0 %vm170_vm0, %v8645_v7 }
  0x1b   :  { %7831 = vmatprep.mubr.msk.f32.mxu1 %vm8904_vm1, %v8902_v14  ;;  %7816 = vmatpush3.msra.mxu1 %v474_v15 }
  0x1c   :  { %7817 = vmatprep.subr.mxu1 %v8902_v14 }
  0x1d   :  { %7806 = vmatpush3.bf16.msra.mxu0 %v8649_v11  ;;  %7818 = vmatpush3.msra.mxu1 %v473_v16 }
  0x1e   :  { %7807 = vmatprep.subr.bf16.mxu0 %v8650_v12  ;;  %7819 = vmatprep.subr.mxu1 %v8902_v14 }
  0x1f   :  { %7820 = vmatpush3.msra.mxu1 %v472_v17 }
  0x20   :  { %7821 = vmatprep.subr.mxu1 %v8902_v14 }
  0x21   :  { %7808 = vmatpush3.bf16.msra.mxu0 %v8650_v12  ;;  %7822 = vmatpush3.msra.mxu1 %v471_v18 }
  0x22   :  { %7809 = vmatprep.subr.bf16.mxu0 %v8651_v13  ;;  %7823 = vmatprep.subr.mxu1 %v8902_v14 }
  0x23   :  { %7824 = vmatpush3.msra.mxu1 %v470_v19 }
  0x24   :  { %7825 = vmatprep.subr.mxu1 %v8902_v14 }
  0x25   :  { %7810 = vmatpush3.bf16.msra.mxu0 %v8651_v13  ;;  %7826 = vmatpush3.msra.mxu1 %v469_v20 }
  0x26   :  { %7834 = vmatprep.subr.mxu0 %v8902_v14  ;;  %7827 = vmatprep.subr.mxu1 %v8902_v14 }
  0x27   :  { %7828 = vmatpush3.msra.mxu1 %v468_v21 }
  0x28   :  { %7812 = vmatmul.mubr.msk.bf16.vlgmr.msra.gmra.mxu0 %vm170_vm0, %v8647_v10  ;;  %7829 = vmatprep.subr.mxu1 %v8902_v14 }
  0x29   :  { %7850 = vmatprep.mubr.msk.f32.mxu0 %vm8904_vm1, %v8902_v14  ;;  %7835 = vmatpush3.msra.mxu0 %v474_v15 }
  0x2a   :  { %7836 = vmatprep.subr.mxu0 %v8902_v14  ;;  %7830 = vmatpush3.msra.mxu1 %v467_v22 }
  0x2b   :  { %7837 = vmatpush3.msra.mxu0 %v473_v16  ;;  %7853 = vmatprep.subr.mxu1 %v8902_v14 }
  0x2c   :  { %7838 = vmatprep.subr.mxu0 %v8902_v14 }
  0x2d   :  { %7839 = vmatpush3.msra.mxu0 %v472_v17 }
  0x2e   :  { %7840 = vmatprep.subr.mxu0 %v8902_v14 }
  0x2f   :  { %7841 = vmatpush3.msra.mxu0 %v471_v18 }
  0x30   :  { %7842 = vmatprep.subr.mxu0 %v8902_v14 }
  0x31   :  { %7843 = vmatpush3.msra.mxu0 %v470_v19 }
  0x32   :  { %7844 = vmatprep.subr.mxu0 %v8902_v14 }
  0x33   :  { %7845 = vmatpush3.msra.mxu0 %v469_v20 }
  0x34   :  { %7846 = vmatprep.subr.mxu0 %v8902_v14 }
  0x35   :  { %7847 = vmatpush3.msra.mxu0 %v468_v21 }
  0x36   :  { %7848 = vmatprep.subr.mxu0 %v8902_v14 }
  0x37   :  { %7849 = vmatpush3.msra.mxu0 %v467_v22 }
  0xd8   :  { %v7789_v23 = vpop.f32.mrf.mxu0 }
  0xd9   :  { %228 = vst.msk [vmem:[#allocation2 + $0x10] sm:$0xff] %vm170_vm0, %v7789_v23  ;;  %v7801_v25 = vpop.f32.mrf.mxu1 }
  0xda   :  { %v211_v24 = vpop.f32.mrf.mxu0 }
  0xdb   :  { %226 = vst.msk [vmem:[#allocation2] sm:$0xff] %vm170_vm0, %v211_v24  ;;  %v296_v27 = vpop.f32.mrf.mxu1 }
  0xdc   :  { %v7790_v26 = vpop.f32.mrf.mxu0 }
  0xdd   :  { %229 = vst.msk [vmem:[#allocation2 + $0x18] sm:$0xff] %vm170_vm0, %v7790_v26  ;;  %v7802_v29 = vpop.f32.mrf.mxu1 }
  0xde   :  { %v214_v28 = vpop.f32.mrf.mxu0 }
  0xdf   :  { %227 = vst.msk [vmem:[#allocation2 + $0x8] sm:$0xff] %vm170_vm0, %v214_v28  ;;  %v299_v35 = vpop.f32.mrf.mxu1  ;;  %v632_v28 = vld [vmem:[%s9071_s11] sm:$0xf] }
  0xe4   :  { %v414_v30 = vld [vmem:[#allocation2 + $0x11] sm:$0xff]  ;;  %v415_v31 = vld [vmem:[#allocation2 + $0x19] sm:$0x7f] }
  0xe5   :  { %v416_v32 = vadd.f32 %v7801_v25, %v414_v30  ;;  %v417_v33 = vadd.f32 %v7802_v29, %v415_v31  ;;  %v8653_v29 = vld [vmem:[%s9079_s16 + $0x18] sm:$0xff]  }
  0xe6   :  { %v393_v34 = vld [vmem:[#allocation2 + $0x1] sm:$0xff]  ;;  %v394_v36 = vld [vmem:[#allocation2 + $0x9] sm:$0x7f]  ;;  %7875 = vmatprep.subr.bf16.mxu0 %v8653_v29 }
  0xe7   :  { %418 = vst.msk [vmem:[#allocation2 + $0x11] sm:$0xff] %vm170_vm0, %v416_v32  ;;  %v395_v37 = vadd.f32 %v393_v34, %v296_v27  ;;  %v396_v38 = vadd.f32 %v394_v36, %v299_v35 }
  0xe8   :  { %419 = vst.msk [vmem:[#allocation2 + $0x19] sm:$0x7f] %vm398_vm2, %v417_v33  ;;  %v7813_v39 = vpop.f32.mrf.mxu0 }
  0xe9   :  { %397 = vst.msk [vmem:[#allocation2 + $0x1] sm:$0xff] %vm170_vm0, %v395_v37  ;;  %v424_v42 = vrot.slane %v7813_v39, 1  ;;  %v625_v39 = vld [vmem:[%s6503_s22] sm:$0x1]  ;;  %s8921_s22 = smov 18  }
  0xea   :  { %399 = vst.msk [vmem:[#allocation2 + $0x9] sm:$0x7f] %vm398_vm2, %v396_v38  ;;  %v378_v40 = vpop.f32.mrf.mxu0  ;;  %s6519_s26 = sld [smem:[%s10337_s0 + %s8921_s22]]  }
  0xeb   :  { %v405_v47 = vrot.slane %v378_v40, 1 }
  0xec   :  { %v7814_v41 = vpop.f32.mrf.mxu0 }
  0xed   :  { %v425_v43 = vrot.slane %v7814_v41, 1 }
  0xee   :  { %v420_v44 = vld [vmem:[#allocation2 + $0x10] sm:$0xff]  ;;  %v381_v46 = vpop.f32.mrf.mxu0 }
  0xef   :  { %v421_v45 = vld [vmem:[#allocation2 + $0x18] sm:$0x7f]  ;;  %v426_v48 = vsel %vm404_vm3, %v424_v42, %v425_v43  ;;  %v406_v50 = vrot.slane %v381_v46, 1  ;;  %v8654_v46 = vld [vmem:[%s9079_s16 + $0x30] sm:$0xff]  }
  0xf0   :  { %v430_v49 = vadd.f32 %v425_v43, %v421_v45  ;;  %v429_v51 = vadd.f32 %v426_v48, %v420_v44  ;;  %v400_v52 = vld [vmem:[#allocation2] sm:$0xff]  ;;  %v8652_v42 = vld [vmem:[%s9079_s16 + $0x38] sm:$0xff]   ;;  %v8656_v48 = vld [vmem:[%s9079_s16 + $0x28] sm:$0xff]  }
  0xf1   :  { %v401_v53 = vld [vmem:[#allocation2 + $0x8] sm:$0x7f]  ;;  %v407_v54 = vsel %vm404_vm3, %v405_v47, %v406_v50  ;;  %v629_v43 = vld [vmem:[%s6504_s27] sm:$0x1]  ;;  %v8655_v47 = vld [vmem:[%s9079_s16 + $0x10] sm:$0xff]  }
  0xf2   :  { %432 = vst.msk [vmem:[#allocation2 + $0x18] sm:$0x7f] %vm398_vm2, %v430_v49  ;;  %v411_v55 = vadd.f32 %v406_v50, %v401_v53  ;;  %v410_v56 = vadd.f32 %v407_v54, %v400_v52  ;;  %v8657_v49 = vld [vmem:[%s9079_s16 + $0x8] sm:$0xff]   ;;  %v8658_v50 = vld [vmem:[%s9079_s16 + $0x20] sm:$0xff]   ;;  %v8660_v52 = vld [vmem:[%s9079_s16 + $0x58] sm:$0xff]   ;;  %v784_v53 = vlaneseq }
  0xf3   :  { %431 = vst.msk [vmem:[#allocation2 + $0x10] sm:$0xff] %vm170_vm0, %v429_v51  ;;  %v8659_v51 = vld [vmem:[%s9079_s16] sm:$0xff]  }
  0xf4   :  { %413 = vst.msk [vmem:[#allocation2 + $0x8] sm:$0x7f] %vm398_vm2, %v411_v55  ;;  %v785_v54 = vshrl.u32 %v784_v53, 7 }
  0xf5   :  { %412 = vst.msk [vmem:[#allocation2] sm:$0xff] %vm170_vm0, %v410_v56 }
  0xf6   :  { %v9102_v55 = vsub.s32 0, %v785_v54 }
  0xf9   :  { %v9042_v60 = vld [vmem:[#allocation2 + $0x18] sm:$0xff] }
  0xfa   :  { %v9036_v57 = vld [vmem:[#allocation2 + $0x10] sm:$0xff]  ;;  %v453_v5 = vmul.f32 %v9042_v60, %v9042_v60  ;;  %v442_v9 = vsel %vm170_vm0, %v9042_v60, 0.0 }
  0xfb   :  { %v9038_v58 = vld [vmem:[#allocation2 + $0x8] sm:$0xff]  ;;  %v452_v1 = vmul.f32 %v9036_v57, %v9036_v57  ;;  %v440_v4 = vsel %vm170_vm0, %v9036_v57, 0.0 }
  0xfc   :  { %v9040_v59 = vld [vmem:[#allocation2] sm:$0xff]  ;;  %v438_v61 = vsel %vm170_vm0, %v9038_v58, 0.0  ;;  %v451_v62 = vmul.f32 %v9038_v58, %v9038_v58  ;;  %v459_v13 = vsel %vm170_vm0, %v453_v5, 0.0 }
  0xfd   :  { %v437_v63 = vsel %vm170_vm0, %v9040_v59, 0.0  ;;  %v450_v0 = vmul.f32 %v9040_v59, %v9040_v59  ;;  %v457_v10 = vsel %vm170_vm0, %v452_v1, 0.0 }
  0xfe   :  { %v439_v2 = vadd.f32 %v438_v61, %v437_v63  ;;  %v455_v3 = vsel %vm170_vm0, %v451_v62, 0.0 }
  0xff   :  { %v454_v6 = vsel %vm170_vm0, %v450_v0, 0.0 }
 0x100   :  { %v441_v7 = vadd.f32 %v440_v4, %v439_v2  ;;  %v456_v8 = vadd.f32 %v455_v3, %v454_v6 }
 0x102   :  { %v443_v11 = vadd.f32 %v442_v9, %v441_v7  ;;  %v458_v12 = vadd.f32 %v457_v10, %v456_v8 }
 0x104   :  { %v444_v15 = vrot.slane %v443_v11, 4  ;;  %v460_v16 = vadd.f32 %v459_v13, %v458_v12 }
 0x106   :  { %v445_v17 = vadd.f32 %v444_v15, %v443_v11  ;;  %v461_v18 = vrot.slane %v460_v16, 4  ;;  %v8663_v15 = vld [vmem:[%s9079_s16 + $0x40] sm:$0xff]  }
 0x108   :  { %v446_v19 = vrot.slane %v445_v17, 2  ;;  %v462_v20 = vadd.f32 %v461_v18, %v460_v16  ;;  %v9140_v16 = vld [vmem:[%s9137_s2 + $0x78] sm:$0xff]  ;;  %v9153_v18 = vld [vmem:[%s9137_s2 + $0x68] sm:$0xff] }
 0x10a   :  { %v447_v21 = vadd.f32 %v446_v19, %v445_v17  ;;  %v463_v22 = vrot.slane %v462_v20, 2  ;;  %v9146_v17 = vld [vmem:[%s9137_s2 + $0x70] sm:$0xff]  ;;  %v9158_v19 = vld [vmem:[%s9137_s2 + $0x60] sm:$0xff] }
 0x10c   :  { %v448_v23 = vrot.slane %v447_v21, 1  ;;  %v464_v24 = vadd.f32 %v463_v22, %v462_v20  ;;  %v9164_v20 = vld [vmem:[%s9137_s2 + $0x58] sm:$0xff]  ;;  %v9178_v22 = vld [vmem:[%s9137_s2 + $0x48] sm:$0xff] }
 0x10e   :  { %v449_v25 = vadd.f32 %v448_v23, %v447_v21  ;;  %v465_v26 = vrot.slane %v464_v24, 1  ;;  %v9171_v21 = vld [vmem:[%s9137_s2 + $0x50] sm:$0xff]  ;;  %v9185_v23 = vld [vmem:[%s9137_s2 + $0x40] sm:$0xff] }
 0x110   :  { %7832 = vmatmul.mubr.msk.f32.vlgmr.msra.gmra.mxu1 %vm170_vm0, %v449_v25  ;;  %v466_v27 = vadd.f32 %v465_v26, %v464_v24  ;;  %v9192_v24 = vld [vmem:[%s9137_s2 + $0x38] sm:$0xff]  ;;  %v9199_v25 = vld [vmem:[%s9137_s2 + $0x30] sm:$0xff]  ;;  %v9206_v26 = vld [vmem:[%s9137_s2 + $0x28] sm:$0xff] }
 0x111   :  { %7855 = vmatprep.mubr.msk.f32.mxu1 %vm8904_vm1, %v8902_v14  ;;  %7854 = vmatpush3.msk.msra.mxu1 %vm637_vm4, %v632_v28 }
 0x112   :  { %7851 = vmatmul.mubr.msk.f32.vlgmr.msra.gmra.mxu0 %vm170_vm0, %v466_v27  ;;  %7858 = vmatprep.subr.mxu1 %v8902_v14  ;;  %v9213_v27 = vld [vmem:[%s9137_s2 + $0x20] sm:$0xff] }
 0x113   :  { %7876 = vmatpush3.bf16.msra.mxu0 %v8653_v29  ;;  %v9227_v29 = vld [vmem:[%s9137_s2 + $0x10] sm:$0xff] }
 0x114   :  { %7877 = vmatprep.subr.bf16.mxu0 %v8655_v47 }
 0x117   :  { %7878 = vmatpush3.bf16.msra.mxu0 %v8655_v47 }
 0x118   :  { %7879 = vmatprep.subr.bf16.mxu0 %v8657_v49 }
 0x11b   :  { %7880 = vmatpush3.bf16.msra.mxu0 %v8657_v49 }
 0x11c   :  { %7881 = vmatprep.subr.bf16.mxu0 %v8659_v51 }
 0x11f   :  { %7882 = vmatpush3.bf16.msra.mxu0 %v8659_v51 }
 0x120   :  { %7899 = vmatprep.subr.mxu0 %v8902_v14 }
 0x1d0   :  { %v544_v30 = vpop.f32.mrf.mxu1 }
 0x1d1   :  { %v548_v31 = vmul.f32 0.001953125, %v544_v30  ;;  %v9234_v30 = vld [vmem:[%s9137_s2 + $0x8] sm:$0xff] }
 0x1d2   :  { %v7833_v32 = vpop.f32.mrf.mxu1  ;;  %v618_v33 = vpop.f32.mrf.mxu0 }
 0x1d3   :  { %v623_v34 = vmul.f32 %v548_v31, %v548_v31  ;;  %v622_v35 = vmul.f32 0.001953125, %v618_v33 }
 0x1d4   :  { %v7852_v36 = vpop.f32.mrf.mxu0 }
 0x1d5   :  { %v624_v37 = vsub.f32 %v622_v35, %v623_v34 }
 0x1d7   :  { %v626_v38 = vadd.f32 1e-05, %v624_v37 }
 0x1d9   :  { %8880 = vrsqrt.f32 %v626_v38 }
 0x1e6   :  { %v8881_v40 = vpop.eup %8880 }
 0x1e7   :  { %v628_v41 = vmul.f32 %v8881_v40, %v625_v39 }
 0x1e9   :  { %7856 = vmatmul.mubr.msk.f32.vlgmr.msra.gmra.mxu1 %vm633_vm5, %v628_v41  ;;  %v630_v44 = vmul.f32 %v628_v41, %v548_v31  ;;  %v9241_v31 = vld [vmem:[%s9137_s2] sm:$0xff] }
 0x1ea   :  { %7859 = vmatpush3.msk.msra.mxu1 %vm637_vm4, %v632_v28  ;;  %7860 = vmatprep.mubr.msk.f32.mxu1 %vm8904_vm1, %v8902_v14  ;;  %v9220_v28 = vld [vmem:[%s9137_s2 + $0x18] sm:$0xff] }
 0x1eb   :  { %v631_v45 = vsub.f32 %v629_v43, %v630_v44  ;;  %7863 = vmatprep.subr.bf16.mxu1 %v8652_v42 }
 0x1ed   :  { %7861 = vmatmul.mubr.msk.f32.vlgmr.msra.gmra.mxu1 %vm633_vm5, %v631_v45 }
 0x1ee   :  { %7864 = vmatpush3.bf16.msra.mxu1 %v8652_v42 }
 0x1ef   :  { %7865 = vmatprep.subr.bf16.mxu1 %v8654_v46 }
 0x1f2   :  { %7866 = vmatpush3.bf16.msra.mxu1 %v8654_v46 }
 0x1f3   :  { %7867 = vmatprep.subr.bf16.mxu1 %v8656_v48 }
 0x1f6   :  { %7868 = vmatpush3.bf16.msra.mxu1 %v8656_v48 }
 0x1f7   :  { %7869 = vmatprep.subr.bf16.mxu1 %v8658_v50 }
 0x1fa   :  { %7870 = vmatpush3.bf16.msra.mxu1 %v8658_v50 }
 0x1fb   :  { %7887 = vmatprep.subr.bf16.mxu1 %v8660_v52 }
 0x2a9   :  { %v707_v56 = vpop.f32.mrf.mxu1 }
 0x2aa   :  { %v787_v61 = vrot.slane %v707_v56, %v9102_v55 }
 0x2ab   :  { %v7857_v62 = vpop.f32.mrf.mxu1 }
 0x2ac   :  { %v788_v63 = vmul.f32 %v787_v61, %v9040_v59  ;;  %v789_v1 = vmul.f32 %v787_v61, %v9038_v58  ;;  %v790_v2 = vmul.f32 %v787_v61, %v9036_v57  ;;  %v791_v3 = vmul.f32 %v787_v61, %v9042_v60  ;;  %v8661_v57 = vld [vmem:[%s9079_s16 + $0x50] sm:$0xff]   ;;  %v8662_v60 = vld [vmem:[%s9079_s16 + $0x48] sm:$0xff]   ;;  %s8919_s16 = smov 15  }
 0x2ad   :  { %v780_v0 = vpop.f32.mrf.mxu1 }
 0x2ae   :  { %v795_v4 = vrot.slane %v780_v0, %v9102_v55 }
 0x2af   :  { %v7862_v5 = vpop.f32.mrf.mxu1 }
 0x2b0   :  { %v796_v6 = vadd.f32 %v795_v4, %v788_v63  ;;  %v797_v7 = vadd.f32 %v795_v4, %v789_v1  ;;  %v798_v8 = vadd.f32 %v795_v4, %v790_v2  ;;  %v799_v9 = vadd.f32 %v795_v4, %v791_v3 }
 0x2b2   :  { %v800_v10 = vmax.f32 %v796_v6, 0.0  ;;  %v801_v11 = vmax.f32 %v797_v7, 0.0  ;;  %v802_v12 = vmax.f32 %v798_v8, 0.0  ;;  %v803_v59 = vmax.f32 %v799_v9, 0.0 }
 0x2b4   :  { %v9110_v13 = vpack.c.bf16 %v801_v11, %v800_v10  ;;  %v9112_v58 = vpack.c.bf16 %v803_v59, %v802_v12 }
 0x2b6   :  { %7871 = vmatprep.mubr.msk.bf16.mxu1 %vm170_vm0, %v9110_v13  ;;  %7883 = vmatprep.mubr.msk.bf16.mxu0 %vm170_vm0, %v9110_v13 }
 0x2b7   :  { %7872 = vmatmul.mubr.msk.bf16.vlgmr.msra.gmra.mxu1 %vm170_vm0, %v9112_v58  ;;  %7884 = vmatmul.mubr.msk.bf16.vlgmr.msra.gmra.mxu0 %vm170_vm0, %v9112_v58 }
 0x2b8   :  { %7888 = vmatpush3.bf16.msra.mxu1 %v8660_v52  ;;  %7895 = vmatprep.mubr.msk.bf16.mxu1 %vm170_vm0, %v9110_v13 }
 0x2b9   :  { %7889 = vmatprep.subr.bf16.mxu1 %v8661_v57  ;;  %7931 = vmatprep.mubr.msk.f32.mxu0 %vm8904_vm1, %v8902_v14 }
 0x2ba   :  { %7900 = vmatpush3.msra.mxu0 %v9140_v16 }
 0x2bb   :  { %7901 = vmatprep.subr.mxu0 %v8902_v14 }
 0x2bc   :  { %7890 = vmatpush3.bf16.msra.mxu1 %v8661_v57  ;;  %7902 = vmatpush3.msra.mxu0 %v9146_v17 }
 0x2bd   :  { %7891 = vmatprep.subr.bf16.mxu1 %v8662_v60  ;;  %7903 = vmatprep.subr.mxu0 %v8902_v14 }
 0x2be   :  { %7904 = vmatpush3.msra.mxu0 %v9153_v18 }
 0x2bf   :  { %7905 = vmatprep.subr.mxu0 %v8902_v14 }
 0x2c0   :  { %7892 = vmatpush3.bf16.msra.mxu1 %v8662_v60  ;;  %7906 = vmatpush3.msra.mxu0 %v9158_v19 }
 0x2c1   :  { %7893 = vmatprep.subr.bf16.mxu1 %v8663_v15  ;;  %7907 = vmatprep.subr.mxu0 %v8902_v14 }
 0x2c2   :  { %7908 = vmatpush3.msra.mxu0 %v9164_v20 }
 0x2c3   :  { %7909 = vmatprep.subr.mxu0 %v8902_v14 }
 0x2c4   :  { %7894 = vmatpush3.bf16.msra.mxu1 %v8663_v15  ;;  %7910 = vmatpush3.msra.mxu0 %v9171_v21 }
 0x2c5   :  { %7934 = vmatprep.subr.mxu1 %v8902_v14  ;;  %7911 = vmatprep.subr.mxu0 %v8902_v14 }
 0x2c6   :  { %7912 = vmatpush3.msra.mxu0 %v9178_v22 }
 0x2c7   :  { %7896 = vmatmul.mubr.msk.bf16.vlgmr.msra.gmra.mxu1 %vm170_vm0, %v9112_v58  ;;  %7913 = vmatprep.subr.mxu0 %v8902_v14 }
 0x2c8   :  { %7966 = vmatprep.mubr.msk.f32.mxu1 %vm8904_vm1, %v8902_v14  ;;  %7935 = vmatpush3.msra.mxu1 %v9140_v16 }
 0x2c9   :  { %7936 = vmatprep.subr.mxu1 %v8902_v14  ;;  %7914 = vmatpush3.msra.mxu0 %v9185_v23 }
 0x2ca   :  { %7937 = vmatpush3.msra.mxu1 %v9146_v17  ;;  %7915 = vmatprep.subr.mxu0 %v8902_v14 }
 0x2cb   :  { %7938 = vmatprep.subr.mxu1 %v8902_v14  ;;  %7916 = vmatpush3.msra.mxu0 %v9192_v24 }
 0x2cc   :  { %7939 = vmatpush3.msra.mxu1 %v9153_v18  ;;  %7917 = vmatprep.subr.mxu0 %v8902_v14 }
 0x2cd   :  { %7940 = vmatprep.subr.mxu1 %v8902_v14  ;;  %7918 = vmatpush3.msra.mxu0 %v9199_v25 }
 0x2ce   :  { %7941 = vmatpush3.msra.mxu1 %v9158_v19  ;;  %7919 = vmatprep.subr.mxu0 %v8902_v14 }
 0x2cf   :  { %7942 = vmatprep.subr.mxu1 %v8902_v14  ;;  %7920 = vmatpush3.msra.mxu0 %v9206_v26 }
 0x2d0   :  { %7943 = vmatpush3.msra.mxu1 %v9164_v20  ;;  %7921 = vmatprep.subr.mxu0 %v8902_v14 }
 0x2d1   :  { %7944 = vmatprep.subr.mxu1 %v8902_v14  ;;  %7922 = vmatpush3.msra.mxu0 %v9213_v27 }
 0x2d2   :  { %7945 = vmatpush3.msra.mxu1 %v9171_v21  ;;  %7923 = vmatprep.subr.mxu0 %v8902_v14 }
 0x2d3   :  { %7946 = vmatprep.subr.mxu1 %v8902_v14  ;;  %7924 = vmatpush3.msra.mxu0 %v9220_v28 }
 0x2d4   :  { %7947 = vmatpush3.msra.mxu1 %v9178_v22  ;;  %7925 = vmatprep.subr.mxu0 %v8902_v14 }
 0x2d5   :  { %7948 = vmatprep.subr.mxu1 %v8902_v14  ;;  %7926 = vmatpush3.msra.mxu0 %v9227_v29 }
 0x2d6   :  { %7949 = vmatpush3.msra.mxu1 %v9185_v23  ;;  %7927 = vmatprep.subr.mxu0 %v8902_v14 }
 0x2d7   :  { %7950 = vmatprep.subr.mxu1 %v8902_v14  ;;  %7928 = vmatpush3.msra.mxu0 %v9234_v30 }
 0x2d8   :  { %7951 = vmatpush3.msra.mxu1 %v9192_v24  ;;  %7929 = vmatprep.subr.mxu0 %v8902_v14 }
 0x2d9   :  { %7952 = vmatprep.subr.mxu1 %v8902_v14  ;;  %7930 = vmatpush3.msra.mxu0 %v9241_v31 }
 0x2da   :  { %7953 = vmatpush3.msra.mxu1 %v9199_v25  ;;  %7969 = vmatprep.subr.mxu0 %v8902_v14 }
 0x2db   :  { %7954 = vmatprep.subr.mxu1 %v8902_v14 }
 0x2dc   :  { %7955 = vmatpush3.msra.mxu1 %v9206_v26 }
 0x2dd   :  { %7956 = vmatprep.subr.mxu1 %v8902_v14 }
 0x2de   :  { %7957 = vmatpush3.msra.mxu1 %v9213_v27 }
 0x2df   :  { %7958 = vmatprep.subr.mxu1 %v8902_v14 }
 0x2e0   :  { %7959 = vmatpush3.msra.mxu1 %v9220_v28 }
 0x2e1   :  { %7960 = vmatprep.subr.mxu1 %v8902_v14 }
 0x2e2   :  { %7961 = vmatpush3.msra.mxu1 %v9227_v29 }
 0x2e3   :  { %7962 = vmatprep.subr.mxu1 %v8902_v14 }
 0x2e4   :  { %7963 = vmatpush3.msra.mxu1 %v9234_v30 }
 0x2e5   :  { %7964 = vmatprep.subr.mxu1 %v8902_v14 }
 0x2e6   :  { %7965 = vmatpush3.msra.mxu1 %v9241_v31 }
 0x377   :  { %v7873_v32 = vpop.f32.mrf.mxu1  ;;  %v7885_v33 = vpop.f32.mrf.mxu0 }
 0x378   :  { %896 = vst [vmem:[#allocation3 + $0x10] sm:$0xff] %v7873_v32 }
 0x379   :  { %v879_v34 = vpop.f32.mrf.mxu1  ;;  %v964_v36 = vpop.f32.mrf.mxu0 }
 0x37a   :  { %894 = vst [vmem:[#allocation3] sm:$0xff] %v879_v34 }
 0x37b   :  { %v7874_v35 = vpop.f32.mrf.mxu1  ;;  %v7886_v38 = vpop.f32.mrf.mxu0 }
 0x37c   :  { %897 = vst [vmem:[#allocation3 + $0x18] sm:$0xff] %v7874_v35 }
 0x37d   :  { %v882_v37 = vpop.f32.mrf.mxu1  ;;  %v967_v45 = vpop.f32.mrf.mxu0 }
 0x37e   :  { %895 = vst [vmem:[#allocation3 + $0x8] sm:$0xff] %v882_v37 }
 0x383   :  { %v1080_v39 = vld [vmem:[#allocation3 + $0x11] sm:$0xff]  ;;  %v1081_v40 = vld [vmem:[#allocation3 + $0x19] sm:$0x7f] }
 0x384   :  { %v1082_v41 = vadd.f32 %v7885_v33, %v1080_v39  ;;  %v1083_v42 = vadd.f32 %v7886_v38, %v1081_v40 }
 0x385   :  { %v1061_v43 = vld [vmem:[#allocation3 + $0x1] sm:$0xff]  ;;  %v1062_v44 = vld [vmem:[#allocation3 + $0x9] sm:$0x7f] }
 0x386   :  { %1084 = vst [vmem:[#allocation3 + $0x11] sm:$0xff] %v1082_v41  ;;  %1085 = vst [vmem:[#allocation3 + $0x19] sm:$0x7f] %v1083_v42  ;;  %v1063_v46 = vadd.f32 %v1061_v43, %v964_v36  ;;  %v1064_v47 = vadd.f32 %v1062_v44, %v967_v45 }
 0x387   :  { %v7897_v48 = vpop.f32.mrf.mxu1 }
 0x388   :  { %1065 = vst [vmem:[#allocation3 + $0x1] sm:$0xff] %v1063_v46  ;;  %1066 = vst [vmem:[#allocation3 + $0x9] sm:$0x7f] %v1064_v47  ;;  %v1090_v0 = vrot.slane %v7897_v48, 1  ;;  %v9280_v46 = vld [vmem:[%s9277_s8] sm:$0xff]  ;;  %v8665_v47 = vld [vmem:[%s8950_s13 + $0x38] sm:$0xff]  }
 0x389   :  { %v1046_v49 = vpop.f32.mrf.mxu1  ;;  %7999 = vmatprep.subr.bf16.mxu1 %v8665_v47  ;;  %v8667_v48 = vld [vmem:[%s8950_s13 + $0x30] sm:$0xff]  }
 0x38a   :  { %v1071_v63 = vrot.slane %v1046_v49, 1  ;;  %v8669_v49 = vld [vmem:[%s8950_s13 + $0x28] sm:$0xff]  }
 0x38b   :  { %v7898_v50 = vpop.f32.mrf.mxu1 }
 0x38c   :  { %v1091_v51 = vrot.slane %v7898_v50, 1  ;;  %v8671_v50 = vld [vmem:[%s8950_s13 + $0x20] sm:$0xff]  }
 0x38d   :  { %v1087_v52 = vld [vmem:[#allocation3 + $0x18] sm:$0x7f]  ;;  %v1049_v53 = vpop.f32.mrf.mxu1  ;;  %v1086_v3 = vld [vmem:[#allocation3 + $0x10] sm:$0xff] }
 0x38e   :  { %v1096_v54 = vadd.f32 %v1091_v51, %v1087_v52  ;;  %v1072_v56 = vrot.slane %v1049_v53, 1  ;;  %v1092_v4 = vsel %vm404_vm3, %v1090_v0, %v1091_v51  ;;  %v8673_v51 = vld [vmem:[%s8950_s13 + $0x18] sm:$0xff]  }
 0x38f   :  { %v1068_v61 = vld [vmem:[#allocation3 + $0x8] sm:$0x7f]  ;;  %v1067_v1 = vld [vmem:[#allocation3] sm:$0xff]  ;;  %v9254_v6 = vadd.f32 %v1092_v4, %v1086_v3 }
 0x390   :  { %1098 = vst [vmem:[#allocation3 + $0x18] sm:$0x7f] %v1096_v54  ;;  %v1077_v62 = vadd.f32 %v1072_v56, %v1068_v61  ;;  %v1073_v2 = vsel %vm404_vm3, %v1071_v63, %v1072_v56 }
 0x391   :  { %v9252_v5 = vadd.f32 %v1073_v2, %v1067_v1  ;;  %v1114_v59 = vmul.f32 %v9254_v6, %v9254_v6  ;;  %v1285_v2 = vld [vmem:[%s6506_s14] sm:$0x1]  ;;  %s8926_s14 = smov 29  }
 0x392   :  { %1079 = vst [vmem:[#allocation3 + $0x8] sm:$0x7f] %v1077_v62  ;;  %s6530_s18 = sld [smem:[%s10337_s0 + %s8926_s14]]  }
 0x393   :  { %v1112_v9 = vmul.f32 %v9252_v5, %v9252_v5 }
 0x397   :  { %v9264_v11 = vld [vmem:[#allocation3 + $0x18] sm:$0xff] }
 0x398   :  { %v1115_v15 = vmul.f32 %v9264_v11, %v9264_v11 }
 0x399   :  { %v9256_v7 = vld [vmem:[#allocation3 + $0x8] sm:$0xff] }
 0x39a   :  { %v1103_v8 = vadd.f32 %v9256_v7, %v9252_v5  ;;  %v1113_v10 = vmul.f32 %v9256_v7, %v9256_v7 }
 0x39c   :  { %v1104_v12 = vadd.f32 %v1103_v8, %v9254_v6  ;;  %v1116_v57 = vadd.f32 %v1113_v10, %v1112_v9  ;;  %v8664_v8 = vld [vmem:[%s8950_s13 + $0x78] sm:$0xff]   ;;  %v1289_v9 = vld [vmem:[%s6507_s19] sm:$0x1] }
 0x39e   :  { %v1105_v60 = vadd.f32 %v1104_v12, %v9264_v11  ;;  %v1117_v32 = vadd.f32 %v1116_v57, %v1114_v59  ;;  %v8666_v59 = vld [vmem:[%s8950_s13 + $0x70] sm:$0xff]   ;;  %v8668_v57 = vld [vmem:[%s8950_s13 + $0x68] sm:$0xff]  }
 0x3a0   :  { %v1106_v33 = vrot.slane %v1105_v60, 4  ;;  %v1118_v34 = vadd.f32 %v1117_v32, %v1115_v15  ;;  %v8672_v15 = vld [vmem:[%s8950_s13 + $0x58] sm:$0xff]   ;;  %v8674_v32 = vld [vmem:[%s8950_s13 + $0x50] sm:$0xff]  }
 0x3a2   :  { %v1107_v35 = vadd.f32 %v1106_v33, %v1105_v60  ;;  %v1119_v36 = vrot.slane %v1118_v34, 4  ;;  %v8670_v60 = vld [vmem:[%s8950_s13 + $0x60] sm:$0xff]   ;;  %v8675_v33 = vld [vmem:[%s8950_s13 + $0x10] sm:$0xff]  }
 0x3a4   :  { %v1108_v37 = vrot.slane %v1107_v35, 2  ;;  %v1120_v38 = vadd.f32 %v1119_v36, %v1118_v34  ;;  %v8676_v34 = vld [vmem:[%s8950_s13 + $0x48] sm:$0xff]   ;;  %v8678_v36 = vld [vmem:[%s8950_s13 + $0x40] sm:$0xff]  }
 0x3a6   :  { %v1109_v39 = vadd.f32 %v1108_v37, %v1107_v35  ;;  %v1121_v40 = vrot.slane %v1120_v38, 2  ;;  %v8677_v35 = vld [vmem:[%s8950_s13 + $0x8] sm:$0xff]   ;;  %v8679_v37 = vld [vmem:[%s8950_s13] sm:$0xff]  }
 0x3a8   :  { %v1110_v41 = vrot.slane %v1109_v39, 1  ;;  %v1122_v42 = vadd.f32 %v1121_v40, %v1120_v38  ;;  %v8680_v38 = vld [vmem:[%s8950_s13 + $0xb8] sm:$0xff]  }
 0x3aa   :  { %v1111_v43 = vadd.f32 %v1110_v41, %v1109_v39  ;;  %v1123_v44 = vrot.slane %v1122_v42, 1 }
 0x3ac   :  { %7932 = vmatmul.mubr.f32.vlgmr.msra.gmra.mxu0 %v1111_v43  ;;  %v1124_v45 = vadd.f32 %v1123_v44, %v1122_v42 }
 0x3ad   :  { %7971 = vmatprep.mubr.msk.f32.mxu0 %vm8904_vm1, %v8902_v14  ;;  %7970 = vmatpush3.msra.mxu0 %v9280_v46 }
 0x3ae   :  { %7967 = vmatmul.mubr.f32.vlgmr.msra.gmra.mxu1 %v1124_v45  ;;  %7974 = vmatprep.subr.mxu0 %v8902_v14 }
 0x3af   :  { %8000 = vmatpush3.bf16.msra.mxu1 %v8665_v47 }
 0x3b0   :  { %8001 = vmatprep.subr.bf16.mxu1 %v8667_v48 }
 0x3b3   :  { %8002 = vmatpush3.bf16.msra.mxu1 %v8667_v48 }
 0x3b4   :  { %8003 = vmatprep.subr.bf16.mxu1 %v8669_v49 }
 0x3b7   :  { %8004 = vmatpush3.bf16.msra.mxu1 %v8669_v49 }
 0x3b8   :  { %8005 = vmatprep.subr.bf16.mxu1 %v8671_v50 }
 0x3bb   :  { %8006 = vmatpush3.bf16.msra.mxu1 %v8671_v50 }
 0x3bc   :  { %8007 = vmatprep.subr.bf16.mxu1 %v8673_v51 }
 0x3bf   :  { %8008 = vmatpush3.bf16.msra.mxu1 %v8673_v51 }
 0x3c0   :  { %8009 = vmatprep.subr.bf16.mxu1 %v8675_v33 }
 0x3c3   :  { %8010 = vmatpush3.bf16.msra.mxu1 %v8675_v33 }
 0x3c4   :  { %8011 = vmatprep.subr.bf16.mxu1 %v8677_v35 }
 0x3c7   :  { %8012 = vmatpush3.bf16.msra.mxu1 %v8677_v35 }
 0x3c8   :  { %8013 = vmatprep.subr.bf16.mxu1 %v8679_v37 }
 0x3cb   :  { %8014 = vmatpush3.bf16.msra.mxu1 %v8679_v37 }
 0x3cc   :  { %8039 = vmatprep.subr.mxu1 %v8902_v14 }
 0x46c   :  { %v1207_v52 = vpop.f32.mrf.mxu0 }
 0x46d   :  { %v1211_v53 = vmul.f32 0.001953125, %v1207_v52 }
 0x46e   :  { %v7933_v54 = vpop.f32.mrf.mxu0  ;;  %v1278_v56 = vpop.f32.mrf.mxu1 }
 0x46f   :  { %v1283_v61 = vmul.f32 %v1211_v53, %v1211_v53  ;;  %v1282_v62 = vmul.f32 0.001953125, %v1278_v56 }
 0x470   :  { %v7968_v63 = vpop.f32.mrf.mxu1 }
 0x471   :  { %v1284_v0 = vsub.f32 %v1282_v62, %v1283_v61 }
 0x473   :  { %v1286_v1 = vadd.f32 1e-05, %v1284_v0  ;;  %v8684_v0 = vld [vmem:[%s8950_s13 + $0x98] sm:$0xff]  }
 0x475   :  { %8882 = vrsqrt.f32 %v1286_v1  ;;  %v8685_v1 = vld [vmem:[%s8950_s13 + $0x90] sm:$0xff]  }
 0x482   :  { %v8883_v3 = vpop.eup %8882 }
 0x483   :  { %v1288_v4 = vmul.f32 %v8883_v3, %v1285_v2  ;;  %v8686_v2 = vld [vmem:[%s8950_s13 + $0x88] sm:$0xff]   ;;  %v8687_v3 = vld [vmem:[%s8950_s13 + $0x80] sm:$0xff]  }
 0x485   :  { %7972 = vmatmul.mubr.msk.f32.vlgmr.msra.gmra.mxu0 %vm1293_vm6, %v1288_v4  ;;  %v1290_v10 = vmul.f32 %v1288_v4, %v1211_v53 }
 0x486   :  { %7975 = vmatpush3.msra.mxu0 %v9280_v46  ;;  %7976 = vmatprep.mubr.msk.f32.mxu0 %vm8904_vm1, %v8902_v14 }
 0x487   :  { %v1291_v12 = vsub.f32 %v1289_v9, %v1290_v10  ;;  %7979 = vmatprep.subr.bf16.mxu0 %v8664_v8 }
 0x489   :  { %7977 = vmatmul.mubr.msk.f32.vlgmr.msra.gmra.mxu0 %vm1293_vm6, %v1291_v12 }
 0x48a   :  { %7980 = vmatpush3.bf16.msra.mxu0 %v8664_v8 }
 0x48b   :  { %7981 = vmatprep.subr.bf16.mxu0 %v8666_v59 }
 0x48e   :  { %7982 = vmatpush3.bf16.msra.mxu0 %v8666_v59 }
 0x48f   :  { %7983 = vmatprep.subr.bf16.mxu0 %v8668_v57 }
 0x492   :  { %7984 = vmatpush3.bf16.msra.mxu0 %v8668_v57 }
 0x493   :  { %7985 = vmatprep.subr.bf16.mxu0 %v8670_v60 }
 0x496   :  { %7986 = vmatpush3.bf16.msra.mxu0 %v8670_v60 }
 0x497   :  { %7987 = vmatprep.subr.bf16.mxu0 %v8672_v15 }
 0x49a   :  { %7988 = vmatpush3.bf16.msra.mxu0 %v8672_v15 }
 0x49b   :  { %7989 = vmatprep.subr.bf16.mxu0 %v8674_v32 }
 0x49e   :  { %7990 = vmatpush3.bf16.msra.mxu0 %v8674_v32 }
 0x49f   :  { %7991 = vmatprep.subr.bf16.mxu0 %v8676_v34 }
 0x4a2   :  { %7992 = vmatpush3.bf16.msra.mxu0 %v8676_v34 }
 0x4a3   :  { %7993 = vmatprep.subr.bf16.mxu0 %v8678_v36 }
 0x4a6   :  { %7994 = vmatpush3.bf16.msra.mxu0 %v8678_v36 }
 0x4a7   :  { %8019 = vmatprep.subr.bf16.mxu0 %v8680_v38 }
 0x545   :  { %v1363_v39 = vpop.f32.mrf.mxu0 }
 0x546   :  { %v1443_v40 = vrot.slane %v1363_v39, %v9102_v55 }
 0x547   :  { %v7973_v41 = vpop.f32.mrf.mxu0 }
 0x548   :  { %v1444_v42 = vmul.f32 %v1443_v40, %v9252_v5  ;;  %v1445_v44 = vmul.f32 %v1443_v40, %v9256_v7  ;;  %v1446_v45 = vmul.f32 %v1443_v40, %v9254_v6  ;;  %v1447_v47 = vmul.f32 %v1443_v40, %v9264_v11  ;;  %v8681_v7 = vld [vmem:[%s8950_s13 + $0xb0] sm:$0xff]   ;;  %v8682_v6 = vld [vmem:[%s8950_s13 + $0xa8] sm:$0xff]   ;;  %v8683_v11 = vld [vmem:[%s8950_s13 + $0xa0] sm:$0xff]   ;;  %s8914_s13 = smov 8  }
 0x549   :  { %v1436_v43 = vpop.f32.mrf.mxu0  ;;  %s6509_s23 = sld [smem:[%s10337_s0 + %s8914_s13]]  }
 0x54a   :  { %v1451_v48 = vrot.slane %v1436_v43, %v9102_v55  ;;  %s6516_s13 = sld [smem:[%s10337_s0 + %s8919_s16]]  }
 0x54b   :  { %v7978_v49 = vpop.f32.mrf.mxu0 }
 0x54c   :  { %v1452_v50 = vadd.f32 %v1451_v48, %v1444_v42  ;;  %v1453_v51 = vadd.f32 %v1451_v48, %v1445_v44  ;;  %v1454_v52 = vadd.f32 %v1451_v48, %v1446_v45  ;;  %v1455_v53 = vadd.f32 %v1451_v48, %v1447_v47 }
 0x54e   :  { %v1456_v54 = vmax.f32 %v1452_v50, 0.0  ;;  %v1457_v56 = vmax.f32 %v1453_v51, 0.0  ;;  %v1458_v61 = vmax.f32 %v1454_v52, 0.0  ;;  %v1459_v5 = vmax.f32 %v1455_v53, 0.0 }
 0x550   :  { %v9319_v62 = vpack.c.bf16 %v1457_v56, %v1456_v54  ;;  %v9321_v63 = vpack.c.bf16 %v1459_v5, %v1458_v61 }
 0x552   :  { %7995 = vmatprep.mubr.bf16.mxu0 %v9319_v62  ;;  %8015 = vmatprep.mubr.bf16.mxu1 %v9319_v62 }
 0x553   :  { %7996 = vmatmul.mubr.bf16.vlgmr.msra.gmra.mxu0 %v9321_v63  ;;  %8016 = vmatmul.mubr.bf16.vlgmr.msra.gmra.mxu1 %v9321_v63 }
 0x554   :  { %8020 = vmatpush3.bf16.msra.mxu0 %v8680_v38  ;;  %8035 = vmatprep.mubr.bf16.mxu0 %v9319_v62 }
 0x555   :  { %8021 = vmatprep.subr.bf16.mxu0 %v8681_v7  ;;  %8040 = vmatpush3.msra.mxu1 %v9140_v16 }
 0x556   :  { %8041 = vmatprep.subr.mxu1 %v8902_v14  ;;  %8071 = vmatprep.mubr.msk.f32.mxu1 %vm8904_vm1, %v8902_v14 }
 0x557   :  { %8042 = vmatpush3.msra.mxu1 %v9146_v17 }
 0x558   :  { %8022 = vmatpush3.bf16.msra.mxu0 %v8681_v7  ;;  %8043 = vmatprep.subr.mxu1 %v8902_v14 }
 0x559   :  { %8023 = vmatprep.subr.bf16.mxu0 %v8682_v6  ;;  %8044 = vmatpush3.msra.mxu1 %v9153_v18 }
 0x55a   :  { %8045 = vmatprep.subr.mxu1 %v8902_v14 }
 0x55b   :  { %8046 = vmatpush3.msra.mxu1 %v9158_v19 }
 0x55c   :  { %8024 = vmatpush3.bf16.msra.mxu0 %v8682_v6  ;;  %8047 = vmatprep.subr.mxu1 %v8902_v14 }
 0x55d   :  { %8025 = vmatprep.subr.bf16.mxu0 %v8683_v11  ;;  %8048 = vmatpush3.msra.mxu1 %v9164_v20 }
 0x55e   :  { %8049 = vmatprep.subr.mxu1 %v8902_v14 }
 0x55f   :  { %8050 = vmatpush3.msra.mxu1 %v9171_v21 }
 0x560   :  { %8026 = vmatpush3.bf16.msra.mxu0 %v8683_v11  ;;  %8051 = vmatprep.subr.mxu1 %v8902_v14 }
 0x561   :  { %8027 = vmatprep.subr.bf16.mxu0 %v8684_v0  ;;  %8052 = vmatpush3.msra.mxu1 %v9178_v22 }
 0x562   :  { %8053 = vmatprep.subr.mxu1 %v8902_v14 }
 0x563   :  { %8054 = vmatpush3.msra.mxu1 %v9185_v23 }
 0x564   :  { %8028 = vmatpush3.bf16.msra.mxu0 %v8684_v0  ;;  %8055 = vmatprep.subr.mxu1 %v8902_v14 }
 0x565   :  { %8029 = vmatprep.subr.bf16.mxu0 %v8685_v1  ;;  %8056 = vmatpush3.msra.mxu1 %v9192_v24 }
 0x566   :  { %8057 = vmatprep.subr.mxu1 %v8902_v14 }
 0x567   :  { %8058 = vmatpush3.msra.mxu1 %v9199_v25 }
 0x568   :  { %8030 = vmatpush3.bf16.msra.mxu0 %v8685_v1  ;;  %8059 = vmatprep.subr.mxu1 %v8902_v14 }
 0x569   :  { %8031 = vmatprep.subr.bf16.mxu0 %v8686_v2  ;;  %8060 = vmatpush3.msra.mxu1 %v9206_v26 }
 0x56a   :  { %8061 = vmatprep.subr.mxu1 %v8902_v14 }
 0x56b   :  { %8062 = vmatpush3.msra.mxu1 %v9213_v27 }
 0x56c   :  { %8032 = vmatpush3.bf16.msra.mxu0 %v8686_v2  ;;  %8063 = vmatprep.subr.mxu1 %v8902_v14 }
 0x56d   :  { %8033 = vmatprep.subr.bf16.mxu0 %v8687_v3  ;;  %8064 = vmatpush3.msra.mxu1 %v9220_v28 }
 0x56e   :  { %8065 = vmatprep.subr.mxu1 %v8902_v14 }
 0x56f   :  { %8066 = vmatpush3.msra.mxu1 %v9227_v29 }
 0x570   :  { %8034 = vmatpush3.bf16.msra.mxu0 %v8687_v3  ;;  %8067 = vmatprep.subr.mxu1 %v8902_v14 }
 0x571   :  { %8074 = vmatprep.subr.mxu0 %v8902_v14  ;;  %8068 = vmatpush3.msra.mxu1 %v9234_v30 }
 0x572   :  { %8069 = vmatprep.subr.mxu1 %v8902_v14 }
 0x573   :  { %8036 = vmatmul.mubr.bf16.vlgmr.msra.gmra.mxu0 %v9321_v63  ;;  %8070 = vmatpush3.msra.mxu1 %v9241_v31 }
 0x574   :  { %8075 = vmatpush3.msra.mxu0 %v9140_v16  ;;  %8106 = vmatprep.mubr.msk.f32.mxu0 %vm8904_vm1, %v8902_v14 }
 0x575   :  { %8076 = vmatprep.subr.mxu0 %v8902_v14  ;;  %8109 = vmatprep.subr.mxu1 %v8902_v14 }
 0x576   :  { %8077 = vmatpush3.msra.mxu0 %v9146_v17 }
 0x577   :  { %8078 = vmatprep.subr.mxu0 %v8902_v14 }
 0x578   :  { %8079 = vmatpush3.msra.mxu0 %v9153_v18 }
 0x579   :  { %8080 = vmatprep.subr.mxu0 %v8902_v14 }
 0x57a   :  { %8081 = vmatpush3.msra.mxu0 %v9158_v19 }
 0x57b   :  { %8082 = vmatprep.subr.mxu0 %v8902_v14 }
 0x57c   :  { %8083 = vmatpush3.msra.mxu0 %v9164_v20 }
 0x57d   :  { %8084 = vmatprep.subr.mxu0 %v8902_v14 }
 0x57e   :  { %8085 = vmatpush3.msra.mxu0 %v9171_v21 }
 0x57f   :  { %8086 = vmatprep.subr.mxu0 %v8902_v14 }
 0x580   :  { %8087 = vmatpush3.msra.mxu0 %v9178_v22 }
 0x581   :  { %8088 = vmatprep.subr.mxu0 %v8902_v14 }
 0x582   :  { %8089 = vmatpush3.msra.mxu0 %v9185_v23 }
 0x583   :  { %8090 = vmatprep.subr.mxu0 %v8902_v14 }
 0x584   :  { %8091 = vmatpush3.msra.mxu0 %v9192_v24 }
 0x585   :  { %8092 = vmatprep.subr.mxu0 %v8902_v14 }
 0x586   :  { %8093 = vmatpush3.msra.mxu0 %v9199_v25 }
 0x587   :  { %8094 = vmatprep.subr.mxu0 %v8902_v14 }
 0x588   :  { %8095 = vmatpush3.msra.mxu0 %v9206_v26 }
 0x589   :  { %8096 = vmatprep.subr.mxu0 %v8902_v14 }
 0x58a   :  { %8097 = vmatpush3.msra.mxu0 %v9213_v27 }
 0x58b   :  { %8098 = vmatprep.subr.mxu0 %v8902_v14 }
 0x58c   :  { %8099 = vmatpush3.msra.mxu0 %v9220_v28 }
 0x58d   :  { %8100 = vmatprep.subr.mxu0 %v8902_v14 }
 0x58e   :  { %8101 = vmatpush3.msra.mxu0 %v9227_v29 }
 0x58f   :  { %8102 = vmatprep.subr.mxu0 %v8902_v14 }
 0x590   :  { %8103 = vmatpush3.msra.mxu0 %v9234_v30 }
 0x591   :  { %8104 = vmatprep.subr.mxu0 %v8902_v14 }
 0x592   :  { %8105 = vmatpush3.msra.mxu0 %v9241_v31 }
 0x613   :  { %v7997_v16 = vpop.f32.mrf.mxu0  ;;  %v8017_v17 = vpop.f32.mrf.mxu1 }
 0x614   :  { %1578 = vst [vmem:[#allocation3 + $0x10] sm:$0xff] %v7997_v16 }
 0x615   :  { %v1561_v18 = vpop.f32.mrf.mxu0  ;;  %v1678_v20 = vpop.f32.mrf.mxu1 }
 0x616   :  { %1576 = vst [vmem:[#allocation3] sm:$0xff] %v1561_v18  ;;  %v8691_v18 = vld [vmem:[%s8965_s17 + $0x30] sm:$0xff]  }
 0x617   :  { %v7998_v19 = vpop.f32.mrf.mxu0  ;;  %v8018_v22 = vpop.f32.mrf.mxu1 }
 0x618   :  { %1579 = vst [vmem:[#allocation3 + $0x18] sm:$0xff] %v7998_v19  ;;  %v8693_v19 = vld [vmem:[%s8965_s17 + $0x28] sm:$0xff]  }
 0x619   :  { %v1564_v21 = vpop.f32.mrf.mxu0  ;;  %v1681_v29 = vpop.f32.mrf.mxu1 }
 0x61a   :  { %1577 = vst [vmem:[#allocation3 + $0x8] sm:$0xff] %v1564_v21  ;;  %v8697_v21 = vld [vmem:[%s8965_s17 + $0x18] sm:$0xff]  }
 0x61f   :  { %v1827_v23 = vld [vmem:[#allocation3 + $0x12] sm:$0xff]  ;;  %v1828_v24 = vld [vmem:[#allocation3 + $0x1a] sm:$0x3f] }
 0x620   :  { %v1829_v25 = vadd.f32 %v8017_v17, %v1827_v23  ;;  %v1830_v26 = vadd.f32 %v8018_v22, %v1828_v24  ;;  %v8689_v17 = vld [vmem:[%s8965_s17 + $0x38] sm:$0xff]  }
 0x621   :  { %v1807_v27 = vld [vmem:[#allocation3 + $0x2] sm:$0xff]  ;;  %v1808_v28 = vld [vmem:[#allocation3 + $0xa] sm:$0x3f]  ;;  %8139 = vmatprep.subr.bf16.mxu0 %v8689_v17 }
 0x622   :  { %1831 = vst [vmem:[#allocation3 + $0x12] sm:$0xff] %v1829_v25  ;;  %1832 = vst [vmem:[#allocation3 + $0x1a] sm:$0x3f] %v1830_v26  ;;  %v1809_v30 = vadd.f32 %v1807_v27, %v1678_v20  ;;  %v1810_v31 = vadd.f32 %v1808_v28, %v1681_v29  ;;  %v8695_v20 = vld [vmem:[%s8965_s17 + $0x20] sm:$0xff]  }
 0x624   :  { %1811 = vst [vmem:[#allocation3 + $0x2] sm:$0xff] %v1809_v30  ;;  %1812 = vst [vmem:[#allocation3 + $0xa] sm:$0x3f] %v1810_v31  ;;  %v2032_v31 = vld [vmem:[%s6509_s23] sm:$0x1] }
 0x629   :  { %v1834_v12 = vld [vmem:[#allocation3 + $0x18] sm:$0x3f]  ;;  %v1833_v39 = vld [vmem:[#allocation3 + $0x10] sm:$0xff] }
 0x62b   :  { %v1814_v15 = vld [vmem:[#allocation3 + $0x8] sm:$0x3f]  ;;  %v1813_v37 = vld [vmem:[#allocation3] sm:$0xff] }
 0x633   :  { %v8037_v4 = vpop.f32.mrf.mxu0 }
 0x634   :  { %v1837_v34 = vrot.slane %v8037_v4, 2 }
 0x635   :  { %v1792_v8 = vpop.f32.mrf.mxu0 }
 0x636   :  { %v1818_v33 = vrot.slane %v1792_v8, 2 }
 0x637   :  { %v8038_v9 = vpop.f32.mrf.mxu0 }
 0x638   :  { %v1838_v10 = vrot.slane %v8038_v9, 2  ;;  %v8688_v9 = vld [vmem:[%s8965_s17 + $0x78] sm:$0xff]  }
 0x639   :  { %v1795_v59 = vpop.f32.mrf.mxu0 }
 0x63a   :  { %v1843_v57 = vadd.f32 %v1838_v10, %v1834_v12  ;;  %v1819_v60 = vrot.slane %v1795_v59, 2  ;;  %v1839_v36 = vsel %vm1817_vm7, %v1837_v34, %v1838_v10  ;;  %v2036_v10 = vld [vmem:[%s6510_s28] sm:$0x1]  ;;  %v8700_v34 = vld [vmem:[%s8965_s17 + $0x48] sm:$0xff]  }
 0x63b   :  { %v9408_v40 = vadd.f32 %v1839_v36, %v1833_v39  ;;  %v8702_v36 = vld [vmem:[%s8965_s17 + $0x40] sm:$0xff]   ;;  %v8704_v39 = vld [vmem:[%s8965_s17 + $0xb8] sm:$0xff]  }
 0x63c   :  { %1845 = vst [vmem:[#allocation3 + $0x18] sm:$0x3f] %v1843_v57  ;;  %v1824_v32 = vadd.f32 %v1819_v60, %v1814_v15  ;;  %v1820_v35 = vsel %vm1817_vm7, %v1818_v33, %v1819_v60  ;;  %v8690_v57 = vld [vmem:[%s8965_s17 + $0x70] sm:$0xff]   ;;  %v8692_v60 = vld [vmem:[%s8965_s17 + $0x68] sm:$0xff]   ;;  %v8694_v15 = vld [vmem:[%s8965_s17 + $0x60] sm:$0xff]  }
 0x63d   :  { %v9406_v38 = vadd.f32 %v1820_v35, %v1813_v37  ;;  %v1861_v48 = vmul.f32 %v9408_v40, %v9408_v40  ;;  %v8699_v33 = vld [vmem:[%s8965_s17 + $0x10] sm:$0xff]   ;;  %v8701_v35 = vld [vmem:[%s8965_s17 + $0x8] sm:$0xff]   ;;  %v8703_v37 = vld [vmem:[%s8965_s17] sm:$0xff]  }
 0x63e   :  { %1826 = vst [vmem:[#allocation3 + $0x8] sm:$0x3f] %v1824_v32  ;;  %v8698_v32 = vld [vmem:[%s8965_s17 + $0x50] sm:$0xff]  }
 0x63f   :  { %v1859_v43 = vmul.f32 %v9406_v38, %v9406_v38 }
 0x643   :  { %v9418_v45 = vld [vmem:[#allocation3 + $0x18] sm:$0xff] }
 0x644   :  { %v1862_v51 = vmul.f32 %v9418_v45, %v9418_v45 }
 0x645   :  { %v9410_v41 = vld [vmem:[#allocation3 + $0x8] sm:$0xff] }
 0x646   :  { %v1850_v42 = vadd.f32 %v9410_v41, %v9406_v38  ;;  %v1860_v44 = vmul.f32 %v9410_v41, %v9410_v41 }
 0x648   :  { %v1851_v47 = vadd.f32 %v1850_v42, %v9408_v40  ;;  %v1863_v49 = vadd.f32 %v1860_v44, %v1859_v43 }
 0x64a   :  { %v1852_v50 = vadd.f32 %v1851_v47, %v9418_v45  ;;  %v1864_v52 = vadd.f32 %v1863_v49, %v1861_v48 }
 0x64c   :  { %v1853_v53 = vrot.slane %v1852_v50, 4  ;;  %v1865_v54 = vadd.f32 %v1864_v52, %v1862_v51 }
 0x64e   :  { %v1854_v56 = vadd.f32 %v1853_v53, %v1852_v50  ;;  %v1866_v61 = vrot.slane %v1865_v54, 4 }
 0x650   :  { %v1855_v5 = vrot.slane %v1854_v56, 2  ;;  %v1867_v7 = vadd.f32 %v1866_v61, %v1865_v54 }
 0x652   :  { %v1856_v6 = vadd.f32 %v1855_v5, %v1854_v56  ;;  %v1868_v11 = vrot.slane %v1867_v7, 2 }
 0x654   :  { %v1857_v0 = vrot.slane %v1856_v6, 1  ;;  %v1869_v1 = vadd.f32 %v1868_v11, %v1867_v7 }
 0x656   :  { %v1858_v2 = vadd.f32 %v1857_v0, %v1856_v6  ;;  %v1870_v3 = vrot.slane %v1869_v1, 1 }
 0x658   :  { %8072 = vmatmul.mubr.f32.vlgmr.msra.gmra.mxu1 %v1858_v2  ;;  %v1871_v16 = vadd.f32 %v1870_v3, %v1869_v1  ;;  %v8707_v1 = vld [vmem:[%s8965_s17 + $0xa0] sm:$0xff]   ;;  %v8708_v2 = vld [vmem:[%s8965_s17 + $0x98] sm:$0xff]   ;;  %v8709_v3 = vld [vmem:[%s8965_s17 + $0x90] sm:$0xff]  }
 0x659   :  { %8110 = vmatpush3.msra.mxu1 %v9280_v46  ;;  %8111 = vmatprep.mubr.msk.f32.mxu1 %vm8904_vm1, %v8902_v14 }
 0x65a   :  { %8107 = vmatmul.mubr.f32.vlgmr.msra.gmra.mxu0 %v1871_v16  ;;  %8114 = vmatprep.subr.mxu1 %v8902_v14  ;;  %v8710_v16 = vld [vmem:[%s8965_s17 + $0x88] sm:$0xff]  }
 0x65b   :  { %8140 = vmatpush3.bf16.msra.mxu0 %v8689_v17  ;;  %v8711_v17 = vld [vmem:[%s8965_s17 + $0x80] sm:$0xff]  }
 0x65c   :  { %8141 = vmatprep.subr.bf16.mxu0 %v8691_v18 }
 0x65f   :  { %8142 = vmatpush3.bf16.msra.mxu0 %v8691_v18  ;;  %v9488_v18 = vld [vmem:[%s9137_s2 + $0x78] sm:$0xff] }
 0x660   :  { %8143 = vmatprep.subr.bf16.mxu0 %v8693_v19 }
 0x663   :  { %8144 = vmatpush3.bf16.msra.mxu0 %v8693_v19  ;;  %v9494_v19 = vld [vmem:[%s9137_s2 + $0x70] sm:$0xff] }
 0x664   :  { %8145 = vmatprep.subr.bf16.mxu0 %v8695_v20 }
 0x667   :  { %8146 = vmatpush3.bf16.msra.mxu0 %v8695_v20  ;;  %v9501_v20 = vld [vmem:[%s9137_s2 + $0x68] sm:$0xff] }
 0x668   :  { %8147 = vmatprep.subr.bf16.mxu0 %v8697_v21 }
 0x66b   :  { %8148 = vmatpush3.bf16.msra.mxu0 %v8697_v21  ;;  %v9508_v21 = vld [vmem:[%s9137_s2 + $0x60] sm:$0xff] }
 0x66c   :  { %8149 = vmatprep.subr.bf16.mxu0 %v8699_v33 }
 0x66f   :  { %8150 = vmatpush3.bf16.msra.mxu0 %v8699_v33 }
 0x670   :  { %8151 = vmatprep.subr.bf16.mxu0 %v8701_v35 }
 0x673   :  { %8152 = vmatpush3.bf16.msra.mxu0 %v8701_v35 }
 0x674   :  { %8153 = vmatprep.subr.bf16.mxu0 %v8703_v37 }
 0x677   :  { %8154 = vmatpush3.bf16.msra.mxu0 %v8703_v37 }
 0x678   :  { %8179 = vmatprep.subr.mxu0 %v8902_v14 }
 0x718   :  { %v1954_v22 = vpop.f32.mrf.mxu1 }
 0x719   :  { %v1958_v23 = vmul.f32 0.001953125, %v1954_v22  ;;  %v9512_v22 = vld [vmem:[%s9137_s2 + $0x58] sm:$0xff] }
 0x71a   :  { %v8073_v24 = vpop.f32.mrf.mxu1  ;;  %v2025_v25 = vpop.f32.mrf.mxu0 }
 0x71b   :  { %v2030_v26 = vmul.f32 %v1958_v23, %v1958_v23  ;;  %v2029_v27 = vmul.f32 0.001953125, %v2025_v25  ;;  %v9526_v24 = vld [vmem:[%s9137_s2 + $0x48] sm:$0xff]  ;;  %v9533_v25 = vld [vmem:[%s9137_s2 + $0x40] sm:$0xff] }
 0x71c   :  { %v8108_v28 = vpop.f32.mrf.mxu0 }
 0x71d   :  { %v2031_v29 = vsub.f32 %v2029_v27, %v2030_v26  ;;  %v9540_v26 = vld [vmem:[%s9137_s2 + $0x38] sm:$0xff]  ;;  %v9547_v27 = vld [vmem:[%s9137_s2 + $0x30] sm:$0xff]  ;;  %v9554_v28 = vld [vmem:[%s9137_s2 + $0x28] sm:$0xff] }
 0x71f   :  { %v2033_v30 = vadd.f32 1e-05, %v2031_v29  ;;  %v9561_v29 = vld [vmem:[%s9137_s2 + $0x20] sm:$0xff] }
 0x721   :  { %8884 = vrsqrt.f32 %v2033_v30  ;;  %v9568_v30 = vld [vmem:[%s9137_s2 + $0x18] sm:$0xff] }
 0x72e   :  { %v8885_v4 = vpop.eup %8884 }
 0x72f   :  { %v2035_v8 = vmul.f32 %v8885_v4, %v2032_v31  ;;  %v9575_v31 = vld [vmem:[%s9137_s2 + $0x10] sm:$0xff]  ;;  %v9582_v4 = vld [vmem:[%s9137_s2 + $0x8] sm:$0xff] }
 0x731   :  { %8112 = vmatmul.mubr.msk.f32.vlgmr.msra.gmra.mxu1 %vm1293_vm6, %v2035_v8  ;;  %v2037_v12 = vmul.f32 %v2035_v8, %v1958_v23  ;;  %v9519_v23 = vld [vmem:[%s9137_s2 + $0x50] sm:$0xff]  ;;  %v9589_v8 = vld [vmem:[%s9137_s2] sm:$0xff] }
 0x732   :  { %8115 = vmatpush3.msra.mxu1 %v9280_v46  ;;  %8116 = vmatprep.mubr.msk.f32.mxu1 %vm8904_vm1, %v8902_v14  ;;  %v8696_v46 = vld [vmem:[%s8965_s17 + $0x58] sm:$0xff]  }
 0x733   :  { %v2038_v59 = vsub.f32 %v2036_v10, %v2037_v12  ;;  %8119 = vmatprep.subr.bf16.mxu1 %v8688_v9 }
 0x735   :  { %8117 = vmatmul.mubr.msk.f32.vlgmr.msra.gmra.mxu1 %vm1293_vm6, %v2038_v59 }
 0x736   :  { %8120 = vmatpush3.bf16.msra.mxu1 %v8688_v9 }
 0x737   :  { %8121 = vmatprep.subr.bf16.mxu1 %v8690_v57 }
 0x73a   :  { %8122 = vmatpush3.bf16.msra.mxu1 %v8690_v57 }
 0x73b   :  { %8123 = vmatprep.subr.bf16.mxu1 %v8692_v60 }
 0x73e   :  { %8124 = vmatpush3.bf16.msra.mxu1 %v8692_v60 }
 0x73f   :  { %8125 = vmatprep.subr.bf16.mxu1 %v8694_v15 }
 0x742   :  { %8126 = vmatpush3.bf16.msra.mxu1 %v8694_v15 }
 0x743   :  { %8127 = vmatprep.subr.bf16.mxu1 %v8696_v46 }
 0x746   :  { %8128 = vmatpush3.bf16.msra.mxu1 %v8696_v46 }
 0x747   :  { %8129 = vmatprep.subr.bf16.mxu1 %v8698_v32 }
 0x74a   :  { %8130 = vmatpush3.bf16.msra.mxu1 %v8698_v32 }
 0x74b   :  { %8131 = vmatprep.subr.bf16.mxu1 %v8700_v34 }
 0x74e   :  { %8132 = vmatpush3.bf16.msra.mxu1 %v8700_v34 }
 0x74f   :  { %8133 = vmatprep.subr.bf16.mxu1 %v8702_v36 }
 0x752   :  { %8134 = vmatpush3.bf16.msra.mxu1 %v8702_v36 }
 0x753   :  { %8159 = vmatprep.subr.bf16.mxu1 %v8704_v39 }
 0x7f1   :  { %v2109_v42 = vpop.f32.mrf.mxu1 }
 0x7f2   :  { %v2189_v43 = vrot.slane %v2109_v42, %v9102_v55 }
 0x7f3   :  { %v8113_v44 = vpop.f32.mrf.mxu1 }
 0x7f4   :  { %v2190_v47 = vmul.f32 %v2189_v43, %v9406_v38  ;;  %v2191_v49 = vmul.f32 %v2189_v43, %v9410_v41  ;;  %v2192_v50 = vmul.f32 %v2189_v43, %v9408_v40  ;;  %v2193_v51 = vmul.f32 %v2189_v43, %v9418_v45  ;;  %v8705_v40 = vld [vmem:[%s8965_s17 + $0xb0] sm:$0xff]   ;;  %v8706_v45 = vld [vmem:[%s8965_s17 + $0xa8] sm:$0xff]   ;;  %s8916_s17 = smov 11  }
 0x7f5   :  { %v2182_v48 = vpop.f32.mrf.mxu1  ;;  %s6512_s4 = sld [smem:[%s10337_s0 + %s8916_s17]]  }
 0x7f6   :  { %v2197_v52 = vrot.slane %v2182_v48, %v9102_v55 }
 0x7f7   :  { %v8118_v53 = vpop.f32.mrf.mxu1 }
 0x7f8   :  { %v2198_v54 = vadd.f32 %v2197_v52, %v2190_v47  ;;  %v2199_v56 = vadd.f32 %v2197_v52, %v2191_v49  ;;  %v2200_v61 = vadd.f32 %v2197_v52, %v2192_v50  ;;  %v2201_v5 = vadd.f32 %v2197_v52, %v2193_v51 }
 0x7fa   :  { %v2202_v7 = vmax.f32 %v2198_v54, 0.0  ;;  %v2203_v6 = vmax.f32 %v2199_v56, 0.0  ;;  %v2204_v11 = vmax.f32 %v2200_v61, 0.0  ;;  %v2205_v38 = vmax.f32 %v2201_v5, 0.0 }
 0x7fc   :  { %v9465_v0 = vpack.c.bf16 %v2203_v6, %v2202_v7  ;;  %v9467_v41 = vpack.c.bf16 %v2205_v38, %v2204_v11 }
 0x7fe   :  { %8135 = vmatprep.mubr.bf16.mxu1 %v9465_v0  ;;  %8155 = vmatprep.mubr.bf16.mxu0 %v9465_v0 }
 0x7ff   :  { %8136 = vmatmul.mubr.bf16.vlgmr.msra.gmra.mxu1 %v9467_v41  ;;  %8156 = vmatmul.mubr.bf16.vlgmr.msra.gmra.mxu0 %v9467_v41 }
 0x800   :  { %8160 = vmatpush3.bf16.msra.mxu1 %v8704_v39  ;;  %8175 = vmatprep.mubr.bf16.mxu1 %v9465_v0 }
 0x801   :  { %8161 = vmatprep.subr.bf16.mxu1 %v8705_v40  ;;  %8211 = vmatprep.mubr.msk.f32.mxu0 %vm8904_vm1, %v8902_v14 }
 0x802   :  { %8180 = vmatpush3.msra.mxu0 %v9488_v18 }
 0x803   :  { %8181 = vmatprep.subr.mxu0 %v8902_v14 }
 0x804   :  { %8162 = vmatpush3.bf16.msra.mxu1 %v8705_v40  ;;  %8182 = vmatpush3.msra.mxu0 %v9494_v19 }
 0x805   :  { %8163 = vmatprep.subr.bf16.mxu1 %v8706_v45  ;;  %8183 = vmatprep.subr.mxu0 %v8902_v14 }
 0x806   :  { %8184 = vmatpush3.msra.mxu0 %v9501_v20 }
 0x807   :  { %8185 = vmatprep.subr.mxu0 %v8902_v14 }
 0x808   :  { %8164 = vmatpush3.bf16.msra.mxu1 %v8706_v45  ;;  %8186 = vmatpush3.msra.mxu0 %v9508_v21 }
 0x809   :  { %8165 = vmatprep.subr.bf16.mxu1 %v8707_v1  ;;  %8187 = vmatprep.subr.mxu0 %v8902_v14 }
 0x80a   :  { %8188 = vmatpush3.msra.mxu0 %v9512_v22 }
 0x80b   :  { %8189 = vmatprep.subr.mxu0 %v8902_v14 }
 0x80c   :  { %8166 = vmatpush3.bf16.msra.mxu1 %v8707_v1  ;;  %8190 = vmatpush3.msra.mxu0 %v9519_v23 }
 0x80d   :  { %8167 = vmatprep.subr.bf16.mxu1 %v8708_v2  ;;  %8191 = vmatprep.subr.mxu0 %v8902_v14 }
 0x80e   :  { %8192 = vmatpush3.msra.mxu0 %v9526_v24 }
 0x80f   :  { %8193 = vmatprep.subr.mxu0 %v8902_v14 }
 0x810   :  { %8168 = vmatpush3.bf16.msra.mxu1 %v8708_v2  ;;  %8194 = vmatpush3.msra.mxu0 %v9533_v25 }
 0x811   :  { %8169 = vmatprep.subr.bf16.mxu1 %v8709_v3  ;;  %8195 = vmatprep.subr.mxu0 %v8902_v14 }
 0x812   :  { %8196 = vmatpush3.msra.mxu0 %v9540_v26 }
 0x813   :  { %8197 = vmatprep.subr.mxu0 %v8902_v14 }
 0x814   :  { %8170 = vmatpush3.bf16.msra.mxu1 %v8709_v3  ;;  %8198 = vmatpush3.msra.mxu0 %v9547_v27 }
 0x815   :  { %8171 = vmatprep.subr.bf16.mxu1 %v8710_v16  ;;  %8199 = vmatprep.subr.mxu0 %v8902_v14 }
 0x816   :  { %8200 = vmatpush3.msra.mxu0 %v9554_v28 }
 0x817   :  { %8201 = vmatprep.subr.mxu0 %v8902_v14 }
 0x818   :  { %8172 = vmatpush3.bf16.msra.mxu1 %v8710_v16  ;;  %8202 = vmatpush3.msra.mxu0 %v9561_v29 }
 0x819   :  { %8173 = vmatprep.subr.bf16.mxu1 %v8711_v17  ;;  %8203 = vmatprep.subr.mxu0 %v8902_v14 }
 0x81a   :  { %8204 = vmatpush3.msra.mxu0 %v9568_v30 }
 0x81b   :  { %8205 = vmatprep.subr.mxu0 %v8902_v14 }
 0x81c   :  { %8174 = vmatpush3.bf16.msra.mxu1 %v8711_v17  ;;  %8206 = vmatpush3.msra.mxu0 %v9575_v31 }
 0x81d   :  { %8214 = vmatprep.subr.mxu1 %v8902_v14  ;;  %8207 = vmatprep.subr.mxu0 %v8902_v14 }
 0x81e   :  { %8208 = vmatpush3.msra.mxu0 %v9582_v4 }
 0x81f   :  { %8176 = vmatmul.mubr.bf16.vlgmr.msra.gmra.mxu1 %v9467_v41  ;;  %8209 = vmatprep.subr.mxu0 %v8902_v14 }
 0x820   :  { %8246 = vmatprep.mubr.msk.f32.mxu1 %vm8904_vm1, %v8902_v14  ;;  %8215 = vmatpush3.msra.mxu1 %v9488_v18 }
 0x821   :  { %8216 = vmatprep.subr.mxu1 %v8902_v14  ;;  %8210 = vmatpush3.msra.mxu0 %v9589_v8 }
 0x822   :  { %8217 = vmatpush3.msra.mxu1 %v9494_v19  ;;  %8249 = vmatprep.subr.mxu0 %v8902_v14 }
 0x823   :  { %8218 = vmatprep.subr.mxu1 %v8902_v14 }
 0x824   :  { %8219 = vmatpush3.msra.mxu1 %v9501_v20 }
 0x825   :  { %8220 = vmatprep.subr.mxu1 %v8902_v14 }
 0x826   :  { %8221 = vmatpush3.msra.mxu1 %v9508_v21 }
 0x827   :  { %8222 = vmatprep.subr.mxu1 %v8902_v14 }
 0x828   :  { %8223 = vmatpush3.msra.mxu1 %v9512_v22 }
 0x829   :  { %8224 = vmatprep.subr.mxu1 %v8902_v14 }
 0x82a   :  { %8225 = vmatpush3.msra.mxu1 %v9519_v23 }
 0x82b   :  { %8226 = vmatprep.subr.mxu1 %v8902_v14 }
 0x82c   :  { %8227 = vmatpush3.msra.mxu1 %v9526_v24 }
 0x82d   :  { %8228 = vmatprep.subr.mxu1 %v8902_v14 }
 0x82e   :  { %8229 = vmatpush3.msra.mxu1 %v9533_v25 }
 0x82f   :  { %8230 = vmatprep.subr.mxu1 %v8902_v14 }
 0x830   :  { %8231 = vmatpush3.msra.mxu1 %v9540_v26 }
 0x831   :  { %8232 = vmatprep.subr.mxu1 %v8902_v14 }
 0x832   :  { %8233 = vmatpush3.msra.mxu1 %v9547_v27 }
 0x833   :  { %8234 = vmatprep.subr.mxu1 %v8902_v14 }
 0x834   :  { %8235 = vmatpush3.msra.mxu1 %v9554_v28 }
 0x835   :  { %8236 = vmatprep.subr.mxu1 %v8902_v14 }
 0x836   :  { %8237 = vmatpush3.msra.mxu1 %v9561_v29 }
 0x837   :  { %8238 = vmatprep.subr.mxu1 %v8902_v14 }
 0x838   :  { %8239 = vmatpush3.msra.mxu1 %v9568_v30 }
 0x839   :  { %8240 = vmatprep.subr.mxu1 %v8902_v14 }
 0x83a   :  { %8241 = vmatpush3.msra.mxu1 %v9575_v31 }
 0x83b   :  { %8242 = vmatprep.subr.mxu1 %v8902_v14 }
 0x83c   :  { %8243 = vmatpush3.msra.mxu1 %v9582_v4 }
 0x83d   :  { %8244 = vmatprep.subr.mxu1 %v8902_v14 }
 0x83e   :  { %8245 = vmatpush3.msra.mxu1 %v9589_v8 }
 0x8bf   :  { %v8137_v9 = vpop.f32.mrf.mxu1  ;;  %v8157_v10 = vpop.f32.mrf.mxu0 }
 0x8c0   :  { %2324 = vst [vmem:[#allocation3 + $0x10] sm:$0xff] %v8137_v9 }
 0x8c1   :  { %v2307_v12 = vpop.f32.mrf.mxu1  ;;  %v2424_v57 = vpop.f32.mrf.mxu0 }
 0x8c2   :  { %2322 = vst [vmem:[#allocation3] sm:$0xff] %v2307_v12 }
 0x8c3   :  { %v8138_v59 = vpop.f32.mrf.mxu1  ;;  %v8158_v15 = vpop.f32.mrf.mxu0 }
 0x8c4   :  { %2325 = vst [vmem:[#allocation3 + $0x18] sm:$0xff] %v8138_v59 }
 0x8c5   :  { %v2310_v60 = vpop.f32.mrf.mxu1  ;;  %v2427_v35 = vpop.f32.mrf.mxu0 }
 0x8c6   :  { %2323 = vst [vmem:[#allocation3 + $0x8] sm:$0xff] %v2310_v60 }
 0x8cb   :  { %v2573_v46 = vld [vmem:[#allocation3 + $0x1c] sm:$0xf]  ;;  %v2572_v32 = vld [vmem:[#allocation3 + $0x14] sm:$0xff] }
 0x8cc   :  { %v2575_v33 = vadd.f32 %v8158_v15, %v2573_v46  ;;  %v2574_v34 = vadd.f32 %v8157_v10, %v2572_v32 }
 0x8cd   :  { %v2554_v36 = vld [vmem:[#allocation3 + $0xc] sm:$0xf]  ;;  %v2553_v37 = vld [vmem:[#allocation3 + $0x4] sm:$0xff] }
 0x8ce   :  { %2577 = vst [vmem:[#allocation3 + $0x1c] sm:$0xf] %v2575_v33  ;;  %v2556_v39 = vadd.f32 %v2554_v36, %v2427_v35  ;;  %2576 = vst [vmem:[#allocation3 + $0x14] sm:$0xff] %v2574_v34  ;;  %v2555_v42 = vadd.f32 %v2553_v37, %v2424_v57 }
 0x8d0   :  { %2558 = vst [vmem:[#allocation3 + $0xc] sm:$0xf] %v2556_v39  ;;  %2557 = vst [vmem:[#allocation3 + $0x4] sm:$0xff] %v2555_v42 }
 0x8d5   :  { %v2579_v49 = vld [vmem:[#allocation3 + $0x18] sm:$0xf]  ;;  %v2578_v38 = vld [vmem:[#allocation3 + $0x10] sm:$0xff] }
 0x8d7   :  { %v2560_v53 = vld [vmem:[#allocation3 + $0x8] sm:$0xf]  ;;  %v2559_v6 = vld [vmem:[#allocation3] sm:$0xff] }
 0x8df   :  { %v8177_v43 = vpop.f32.mrf.mxu1 }
 0x8e0   :  { %v2582_v61 = vrot.slane %v8177_v43, 4 }
 0x8e1   :  { %v2538_v44 = vpop.f32.mrf.mxu1 }
 0x8e2   :  { %v2563_v56 = vrot.slane %v2538_v44, 4 }
 0x8e3   :  { %v8178_v47 = vpop.f32.mrf.mxu1 }
 0x8e4   :  { %v2583_v48 = vrot.slane %v8178_v47, 4  ;;  %v9623_v47 = vld [vmem:[%s9277_s8] sm:$0xff] }
 0x8e5   :  { %v2541_v50 = vpop.f32.mrf.mxu1 }
 0x8e6   :  { %v2588_v51 = vadd.f32 %v2583_v48, %v2579_v49  ;;  %v2564_v52 = vrot.slane %v2541_v50, 4  ;;  %v2584_v7 = vsel %vm637_vm4, %v2582_v61, %v2583_v48  ;;  %v8713_v48 = vld [vmem:[%s8971_s21 + $0x38] sm:$0xff]   ;;  %v8715_v49 = vld [vmem:[%s8971_s21 + $0x30] sm:$0xff]   ;;  %v8717_v50 = vld [vmem:[%s8971_s21 + $0x28] sm:$0xff]  }
 0x8e7   :  { %v9602_v40 = vadd.f32 %v2584_v7, %v2578_v38  ;;  %8279 = vmatprep.subr.bf16.mxu1 %v8713_v48 }
 0x8e8   :  { %2590 = vst [vmem:[#allocation3 + $0x18] sm:$0xf] %v2588_v51  ;;  %v2569_v54 = vadd.f32 %v2564_v52, %v2560_v53  ;;  %v2565_v5 = vsel %vm637_vm4, %v2563_v56, %v2564_v52  ;;  %v8719_v51 = vld [vmem:[%s8971_s21 + $0x20] sm:$0xff]   ;;  %v8721_v52 = vld [vmem:[%s8971_s21 + $0x18] sm:$0xff]  }
 0x8e9   :  { %v9600_v11 = vadd.f32 %v2565_v5, %v2559_v6  ;;  %v2606_v9 = vmul.f32 %v9602_v40, %v9602_v40 }
 0x8ea   :  { %2571 = vst [vmem:[#allocation3 + $0x8] sm:$0xf] %v2569_v54 }
 0x8eb   :  { %v2604_v2 = vmul.f32 %v9600_v11, %v9600_v11 }
 0x8ef   :  { %v9612_v16 = vld [vmem:[#allocation3 + $0x18] sm:$0xff] }
 0x8f0   :  { %v2607_v59 = vmul.f32 %v9612_v16, %v9612_v16 }
 0x8f1   :  { %v9604_v45 = vld [vmem:[#allocation3 + $0x8] sm:$0xff] }
 0x8f2   :  { %v2595_v1 = vadd.f32 %v9604_v45, %v9600_v11  ;;  %v2605_v3 = vmul.f32 %v9604_v45, %v9604_v45 }
 0x8f4   :  { %v2596_v17 = vadd.f32 %v2595_v1, %v9602_v40  ;;  %v2608_v10 = vadd.f32 %v2605_v3, %v2604_v2  ;;  %v2777_v2 = vld [vmem:[%s6512_s4] sm:$0x1] }
 0x8f6   :  { %v2597_v12 = vadd.f32 %v2596_v17, %v9612_v16  ;;  %v2609_v57 = vadd.f32 %v2608_v10, %v2606_v9  ;;  %v8712_v9 = vld [vmem:[%s8971_s21 + $0x78] sm:$0xff]   ;;  %v2781_v10 = vld [vmem:[%s6513_s10] sm:$0x1] }
 0x8f8   :  { %v2598_v60 = vrot.slane %v2597_v12, 4  ;;  %v2610_v15 = vadd.f32 %v2609_v57, %v2607_v59  ;;  %v8714_v57 = vld [vmem:[%s8971_s21 + $0x70] sm:$0xff]  }
 0x8fa   :  { %v2599_v46 = vadd.f32 %v2598_v60, %v2597_v12  ;;  %v2611_v32 = vrot.slane %v2610_v15, 4  ;;  %v8716_v60 = vld [vmem:[%s8971_s21 + $0x68] sm:$0xff]  }
 0x8fc   :  { %v2600_v33 = vrot.slane %v2599_v46, 2  ;;  %v2612_v34 = vadd.f32 %v2611_v32, %v2610_v15  ;;  %v8718_v15 = vld [vmem:[%s8971_s21 + $0x60] sm:$0xff]   ;;  %v8722_v32 = vld [vmem:[%s8971_s21 + $0x50] sm:$0xff]  }
 0x8fe   :  { %v2601_v35 = vadd.f32 %v2600_v33, %v2599_v46  ;;  %v2613_v36 = vrot.slane %v2612_v34, 2  ;;  %v8720_v46 = vld [vmem:[%s8971_s21 + $0x58] sm:$0xff]   ;;  %v8723_v33 = vld [vmem:[%s8971_s21 + $0x10] sm:$0xff]  }
 0x900   :  { %v2602_v37 = vrot.slane %v2601_v35, 1  ;;  %v2614_v39 = vadd.f32 %v2613_v36, %v2612_v34  ;;  %v8724_v34 = vld [vmem:[%s8971_s21 + $0x48] sm:$0xff]   ;;  %v8726_v36 = vld [vmem:[%s8971_s21 + $0x40] sm:$0xff]  }
 0x902   :  { %v2603_v42 = vadd.f32 %v2602_v37, %v2601_v35  ;;  %v2615_v43 = vrot.slane %v2614_v39, 1  ;;  %v8725_v35 = vld [vmem:[%s8971_s21 + $0x8] sm:$0xff]   ;;  %v8727_v37 = vld [vmem:[%s8971_s21] sm:$0xff]  }
 0x904   :  { %8212 = vmatmul.mubr.f32.vlgmr.msra.gmra.mxu0 %v2603_v42  ;;  %v2616_v44 = vadd.f32 %v2615_v43, %v2614_v39  ;;  %v8728_v39 = vld [vmem:[%s8971_s21 + $0xb8] sm:$0xff]  }
 0x905   :  { %8251 = vmatprep.mubr.msk.f32.mxu0 %vm8904_vm1, %v8902_v14  ;;  %8250 = vmatpush3.msra.mxu0 %v9623_v47 }
 0x906   :  { %8247 = vmatmul.mubr.f32.vlgmr.msra.gmra.mxu1 %v2616_v44  ;;  %8254 = vmatprep.subr.mxu0 %v8902_v14 }
 0x907   :  { %8280 = vmatpush3.bf16.msra.mxu1 %v8713_v48 }
 0x908   :  { %8281 = vmatprep.subr.bf16.mxu1 %v8715_v49 }
 0x90b   :  { %8282 = vmatpush3.bf16.msra.mxu1 %v8715_v49 }
 0x90c   :  { %8283 = vmatprep.subr.bf16.mxu1 %v8717_v50 }
 0x90f   :  { %8284 = vmatpush3.bf16.msra.mxu1 %v8717_v50 }
 0x910   :  { %8285 = vmatprep.subr.bf16.mxu1 %v8719_v51 }
 0x913   :  { %8286 = vmatpush3.bf16.msra.mxu1 %v8719_v51 }
 0x914   :  { %8287 = vmatprep.subr.bf16.mxu1 %v8721_v52 }
 0x917   :  { %8288 = vmatpush3.bf16.msra.mxu1 %v8721_v52 }
 0x918   :  { %8289 = vmatprep.subr.bf16.mxu1 %v8723_v33 }
 0x91b   :  { %8290 = vmatpush3.bf16.msra.mxu1 %v8723_v33 }
 0x91c   :  { %8291 = vmatprep.subr.bf16.mxu1 %v8725_v35 }
 0x91f   :  { %8292 = vmatpush3.bf16.msra.mxu1 %v8725_v35 }
 0x920   :  { %8293 = vmatprep.subr.bf16.mxu1 %v8727_v37 }
 0x923   :  { %8294 = vmatpush3.bf16.msra.mxu1 %v8727_v37 }
 0x924   :  { %8319 = vmatprep.subr.mxu1 %v8902_v14 }
 0x9c4   :  { %v2699_v53 = vpop.f32.mrf.mxu0 }
 0x9c5   :  { %v2703_v54 = vmul.f32 0.001953125, %v2699_v53 }
 0x9c6   :  { %v8213_v56 = vpop.f32.mrf.mxu0  ;;  %v2770_v61 = vpop.f32.mrf.mxu1 }
 0x9c7   :  { %v2775_v5 = vmul.f32 %v2703_v54, %v2703_v54  ;;  %v2774_v7 = vmul.f32 0.001953125, %v2770_v61 }
 0x9c8   :  { %v8248_v6 = vpop.f32.mrf.mxu1 }
 0x9c9   :  { %v2776_v38 = vsub.f32 %v2774_v7, %v2775_v5 }
 0x9cb   :  { %v2778_v1 = vadd.f32 1e-05, %v2776_v38 }
 0x9cd   :  { %8886 = vrsqrt.f32 %v2778_v1 }
 0x9da   :  { %v8887_v3 = vpop.eup %8886 }
 0x9db   :  { %v2780_v17 = vmul.f32 %v8887_v3, %v2777_v2 }
 0x9dd   :  { %8252 = vmatmul.mubr.msk.f32.vlgmr.msra.gmra.mxu0 %vm1293_vm6, %v2780_v17  ;;  %v2782_v12 = vmul.f32 %v2780_v17, %v2703_v54  ;;  %v8732_v17 = vld [vmem:[%s8971_s21 + $0x98] sm:$0xff]  }
 0x9de   :  { %8255 = vmatpush3.msra.mxu0 %v9623_v47  ;;  %8256 = vmatprep.mubr.msk.f32.mxu0 %vm8904_vm1, %v8902_v14 }
 0x9df   :  { %v2783_v59 = vsub.f32 %v2781_v10, %v2782_v12  ;;  %8259 = vmatprep.subr.bf16.mxu0 %v8712_v9  ;;  %v8734_v10 = vld [vmem:[%s8971_s21 + $0x88] sm:$0xff]   ;;  %v8735_v12 = vld [vmem:[%s8971_s21 + $0x80] sm:$0xff]  }
 0x9e1   :  { %8257 = vmatmul.mubr.msk.f32.vlgmr.msra.gmra.mxu0 %vm1293_vm6, %v2783_v59 }
 0x9e2   :  { %8260 = vmatpush3.bf16.msra.mxu0 %v8712_v9  ;;  %v8733_v9 = vld [vmem:[%s8971_s21 + $0x90] sm:$0xff]  }
 0x9e3   :  { %8261 = vmatprep.subr.bf16.mxu0 %v8714_v57 }
 0x9e6   :  { %8262 = vmatpush3.bf16.msra.mxu0 %v8714_v57 }
 0x9e7   :  { %8263 = vmatprep.subr.bf16.mxu0 %v8716_v60 }
 0x9ea   :  { %8264 = vmatpush3.bf16.msra.mxu0 %v8716_v60 }
 0x9eb   :  { %8265 = vmatprep.subr.bf16.mxu0 %v8718_v15 }
 0x9ee   :  { %8266 = vmatpush3.bf16.msra.mxu0 %v8718_v15 }
 0x9ef   :  { %8267 = vmatprep.subr.bf16.mxu0 %v8720_v46 }
 0x9f2   :  { %8268 = vmatpush3.bf16.msra.mxu0 %v8720_v46 }
 0x9f3   :  { %8269 = vmatprep.subr.bf16.mxu0 %v8722_v32 }
 0x9f6   :  { %8270 = vmatpush3.bf16.msra.mxu0 %v8722_v32 }
 0x9f7   :  { %8271 = vmatprep.subr.bf16.mxu0 %v8724_v34 }
 0x9fa   :  { %8272 = vmatpush3.bf16.msra.mxu0 %v8724_v34 }
 0x9fb   :  { %8273 = vmatprep.subr.bf16.mxu0 %v8726_v36 }
 0x9fe   :  { %8274 = vmatpush3.bf16.msra.mxu0 %v8726_v36 }
 0x9ff   :  { %8299 = vmatprep.subr.bf16.mxu0 %v8728_v39 }
 0xa9d   :  { %v2854_v42 = vpop.f32.mrf.mxu0 }
 0xa9e   :  { %v2934_v43 = vrot.slane %v2854_v42, %v9102_v55 }
 0xa9f   :  { %v8253_v44 = vpop.f32.mrf.mxu0 }
 0xaa0   :  { %v2935_v48 = vmul.f32 %v2934_v43, %v9600_v11  ;;  %v2936_v50 = vmul.f32 %v2934_v43, %v9604_v45  ;;  %v2937_v51 = vmul.f32 %v2934_v43, %v9602_v40  ;;  %v2938_v52 = vmul.f32 %v2934_v43, %v9612_v16  ;;  %v8729_v45 = vld [vmem:[%s8971_s21 + $0xb0] sm:$0xff]   ;;  %v8730_v40 = vld [vmem:[%s8971_s21 + $0xa8] sm:$0xff]   ;;  %v8731_v16 = vld [vmem:[%s8971_s21 + $0xa0] sm:$0xff]   ;;  %s8918_s21 = smov 14  }
 0xaa1   :  { %v2927_v49 = vpop.f32.mrf.mxu0  ;;  %s6515_s15 = sld [smem:[%s10337_s0 + %s8918_s21]]  }
 0xaa2   :  { %v2942_v53 = vrot.slane %v2927_v49, %v9102_v55 }
 0xaa3   :  { %v8258_v54 = vpop.f32.mrf.mxu0 }
 0xaa4   :  { %v2943_v56 = vadd.f32 %v2942_v53, %v2935_v48  ;;  %v2944_v61 = vadd.f32 %v2942_v53, %v2936_v50  ;;  %v2945_v5 = vadd.f32 %v2942_v53, %v2937_v51  ;;  %v2946_v7 = vadd.f32 %v2942_v53, %v2938_v52 }
 0xaa6   :  { %v2947_v6 = vmax.f32 %v2943_v56, 0.0  ;;  %v2948_v38 = vmax.f32 %v2944_v61, 0.0  ;;  %v2949_v1 = vmax.f32 %v2945_v5, 0.0  ;;  %v2950_v11 = vmax.f32 %v2946_v7, 0.0  ;;  %v8738_v56 = vld [vmem:[%s8976_s25 + $0x78] sm:$0xff]   ;;  %v8742_v5 = vld [vmem:[%s8976_s25 + $0x70] sm:$0xff]  }
 0xaa7   :  { %v8739_v61 = vld [vmem:[%s8976_s25 + $0x38] sm:$0xff]   ;;  %v8743_v7 = vld [vmem:[%s8976_s25 + $0x30] sm:$0xff]  }
 0xaa8   :  { %v9662_v2 = vpack.c.bf16 %v2948_v38, %v2947_v6  ;;  %v9664_v3 = vpack.c.bf16 %v2950_v11, %v2949_v1  ;;  %v8746_v6 = vld [vmem:[%s8976_s25 + $0x68] sm:$0xff]   ;;  %v8750_v1 = vld [vmem:[%s8976_s25 + $0x60] sm:$0xff]  }
 0xaa9   :  { %v8747_v38 = vld [vmem:[%s8976_s25 + $0x28] sm:$0xff]   ;;  %v8751_v11 = vld [vmem:[%s8976_s25 + $0x20] sm:$0xff]  }
 0xaaa   :  { %8275 = vmatprep.mubr.bf16.mxu0 %v9662_v2  ;;  %8295 = vmatprep.mubr.bf16.mxu1 %v9662_v2 }
 0xaab   :  { %8276 = vmatmul.mubr.bf16.vlgmr.msra.gmra.mxu0 %v9664_v3  ;;  %8296 = vmatmul.mubr.bf16.vlgmr.msra.gmra.mxu1 %v9664_v3 }
 0xaac   :  { %8300 = vmatpush3.bf16.msra.mxu0 %v8728_v39  ;;  %8315 = vmatprep.mubr.bf16.mxu0 %v9662_v2 }
 0xaad   :  { %8301 = vmatprep.subr.bf16.mxu0 %v8729_v45  ;;  %8320 = vmatpush3.msra.mxu1 %v9488_v18 }
 0xaae   :  { %8321 = vmatprep.subr.mxu1 %v8902_v14  ;;  %8351 = vmatprep.mubr.msk.f32.mxu1 %vm8904_vm1, %v8902_v14 }
 0xaaf   :  { %8322 = vmatpush3.msra.mxu1 %v9494_v19 }
 0xab0   :  { %8302 = vmatpush3.bf16.msra.mxu0 %v8729_v45  ;;  %8323 = vmatprep.subr.mxu1 %v8902_v14  ;;  %v8754_v45 = vld [vmem:[%s8976_s25 + $0x58] sm:$0xff]  }
 0xab1   :  { %8303 = vmatprep.subr.bf16.mxu0 %v8730_v40  ;;  %8324 = vmatpush3.msra.mxu1 %v9501_v20 }
 0xab2   :  { %8325 = vmatprep.subr.mxu1 %v8902_v14 }
 0xab3   :  { %8326 = vmatpush3.msra.mxu1 %v9508_v21 }
 0xab4   :  { %8304 = vmatpush3.bf16.msra.mxu0 %v8730_v40  ;;  %8327 = vmatprep.subr.mxu1 %v8902_v14  ;;  %v8755_v40 = vld [vmem:[%s8976_s25 + $0x18] sm:$0xff]  }
 0xab5   :  { %8305 = vmatprep.subr.bf16.mxu0 %v8731_v16  ;;  %8328 = vmatpush3.msra.mxu1 %v9512_v22 }
 0xab6   :  { %8329 = vmatprep.subr.mxu1 %v8902_v14 }
 0xab7   :  { %8330 = vmatpush3.msra.mxu1 %v9519_v23 }
 0xab8   :  { %8306 = vmatpush3.bf16.msra.mxu0 %v8731_v16  ;;  %8331 = vmatprep.subr.mxu1 %v8902_v14 }
 0xab9   :  { %8307 = vmatprep.subr.bf16.mxu0 %v8732_v17  ;;  %8332 = vmatpush3.msra.mxu1 %v9526_v24 }
 0xaba   :  { %8333 = vmatprep.subr.mxu1 %v8902_v14 }
 0xabb   :  { %8334 = vmatpush3.msra.mxu1 %v9533_v25 }
 0xabc   :  { %8308 = vmatpush3.bf16.msra.mxu0 %v8732_v17  ;;  %8335 = vmatprep.subr.mxu1 %v8902_v14 }
 0xabd   :  { %8309 = vmatprep.subr.bf16.mxu0 %v8733_v9  ;;  %8336 = vmatpush3.msra.mxu1 %v9540_v26 }
 0xabe   :  { %8337 = vmatprep.subr.mxu1 %v8902_v14 }
 0xabf   :  { %8338 = vmatpush3.msra.mxu1 %v9547_v27 }
 0xac0   :  { %8310 = vmatpush3.bf16.msra.mxu0 %v8733_v9  ;;  %8339 = vmatprep.subr.mxu1 %v8902_v14 }
 0xac1   :  { %8311 = vmatprep.subr.bf16.mxu0 %v8734_v10  ;;  %8340 = vmatpush3.msra.mxu1 %v9554_v28 }
 0xac2   :  { %8341 = vmatprep.subr.mxu1 %v8902_v14 }
 0xac3   :  { %8342 = vmatpush3.msra.mxu1 %v9561_v29 }
 0xac4   :  { %8312 = vmatpush3.bf16.msra.mxu0 %v8734_v10  ;;  %8343 = vmatprep.subr.mxu1 %v8902_v14 }
 0xac5   :  { %8313 = vmatprep.subr.bf16.mxu0 %v8735_v12  ;;  %8344 = vmatpush3.msra.mxu1 %v9568_v30 }
 0xac6   :  { %8345 = vmatprep.subr.mxu1 %v8902_v14 }
 0xac7   :  { %8346 = vmatpush3.msra.mxu1 %v9575_v31 }
 0xac8   :  { %8314 = vmatpush3.bf16.msra.mxu0 %v8735_v12  ;;  %8347 = vmatprep.subr.mxu1 %v8902_v14 }
 0xac9   :  { %8354 = vmatprep.subr.mxu0 %v8902_v14  ;;  %8348 = vmatpush3.msra.mxu1 %v9582_v4 }
 0xaca   :  { %8349 = vmatprep.subr.mxu1 %v8902_v14 }
 0xacb   :  { %8316 = vmatmul.mubr.bf16.vlgmr.msra.gmra.mxu0 %v9664_v3  ;;  %8350 = vmatpush3.msra.mxu1 %v9589_v8 }
 0xacc   :  { %8355 = vmatpush3.msra.mxu0 %v9488_v18  ;;  %8386 = vmatprep.mubr.msk.f32.mxu0 %vm8904_vm1, %v8902_v14 }
 0xacd   :  { %8356 = vmatprep.subr.mxu0 %v8902_v14  ;;  %8389 = vmatprep.subr.mxu1 %v8902_v14 }
 0xace   :  { %8357 = vmatpush3.msra.mxu0 %v9494_v19 }
 0xacf   :  { %8358 = vmatprep.subr.mxu0 %v8902_v14 }
 0xad0   :  { %8359 = vmatpush3.msra.mxu0 %v9501_v20 }
 0xad1   :  { %8360 = vmatprep.subr.mxu0 %v8902_v14 }
 0xad2   :  { %8361 = vmatpush3.msra.mxu0 %v9508_v21 }
 0xad3   :  { %8362 = vmatprep.subr.mxu0 %v8902_v14 }
 0xad4   :  { %8363 = vmatpush3.msra.mxu0 %v9512_v22 }
 0xad5   :  { %8364 = vmatprep.subr.mxu0 %v8902_v14 }
 0xad6   :  { %8365 = vmatpush3.msra.mxu0 %v9519_v23 }
 0xad7   :  { %8366 = vmatprep.subr.mxu0 %v8902_v14 }
 0xad8   :  { %8367 = vmatpush3.msra.mxu0 %v9526_v24 }
 0xad9   :  { %8368 = vmatprep.subr.mxu0 %v8902_v14 }
 0xada   :  { %8369 = vmatpush3.msra.mxu0 %v9533_v25 }
 0xadb   :  { %8370 = vmatprep.subr.mxu0 %v8902_v14 }
 0xadc   :  { %8371 = vmatpush3.msra.mxu0 %v9540_v26 }
 0xadd   :  { %8372 = vmatprep.subr.mxu0 %v8902_v14 }
 0xade   :  { %8373 = vmatpush3.msra.mxu0 %v9547_v27 }
 0xadf   :  { %8374 = vmatprep.subr.mxu0 %v8902_v14 }
 0xae0   :  { %8375 = vmatpush3.msra.mxu0 %v9554_v28 }
 0xae1   :  { %8376 = vmatprep.subr.mxu0 %v8902_v14 }
 0xae2   :  { %8377 = vmatpush3.msra.mxu0 %v9561_v29 }
 0xae3   :  { %8378 = vmatprep.subr.mxu0 %v8902_v14 }
 0xae4   :  { %8379 = vmatpush3.msra.mxu0 %v9568_v30 }
 0xae5   :  { %8380 = vmatprep.subr.mxu0 %v8902_v14 }
 0xae6   :  { %8381 = vmatpush3.msra.mxu0 %v9575_v31 }
 0xae7   :  { %8382 = vmatprep.subr.mxu0 %v8902_v14 }
 0xae8   :  { %8383 = vmatpush3.msra.mxu0 %v9582_v4 }
 0xae9   :  { %8384 = vmatprep.subr.mxu0 %v8902_v14 }
 0xaea   :  { %8385 = vmatpush3.msra.mxu0 %v9589_v8 }
 0xaeb   :  { %7457 = vmatprep.subr.bf16.mxu0 %v8738_v56 }
 0xb6b   :  { %v8297_v18 = vpop.f32.mrf.mxu1  ;;  %v8277_v22 = vpop.f32.mrf.mxu0 }
 0xb6d   :  { %v3169_v19 = vpop.f32.mrf.mxu1  ;;  %v3052_v23 = vpop.f32.mrf.mxu0 }
 0xb6f   :  { %v8298_v20 = vpop.f32.mrf.mxu1  ;;  %v8278_v24 = vpop.f32.mrf.mxu0 }
 0xb70   :  { %v9753_v59 = vadd.f32 %v8297_v18, %v8278_v24 }
 0xb71   :  { %v3172_v21 = vpop.f32.mrf.mxu1  ;;  %v3055_v25 = vpop.f32.mrf.mxu0 }
 0xb72   :  { %v9747_v29 = vadd.f32 %v3169_v19, %v3055_v25  ;;  %v3322_v34 = vmul.f32 %v9753_v59, %v9753_v59  ;;  %v8736_v25 = vld [vmem:[%s8976_s25 + $0xf8] sm:$0xff]  }
 0xb74   :  { %v3320_v60 = vmul.f32 %v9747_v29, %v9747_v29 }
 0xb8b   :  { %v8317_v26 = vpop.f32.mrf.mxu0 }
 0xb8c   :  { %v3496_v26 = vld [vmem:[%s6516_s13] sm:$0x1] }
 0xb8d   :  { %v3281_v27 = vpop.f32.mrf.mxu0 }
 0xb8f   :  { %v8318_v28 = vpop.f32.mrf.mxu0 }
 0xb90   :  { %v9749_v31 = vadd.f32 %v8318_v28, %v8277_v22  ;;  %v3492_v22 = vld [vmem:[%s6515_s15] sm:$0x1]  ;;  %v8737_v28 = vld [vmem:[%s8976_s25 + $0xb8] sm:$0xff]  }
 0xb91   :  { %v3283_v30 = vpop.f32.mrf.mxu0 }
 0xb92   :  { %v9751_v4 = vadd.f32 %v3283_v30, %v3052_v23  ;;  %v3321_v46 = vmul.f32 %v9749_v31, %v9749_v31 }
 0xb94   :  { %v3310_v8 = vadd.f32 %v9751_v4, %v9747_v29  ;;  %v3319_v57 = vmul.f32 %v9751_v4, %v9751_v4 }
 0xb96   :  { %v3311_v15 = vadd.f32 %v3310_v8, %v9749_v31  ;;  %v3323_v32 = vadd.f32 %v3320_v60, %v3319_v57  ;;  %v8740_v8 = vld [vmem:[%s8976_s25 + $0xf0] sm:$0xff]   ;;  %v8745_v60 = vld [vmem:[%s8976_s25 + $0xa8] sm:$0xff]  }
 0xb97   :  { %v8741_v57 = vld [vmem:[%s8976_s25 + $0xb0] sm:$0xff]  }
 0xb98   :  { %v3312_v33 = vadd.f32 %v3311_v15, %v9753_v59  ;;  %v3324_v35 = vadd.f32 %v3323_v32, %v3321_v46  ;;  %v8748_v15 = vld [vmem:[%s8976_s25 + $0xe0] sm:$0xff]   ;;  %v8752_v32 = vld [vmem:[%s8976_s25 + $0xd8] sm:$0xff]  }
 0xb99   :  { %v8749_v46 = vld [vmem:[%s8976_s25 + $0xa0] sm:$0xff]  }
 0xb9a   :  { %v3313_v36 = vrot.slane %v3312_v33, 4  ;;  %v3325_v37 = vadd.f32 %v3324_v35, %v3322_v34  ;;  %v8756_v34 = vld [vmem:[%s8976_s25 + $0xd0] sm:$0xff]  }
 0xb9b   :  { %v8757_v35 = vld [vmem:[%s8976_s25 + $0x90] sm:$0xff]  }
 0xb9c   :  { %v3314_v39 = vadd.f32 %v3313_v36, %v3312_v33  ;;  %v3326_v42 = vrot.slane %v3325_v37, 4  ;;  %v8753_v33 = vld [vmem:[%s8976_s25 + $0x98] sm:$0xff]   ;;  %v8758_v36 = vld [vmem:[%s8976_s25 + $0x50] sm:$0xff]  }
 0xb9e   :  { %v3315_v43 = vrot.slane %v3314_v39, 2  ;;  %v3327_v44 = vadd.f32 %v3326_v42, %v3325_v37  ;;  %v8759_v37 = vld [vmem:[%s8976_s25 + $0x10] sm:$0xff]   ;;  %v8761_v42 = vld [vmem:[%s8976_s25 + $0x88] sm:$0xff]  }
 0xba0   :  { %v3316_v48 = vadd.f32 %v3315_v43, %v3314_v39  ;;  %v3328_v49 = vrot.slane %v3327_v44, 2  ;;  %v8760_v39 = vld [vmem:[%s8976_s25 + $0xc8] sm:$0xff]  }
 0xba1   :  { %v8762_v43 = vld [vmem:[%s8976_s25 + $0x48] sm:$0xff]  }
 0xba2   :  { %v3317_v50 = vrot.slane %v3316_v48, 1  ;;  %v3329_v51 = vadd.f32 %v3328_v49, %v3327_v44  ;;  %v8763_v44 = vld [vmem:[%s8976_s25 + $0x8] sm:$0xff]   ;;  %v8765_v49 = vld [vmem:[%s8976_s25 + $0x80] sm:$0xff]  }
 0xba4   :  { %v3318_v52 = vadd.f32 %v3317_v50, %v3316_v48  ;;  %v3330_v53 = vrot.slane %v3329_v51, 1  ;;  %v8764_v48 = vld [vmem:[%s8976_s25 + $0xc0] sm:$0xff]  }
 0xba5   :  { %v8766_v50 = vld [vmem:[%s8976_s25 + $0x40] sm:$0xff]  }
 0xba6   :  { %8352 = vmatmul.mubr.f32.vlgmr.msra.gmra.mxu1 %v3318_v52  ;;  %v3331_v54 = vadd.f32 %v3330_v53, %v3329_v51  ;;  %v8767_v51 = vld [vmem:[%s8976_s25] sm:$0xff]   ;;  %v8768_v52 = vld [vmem:[%s8976_s25 + $0x178] sm:$0xff]  }
 0xba7   :  { %8390 = vmatpush3.msra.mxu1 %v9623_v47  ;;  %8391 = vmatprep.mubr.msk.f32.mxu1 %vm8904_vm1, %v8902_v14 }
 0xba8   :  { %8387 = vmatmul.mubr.f32.vlgmr.msra.gmra.mxu0 %v3331_v54  ;;  %8394 = vmatprep.subr.mxu1 %v8902_v14 }
 0xba9   :  { %4010 = vmatprep.mubr.bf16.mxu0 %v9662_v2  ;;  %7458 = vmatpush3.bf16.msra.mxu0 %v8739_v61 }
 0xbaa   :  { %7459 = vmatprep.subr.bf16.mxu0 %v8742_v5 }
 0xbad   :  { %7460 = vmatpush3.bf16.msra.mxu0 %v8743_v7 }
 0xbae   :  { %7461 = vmatprep.subr.bf16.mxu0 %v8746_v6 }
 0xbb1   :  { %7462 = vmatpush3.bf16.msra.mxu0 %v8747_v38 }
 0xbb2   :  { %7463 = vmatprep.subr.bf16.mxu0 %v8750_v1 }
 0xbb5   :  { %7464 = vmatpush3.bf16.msra.mxu0 %v8751_v11 }
 0xbb6   :  { %7465 = vmatprep.subr.bf16.mxu0 %v8754_v45 }
 0xbb9   :  { %7466 = vmatpush3.bf16.msra.mxu0 %v8755_v40 }
 0xbba   :  { %7467 = vmatprep.subr.bf16.mxu0 %v8758_v36  ;;  %v9915_v36 = vld [vmem:[%s9137_s2 + $0x28] sm:$0xff] }
 0xbbd   :  { %7468 = vmatpush3.bf16.msra.mxu0 %v8759_v37  ;;  %v9922_v37 = vld [vmem:[%s9137_s2 + $0x20] sm:$0xff] }
 0xbbe   :  { %7469 = vmatprep.subr.bf16.mxu0 %v8762_v43  ;;  %v9943_v43 = vld [vmem:[%s9137_s2 + $0x8] sm:$0xff] }
 0xbc1   :  { %7470 = vmatpush3.bf16.msra.mxu0 %v8763_v44  ;;  %v9950_v44 = vld [vmem:[%s9137_s2] sm:$0xff] }
 0xbc2   :  { %7471 = vmatprep.subr.bf16.mxu0 %v8766_v50 }
 0xbc5   :  { %7472 = vmatpush3.bf16.msra.mxu0 %v8767_v51 }
 0xbc6   :  { %8399 = vmatprep.subr.mxu0 %v8902_v14 }
 0xc66   :  { %v3414_v16 = vpop.f32.mrf.mxu1 }
 0xc67   :  { %v3418_v17 = vmul.f32 0.001953125, %v3414_v16 }
 0xc68   :  { %v8353_v9 = vpop.f32.mrf.mxu1  ;;  %v3485_v10 = vpop.f32.mrf.mxu0 }
 0xc69   :  { %v3490_v12 = vmul.f32 %v3418_v17, %v3418_v17  ;;  %v3489_v18 = vmul.f32 0.001953125, %v3485_v10  ;;  %v8769_v9 = vld [vmem:[%s8976_s25 + $0x138] sm:$0xff]  }
 0xc6a   :  { %v8388_v19 = vpop.f32.mrf.mxu0 }
 0xc6b   :  { %v3491_v20 = vsub.f32 %v3489_v18, %v3490_v12  ;;  %v8770_v12 = vld [vmem:[%s8976_s25 + $0x170] sm:$0xff]  }
 0xc6c   :  { %v8771_v18 = vld [vmem:[%s8976_s25 + $0x130] sm:$0xff]  }
 0xc6d   :  { %v3493_v21 = vadd.f32 1e-05, %v3491_v20  ;;  %v8773_v20 = vld [vmem:[%s8976_s25 + $0x128] sm:$0xff]  }
 0xc6f   :  { %8888 = vrsqrt.f32 %v3493_v21 }
 0xc7c   :  { %v8889_v23 = vpop.eup %8888 }
 0xc7d   :  { %v3495_v24 = vmul.f32 %v8889_v23, %v3492_v22  ;;  %v8774_v22 = vld [vmem:[%s8976_s25 + $0x160] sm:$0xff]  }
 0xc7e   :  { %v8775_v23 = vld [vmem:[%s8976_s25 + $0x120] sm:$0xff]  }
 0xc7f   :  { %8392 = vmatmul.mubr.msk.f32.vlgmr.msra.gmra.mxu1 %vm1293_vm6, %v3495_v24  ;;  %v3497_v27 = vmul.f32 %v3495_v24, %v3418_v17  ;;  %v8776_v24 = vld [vmem:[%s8976_s25 + $0x158] sm:$0xff]  }
 0xc80   :  { %8395 = vmatpush3.msra.mxu1 %v9623_v47  ;;  %8396 = vmatprep.mubr.msk.f32.mxu1 %vm8904_vm1, %v8902_v14  ;;  %v8744_v47 = vld [vmem:[%s8976_s25 + $0xe8] sm:$0xff]  }
 0xc81   :  { %v3498_v30 = vsub.f32 %v3496_v26, %v3497_v27  ;;  %7429 = vmatprep.subr.bf16.mxu1 %v8736_v25  ;;  %v8777_v25 = vld [vmem:[%s8976_s25 + $0x118] sm:$0xff]   ;;  %v8778_v26 = vld [vmem:[%s8976_s25 + $0x150] sm:$0xff]  }
 0xc82   :  { %v8779_v27 = vld [vmem:[%s8976_s25 + $0x110] sm:$0xff]  }
 0xc83   :  { %8397 = vmatmul.mubr.msk.f32.vlgmr.msra.gmra.mxu1 %vm1293_vm6, %v3498_v30  ;;  %v8781_v30 = vld [vmem:[%s8976_s25 + $0x108] sm:$0xff]  }
 0xc84   :  { %3829 = vmatprep.mubr.bf16.mxu1 %v9662_v2  ;;  %7430 = vmatpush3.bf16.msra.mxu1 %v8737_v28  ;;  %v8780_v28 = vld [vmem:[%s8976_s25 + $0x148] sm:$0xff]  }
 0xc85   :  { %7431 = vmatprep.subr.bf16.mxu1 %v8740_v8  ;;  %v8783_v8 = vld [vmem:[%s8976_s25 + $0x100] sm:$0xff]  }
 0xc88   :  { %7432 = vmatpush3.bf16.msra.mxu1 %v8741_v57  ;;  %v9849_v57 = vld [vmem:[%s9137_s2 + $0x78] sm:$0xff] }
 0xc89   :  { %7433 = vmatprep.subr.bf16.mxu1 %v8744_v47  ;;  %v9855_v47 = vld [vmem:[%s9137_s2 + $0x70] sm:$0xff] }
 0xc8c   :  { %7434 = vmatpush3.bf16.msra.mxu1 %v8745_v60  ;;  %v9869_v60 = vld [vmem:[%s9137_s2 + $0x60] sm:$0xff] }
 0xc8d   :  { %7435 = vmatprep.subr.bf16.mxu1 %v8748_v15  ;;  %v9876_v15 = vld [vmem:[%s9137_s2 + $0x58] sm:$0xff] }
 0xc90   :  { %7436 = vmatpush3.bf16.msra.mxu1 %v8749_v46  ;;  %v9883_v46 = vld [vmem:[%s9137_s2 + $0x50] sm:$0xff] }
 0xc91   :  { %7437 = vmatprep.subr.bf16.mxu1 %v8752_v32  ;;  %v9887_v32 = vld [vmem:[%s9137_s2 + $0x48] sm:$0xff] }
 0xc94   :  { %7438 = vmatpush3.bf16.msra.mxu1 %v8753_v33  ;;  %v9894_v33 = vld [vmem:[%s9137_s2 + $0x40] sm:$0xff] }
 0xc95   :  { %7439 = vmatprep.subr.bf16.mxu1 %v8756_v34  ;;  %v9901_v34 = vld [vmem:[%s9137_s2 + $0x38] sm:$0xff] }
 0xc98   :  { %7440 = vmatpush3.bf16.msra.mxu1 %v8757_v35  ;;  %v9908_v35 = vld [vmem:[%s9137_s2 + $0x30] sm:$0xff] }
 0xc99   :  { %7441 = vmatprep.subr.bf16.mxu1 %v8760_v39  ;;  %v9929_v39 = vld [vmem:[%s9137_s2 + $0x18] sm:$0xff] }
 0xc9c   :  { %7442 = vmatpush3.bf16.msra.mxu1 %v8761_v42  ;;  %v9936_v42 = vld [vmem:[%s9137_s2 + $0x10] sm:$0xff] }
 0xc9d   :  { %7443 = vmatprep.subr.bf16.mxu1 %v8764_v48 }
 0xca0   :  { %7444 = vmatpush3.bf16.msra.mxu1 %v8765_v49 }
 0xca1   :  { %7485 = vmatprep.subr.bf16.mxu1 %v8768_v52 }
 0xd3f   :  { %v3569_v53 = vpop.f32.mrf.mxu1 }
 0xd40   :  { %v3649_v54 = vrot.slane %v3569_v53, %v9102_v55 }
 0xd41   :  { %v8393_v56 = vpop.f32.mrf.mxu1 }
 0xd42   :  { %v3650_v5 = vmul.f32 %v3649_v54, %v9751_v4  ;;  %v3651_v7 = vmul.f32 %v3649_v54, %v9747_v29  ;;  %v3652_v16 = vmul.f32 %v3649_v54, %v9749_v31  ;;  %v3653_v17 = vmul.f32 %v3649_v54, %v9753_v59  ;;  %v8772_v31 = vld [vmem:[%s8976_s25 + $0x168] sm:$0xff]  }
 0xd43   :  { %v3642_v61 = vpop.f32.mrf.mxu1 }
 0xd44   :  { %v3657_v6 = vrot.slane %v3642_v61, %v9102_v55 }
 0xd45   :  { %v8398_v38 = vpop.f32.mrf.mxu1 }
 0xd46   :  { %v3658_v1 = vadd.f32 %v3657_v6, %v3650_v5  ;;  %v3659_v11 = vadd.f32 %v3657_v6, %v3651_v7  ;;  %v3660_v4 = vadd.f32 %v3657_v6, %v3652_v16  ;;  %v3661_v29 = vadd.f32 %v3657_v6, %v3653_v17 }
 0xd48   :  { %v3662_v45 = vmax.f32 %v3658_v1, 0.0  ;;  %v3663_v40 = vmax.f32 %v3659_v11, 0.0  ;;  %v3664_v59 = vmax.f32 %v3660_v4, 0.0  ;;  %v3665_v19 = vmax.f32 %v3661_v29, 0.0 }
 0xd4a   :  { %v3666_v10 = vpack.c.bf16 %v3663_v40, %v3662_v45  ;;  %v3667_v21 = vpack.c.bf16 %v3665_v19, %v3664_v59 }
 0xd4c   :  { %3830 = vmatmul.mubr.bf16.vlgmr.msra.gmra.mxu1 %v3666_v10  ;;  %4011 = vmatmul.mubr.bf16.vlgmr.msra.gmra.mxu0 %v3666_v10 }
 0xd4d   :  { %7486 = vmatpush3.bf16.msra.mxu1 %v8769_v9  ;;  %3837 = vmatprep.mubr.bf16.mxu1 %v9664_v3 }
 0xd4e   :  { %4018 = vmatprep.mubr.bf16.mxu0 %v9664_v3  ;;  %7487 = vmatprep.subr.bf16.mxu1 %v8770_v12 }
 0xd4f   :  { %8400 = vmatpush3.msra.mxu0 %v9849_v57 }
 0xd50   :  { %8401 = vmatprep.subr.mxu0 %v8902_v14 }
 0xd51   :  { %7488 = vmatpush3.bf16.msra.mxu1 %v8771_v18  ;;  %8402 = vmatpush3.msra.mxu0 %v9855_v47 }
 0xd52   :  { %7489 = vmatprep.subr.bf16.mxu1 %v8772_v31  ;;  %8403 = vmatprep.subr.mxu0 %v8902_v14 }
 0xd54   :  { %3838 = vmatmul.mubr.bf16.gmra.mxu1 %v3667_v21  ;;  %4019 = vmatmul.mubr.bf16.gmra.mxu0 %v3667_v21 }
 0xd55   :  { %7490 = vmatpush3.bf16.msra.mxu1 %v8773_v20  ;;  %4188 = vmatprep.mubr.bf16.mxu1 %v9662_v2  ;;  %v8782_v2 = vld [vmem:[%s8976_s25 + $0x140] sm:$0xff]   ;;  %s8920_s25 = smov 17  }
 0xd56   :  { %7491 = vmatprep.subr.bf16.mxu1 %v8774_v22  ;;  %8431 = vmatprep.mubr.msk.f32.mxu0 %vm8904_vm1, %v8902_v14  ;;  %s6518_s20 = sld [smem:[%s10337_s0 + %s8920_s25]]  }
 0xd59   :  { %7492 = vmatpush3.bf16.msra.mxu1 %v8775_v23 }
 0xd5a   :  { %7493 = vmatprep.subr.bf16.mxu1 %v8776_v24 }
 0xd5d   :  { %7494 = vmatpush3.bf16.msra.mxu1 %v8777_v25 }
 0xd5e   :  { %7495 = vmatprep.subr.bf16.mxu1 %v8778_v26 }
 0xd61   :  { %7496 = vmatpush3.bf16.msra.mxu1 %v8779_v27 }
 0xd62   :  { %7497 = vmatprep.subr.bf16.mxu1 %v8780_v28 }
 0xd65   :  { %7498 = vmatpush3.bf16.msra.mxu1 %v8781_v30 }
 0xd66   :  { %7499 = vmatprep.subr.bf16.mxu1 %v8782_v2 }
 0xd69   :  { %7500 = vmatpush3.bf16.msra.mxu1 %v8783_v8 }
 0xd6a   :  { %8434 = vmatprep.subr.mxu1 %v8902_v14 }
 0xd6c   :  { %4189 = vmatmul.mubr.bf16.vlgmr.msra.gmra.mxu1 %v3666_v10 }
 0xd6d   :  { %4196 = vmatprep.mubr.bf16.mxu1 %v9664_v3  ;;  %8435 = vmatpush3.msra.mxu1 %v9849_v57  ;;  %v9862_v3 = vld [vmem:[%s9137_s2 + $0x68] sm:$0xff] }
 0xd6e   :  { %8436 = vmatprep.subr.mxu1 %v8902_v14  ;;  %8404 = vmatpush3.msra.mxu0 %v9862_v3 }
 0xd6f   :  { %8437 = vmatpush3.msra.mxu1 %v9855_v47  ;;  %8405 = vmatprep.subr.mxu0 %v8902_v14 }
 0xd70   :  { %8438 = vmatprep.subr.mxu1 %v8902_v14  ;;  %8406 = vmatpush3.msra.mxu0 %v9869_v60 }
 0xd71   :  { %8439 = vmatpush3.msra.mxu1 %v9862_v3  ;;  %8407 = vmatprep.subr.mxu0 %v8902_v14 }
 0xd72   :  { %8440 = vmatprep.subr.mxu1 %v8902_v14  ;;  %8408 = vmatpush3.msra.mxu0 %v9876_v15 }
 0xd73   :  { %8441 = vmatpush3.msra.mxu1 %v9869_v60  ;;  %8409 = vmatprep.subr.mxu0 %v8902_v14 }
 0xd74   :  { %4197 = vmatmul.mubr.bf16.gmra.mxu1 %v3667_v21  ;;  %8442 = vmatprep.subr.mxu1 %v8902_v14 }
 0xd75   :  { %8466 = vmatprep.mubr.msk.f32.mxu1 %vm8904_vm1, %v8902_v14  ;;  %8443 = vmatpush3.msra.mxu1 %v9876_v15 }
 0xd76   :  { %8444 = vmatprep.subr.mxu1 %v8902_v14  ;;  %8410 = vmatpush3.msra.mxu0 %v9883_v46 }
 0xd77   :  { %8445 = vmatpush3.msra.mxu1 %v9883_v46  ;;  %8411 = vmatprep.subr.mxu0 %v8902_v14 }
 0xd78   :  { %8446 = vmatprep.subr.mxu1 %v8902_v14  ;;  %8412 = vmatpush3.msra.mxu0 %v9887_v32 }
 0xd79   :  { %8447 = vmatpush3.msra.mxu1 %v9887_v32  ;;  %8413 = vmatprep.subr.mxu0 %v8902_v14 }
 0xd7a   :  { %8448 = vmatprep.subr.mxu1 %v8902_v14  ;;  %8414 = vmatpush3.msra.mxu0 %v9894_v33 }
 0xd7b   :  { %8449 = vmatpush3.msra.mxu1 %v9894_v33  ;;  %8415 = vmatprep.subr.mxu0 %v8902_v14 }
 0xd7c   :  { %8450 = vmatprep.subr.mxu1 %v8902_v14  ;;  %8416 = vmatpush3.msra.mxu0 %v9901_v34 }
 0xd7d   :  { %8451 = vmatpush3.msra.mxu1 %v9901_v34  ;;  %8417 = vmatprep.subr.mxu0 %v8902_v14 }
 0xd7e   :  { %8452 = vmatprep.subr.mxu1 %v8902_v14  ;;  %8418 = vmatpush3.msra.mxu0 %v9908_v35 }
 0xd7f   :  { %8453 = vmatpush3.msra.mxu1 %v9908_v35  ;;  %8419 = vmatprep.subr.mxu0 %v8902_v14 }
 0xd80   :  { %8454 = vmatprep.subr.mxu1 %v8902_v14  ;;  %8420 = vmatpush3.msra.mxu0 %v9915_v36 }
 0xd81   :  { %8455 = vmatpush3.msra.mxu1 %v9915_v36  ;;  %8421 = vmatprep.subr.mxu0 %v8902_v14 }
 0xd82   :  { %8456 = vmatprep.subr.mxu1 %v8902_v14  ;;  %8422 = vmatpush3.msra.mxu0 %v9922_v37 }
 0xd83   :  { %8457 = vmatpush3.msra.mxu1 %v9922_v37  ;;  %8423 = vmatprep.subr.mxu0 %v8902_v14 }
 0xd84   :  { %8458 = vmatprep.subr.mxu1 %v8902_v14  ;;  %8424 = vmatpush3.msra.mxu0 %v9929_v39 }
 0xd85   :  { %8459 = vmatpush3.msra.mxu1 %v9929_v39  ;;  %8425 = vmatprep.subr.mxu0 %v8902_v14 }
 0xd86   :  { %8460 = vmatprep.subr.mxu1 %v8902_v14  ;;  %8426 = vmatpush3.msra.mxu0 %v9936_v42 }
 0xd87   :  { %8461 = vmatpush3.msra.mxu1 %v9936_v42  ;;  %8427 = vmatprep.subr.mxu0 %v8902_v14 }
 0xd88   :  { %8462 = vmatprep.subr.mxu1 %v8902_v14  ;;  %8428 = vmatpush3.msra.mxu0 %v9943_v43 }
 0xd89   :  { %8463 = vmatpush3.msra.mxu1 %v9943_v43  ;;  %8429 = vmatprep.subr.mxu0 %v8902_v14 }
 0xd8a   :  { %8464 = vmatprep.subr.mxu1 %v8902_v14  ;;  %8430 = vmatpush3.msra.mxu0 %v9950_v44 }
 0xd8b   :  { %8465 = vmatpush3.msra.mxu1 %v9950_v44  ;;  %8469 = vmatprep.subr.mxu0 %v8902_v14 }
 0xe0c   :  { %v7445_v48 = vpop.f32.mrf.mxu1  ;;  %v7473_v49 = vpop.f32.mrf.mxu0 }
 0xe0e   :  { %v7446_v50 = vpop.f32.mrf.mxu1  ;;  %v7474_v51 = vpop.f32.mrf.mxu0 }
 0xe0f   :  { %v7447_v52 = vadd.f32 %v7446_v50, %v7445_v48  ;;  %v7475_v16 = vadd.f32 %v7474_v51, %v7473_v49 }
 0xe10   :  { %v7448_v53 = vpop.f32.mrf.mxu1  ;;  %v7476_v54 = vpop.f32.mrf.mxu0 }
 0xe11   :  { %3846 = vst [vmem:[#allocation3] sm:$0xff] %v7447_v52 }
 0xe12   :  { %v7449_v56 = vpop.f32.mrf.mxu1  ;;  %v7477_v61 = vpop.f32.mrf.mxu0 }
 0xe13   :  { %v7450_v5 = vadd.f32 %v7449_v56, %v7448_v53  ;;  %v7478_v17 = vadd.f32 %v7477_v61, %v7476_v54 }
 0xe14   :  { %v7451_v7 = vpop.f32.mrf.mxu1  ;;  %v7479_v6 = vpop.f32.mrf.mxu0 }
 0xe15   :  { %3847 = vst [vmem:[#allocation3 + $0x8] sm:$0xff] %v7450_v5 }
 0xe16   :  { %v7452_v38 = vpop.f32.mrf.mxu1  ;;  %v7480_v11 = vpop.f32.mrf.mxu0 }
 0xe17   :  { %v7453_v1 = vadd.f32 %v7452_v38, %v7451_v7  ;;  %v7481_v59 = vadd.f32 %v7480_v11, %v7479_v6 }
 0xe18   :  { %v7454_v45 = vpop.f32.mrf.mxu1  ;;  %v7482_v12 = vpop.f32.mrf.mxu0 }
 0xe19   :  { %3848 = vst [vmem:[#allocation3 + $0x10] sm:$0xff] %v7453_v1 }
 0xe1a   :  { %v7455_v40 = vpop.f32.mrf.mxu1  ;;  %v7483_v31 = vpop.f32.mrf.mxu0 }
 0xe1b   :  { %v7456_v9 = vadd.f32 %v7455_v40, %v7454_v45  ;;  %v7484_v19 = vadd.f32 %v7483_v31, %v7482_v12 }
 0xe1c   :  { %v4206_v10 = vld [vmem:[#allocation3 + $0xc] sm:$0xf]  ;;  %v4205_v4 = vld [vmem:[#allocation3 + $0x4] sm:$0xff] }
 0xe1d   :  { %v4208_v29 = vadd.f32 %v7478_v17, %v4206_v10  ;;  %3849 = vst [vmem:[#allocation3 + $0x18] sm:$0xff] %v7456_v9  ;;  %v4207_v18 = vadd.f32 %v7475_v16, %v4205_v4 }
 0xe1f   :  { %4210 = vst [vmem:[#allocation3 + $0xc] sm:$0xf] %v4208_v29  ;;  %4209 = vst [vmem:[#allocation3 + $0x4] sm:$0xff] %v4207_v18 }
 0xe24   :  { %v4225_v20 = vld [vmem:[#allocation3 + $0x1c] sm:$0xf]  ;;  %v4224_v21 = vld [vmem:[#allocation3 + $0x14] sm:$0xff] }
 0xe25   :  { %v4227_v22 = vadd.f32 %v7484_v19, %v4225_v20  ;;  %v4226_v23 = vadd.f32 %v7481_v59, %v4224_v21 }
 0xe26   :  { %v4212_v48 = vld [vmem:[#allocation3 + $0x8] sm:$0xf]  ;;  %v4211_v6 = vld [vmem:[#allocation3] sm:$0xff] }
 0xe27   :  { %4229 = vst [vmem:[#allocation3 + $0x1c] sm:$0xf] %v4227_v22  ;;  %4228 = vst [vmem:[#allocation3 + $0x14] sm:$0xff] %v4226_v23 }
 0xe2c   :  { %v7501_v24 = vpop.f32.mrf.mxu1 }
 0xe2e   :  { %v7502_v25 = vpop.f32.mrf.mxu1  ;;  %v4231_v38 = vld [vmem:[#allocation3 + $0x18] sm:$0xf]  ;;  %v4230_v40 = vld [vmem:[#allocation3 + $0x10] sm:$0xff] }
 0xe2f   :  { %v7503_v8 = vadd.f32 %v7502_v25, %v7501_v24 }
 0xe30   :  { %v7504_v26 = vpop.f32.mrf.mxu1 }
 0xe31   :  { %v4215_v53 = vrot.slane %v7503_v8, 4 }
 0xe32   :  { %v7505_v27 = vpop.f32.mrf.mxu1 }
 0xe33   :  { %v7506_v28 = vadd.f32 %v7505_v27, %v7504_v26 }
 0xe34   :  { %v7507_v30 = vpop.f32.mrf.mxu1 }
 0xe35   :  { %v4216_v2 = vrot.slane %v7506_v28, 4 }
 0xe36   :  { %v7508_v49 = vpop.f32.mrf.mxu1 }
 0xe37   :  { %v4221_v50 = vadd.f32 %v4216_v2, %v4212_v48  ;;  %v7509_v52 = vadd.f32 %v7508_v49, %v7507_v30  ;;  %v4217_v61 = vsel %vm637_vm4, %v4215_v53, %v4216_v2  ;;  %v8790_v53 = vld [vmem:[%s8981_s29 + $0x70] sm:$0xff]  }
 0xe38   :  { %v7510_v51 = vpop.f32.mrf.mxu1  ;;  %v9960_v1 = vadd.f32 %v4217_v61, %v4211_v6  ;;  %v8795_v61 = vld [vmem:[%s8981_s29 + $0x28] sm:$0xff]   ;;  %v8802_v6 = vld [vmem:[%s8981_s29 + $0x58] sm:$0xff]  }
 0xe39   :  { %4223 = vst [vmem:[#allocation3 + $0x8] sm:$0xf] %v4221_v50  ;;  %v4234_v5 = vrot.slane %v7509_v52, 4  ;;  %v9985_v50 = vld [vmem:[%s9277_s8] sm:$0xff]  ;;  %v8787_v52 = vld [vmem:[%s8981_s29 + $0x38] sm:$0xff]  }
 0xe3a   :  { %v7511_v54 = vpop.f32.mrf.mxu1  ;;  %v4256_v12 = vmul.f32 %v9960_v1, %v9960_v1 }
 0xe3b   :  { %v7512_v56 = vadd.f32 %v7511_v54, %v7510_v51  ;;  %v8786_v51 = vld [vmem:[%s8981_s29 + $0x78] sm:$0xff]   ;;  %v8791_v54 = vld [vmem:[%s8981_s29 + $0x30] sm:$0xff]  }
 0xe3c   :  { %7579 = vmatprep.subr.bf16.mxu1 %v8786_v51  ;;  %v8804_v51 = vld [vmem:[%s8981_s29 + $0xd0] sm:$0xff]  }
 0xe3d   :  { %v4235_v7 = vrot.slane %v7512_v56, 4  ;;  %v8794_v56 = vld [vmem:[%s8981_s29 + $0x68] sm:$0xff]  }
 0xe3f   :  { %v4236_v11 = vsel %vm637_vm4, %v4234_v5, %v4235_v7  ;;  %v4240_v45 = vadd.f32 %v4235_v7, %v4231_v38  ;;  %v8798_v5 = vld [vmem:[%s8981_s29 + $0x60] sm:$0xff]   ;;  %v8803_v38 = vld [vmem:[%s8981_s29 + $0x18] sm:$0xff]  }
 0xe40   :  { %v9963_v16 = vld [vmem:[#allocation3 + $0x8] sm:$0xff]  ;;  %v9965_v17 = vadd.f32 %v4236_v11, %v4230_v40  ;;  %v8799_v7 = vld [vmem:[%s8981_s29 + $0x20] sm:$0xff]  }
 0xe41   :  { %4242 = vst [vmem:[#allocation3 + $0x18] sm:$0xf] %v4240_v45  ;;  %v4257_v9 = vmul.f32 %v9963_v16, %v9963_v16  ;;  %v4247_v10 = vadd.f32 %v9963_v16, %v9960_v1 }
 0xe42   :  { %v4258_v4 = vmul.f32 %v9965_v17, %v9965_v17 }
 0xe43   :  { %v4260_v29 = vadd.f32 %v4257_v9, %v4256_v12  ;;  %v4248_v18 = vadd.f32 %v4247_v10, %v9965_v17 }
 0xe45   :  { %v4261_v20 = vadd.f32 %v4260_v29, %v4258_v4 }
 0xe48   :  { %v9976_v31 = vld [vmem:[#allocation3 + $0x18] sm:$0xff] }
 0xe49   :  { %v4249_v59 = vadd.f32 %v4248_v18, %v9976_v31  ;;  %v4259_v19 = vmul.f32 %v9976_v31, %v9976_v31 }
 0xe4b   :  { %v4250_v21 = vrot.slane %v4249_v59, 4  ;;  %v4262_v22 = vadd.f32 %v4261_v20, %v4259_v19 }
 0xe4d   :  { %v4251_v23 = vadd.f32 %v4250_v21, %v4249_v59  ;;  %v4263_v24 = vrot.slane %v4262_v22, 4  ;;  %v4429_v59 = vld [vmem:[%s6518_s20] sm:$0x1]  ;;  %v8784_v21 = vld [vmem:[%s8981_s29 + $0xf8] sm:$0xff]  }
 0xe4f   :  { %v4252_v25 = vrot.slane %v4251_v23, 2  ;;  %v4264_v26 = vadd.f32 %v4263_v24, %v4262_v22  ;;  %v4433_v22 = vld [vmem:[%s6519_s26] sm:$0x1]  ;;  %v8785_v24 = vld [vmem:[%s8981_s29 + $0xb8] sm:$0xff]  }
 0xe51   :  { %v4253_v27 = vadd.f32 %v4252_v25, %v4251_v23  ;;  %v4265_v28 = vrot.slane %v4264_v26, 2 }
 0xe53   :  { %v4254_v30 = vrot.slane %v4253_v27, 1  ;;  %v4266_v2 = vadd.f32 %v4265_v28, %v4264_v26  ;;  %v8788_v26 = vld [vmem:[%s8981_s29 + $0xf0] sm:$0xff]   ;;  %v8792_v28 = vld [vmem:[%s8981_s29 + $0xe8] sm:$0xff]  }
 0xe55   :  { %v4255_v8 = vadd.f32 %v4254_v30, %v4253_v27  ;;  %v4267_v48 = vrot.slane %v4266_v2, 1  ;;  %v8789_v27 = vld [vmem:[%s8981_s29 + $0xb0] sm:$0xff]   ;;  %v8793_v30 = vld [vmem:[%s8981_s29 + $0xa8] sm:$0xff]  }
 0xe57   :  { %8432 = vmatmul.mubr.f32.vlgmr.msra.gmra.mxu0 %v4255_v8  ;;  %v4268_v49 = vadd.f32 %v4267_v48, %v4266_v2  ;;  %v8796_v2 = vld [vmem:[%s8981_s29 + $0xe0] sm:$0xff]   ;;  %v8800_v48 = vld [vmem:[%s8981_s29 + $0xd8] sm:$0xff]  }
 0xe58   :  { %8471 = vmatprep.mubr.msk.f32.mxu0 %vm8904_vm1, %v8902_v14  ;;  %8470 = vmatpush3.msra.mxu0 %v9985_v50  ;;  %v8797_v8 = vld [vmem:[%s8981_s29 + $0xa0] sm:$0xff]  }
 0xe59   :  { %8467 = vmatmul.mubr.f32.vlgmr.msra.gmra.mxu1 %v4268_v49  ;;  %8474 = vmatprep.subr.mxu0 %v8902_v14  ;;  %v8801_v49 = vld [vmem:[%s8981_s29 + $0x98] sm:$0xff]  }
 0xe5a   :  { %4947 = vmatprep.mubr.bf16.mxu1 %v9465_v0  ;;  %7580 = vmatpush3.bf16.msra.mxu1 %v8787_v52  ;;  %v8805_v52 = vld [vmem:[%s8981_s29 + $0x90] sm:$0xff]  }
 0xe5b   :  { %7581 = vmatprep.subr.bf16.mxu1 %v8790_v53  ;;  %v8806_v53 = vld [vmem:[%s8981_s29 + $0x50] sm:$0xff]  }
 0xe5e   :  { %7582 = vmatpush3.bf16.msra.mxu1 %v8791_v54  ;;  %v8807_v54 = vld [vmem:[%s8981_s29 + $0x10] sm:$0xff]  }
 0xe5f   :  { %7583 = vmatprep.subr.bf16.mxu1 %v8794_v56  ;;  %v8808_v56 = vld [vmem:[%s8981_s29 + $0xc8] sm:$0xff]  }
 0xe62   :  { %7584 = vmatpush3.bf16.msra.mxu1 %v8795_v61  ;;  %v8809_v61 = vld [vmem:[%s8981_s29 + $0x88] sm:$0xff]  }
 0xe63   :  { %7585 = vmatprep.subr.bf16.mxu1 %v8798_v5  ;;  %v8810_v5 = vld [vmem:[%s8981_s29 + $0x48] sm:$0xff]  }
 0xe66   :  { %7586 = vmatpush3.bf16.msra.mxu1 %v8799_v7  ;;  %v8811_v7 = vld [vmem:[%s8981_s29 + $0x8] sm:$0xff]  }
 0xe67   :  { %7587 = vmatprep.subr.bf16.mxu1 %v8802_v6  ;;  %v8812_v6 = vld [vmem:[%s8981_s29 + $0xc0] sm:$0xff]  }
 0xe6a   :  { %7588 = vmatpush3.bf16.msra.mxu1 %v8803_v38  ;;  %v8813_v38 = vld [vmem:[%s8981_s29 + $0x80] sm:$0xff]  }
 0xe6b   :  { %7589 = vmatprep.subr.bf16.mxu1 %v8806_v53  ;;  %v8825_v53 = vld [vmem:[%s8981_s29 + $0x118] sm:$0xff]  }
 0xe6e   :  { %7590 = vmatpush3.bf16.msra.mxu1 %v8807_v54  ;;  %v8827_v54 = vld [vmem:[%s8981_s29 + $0x110] sm:$0xff]  }
 0xe6f   :  { %7591 = vmatprep.subr.bf16.mxu1 %v8810_v5  ;;  %v8830_v5 = vld [vmem:[%s8981_s29 + $0x140] sm:$0xff]  }
 0xe72   :  { %7592 = vmatpush3.bf16.msra.mxu1 %v8811_v7  ;;  %v8831_v7 = vld [vmem:[%s8981_s29 + $0x100] sm:$0xff]  }
 0xf17   :  { %v4351_v11 = vpop.f32.mrf.mxu0 }
 0xf18   :  { %v4355_v45 = vmul.f32 0.001953125, %v4351_v11  ;;  %v8814_v11 = vld [vmem:[%s8981_s29 + $0x40] sm:$0xff]  }
 0xf19   :  { %v8433_v40 = vpop.f32.mrf.mxu0  ;;  %v4422_v9 = vpop.f32.mrf.mxu1  ;;  %7593 = vmatprep.subr.bf16.mxu1 %v8814_v11 }
 0xf1a   :  { %v4427_v10 = vmul.f32 %v4355_v45, %v4355_v45  ;;  %v4426_v12 = vmul.f32 0.001953125, %v4422_v9  ;;  %v8816_v40 = vld [vmem:[%s8981_s29 + $0x178] sm:$0xff]  }
 0xf1b   :  { %v8468_v4 = vpop.f32.mrf.mxu1 }
 0xf1c   :  { %v4428_v29 = vsub.f32 %v4426_v12, %v4427_v10 }
 0xf1e   :  { %v4430_v18 = vadd.f32 1e-05, %v4428_v29 }
 0xf20   :  { %8890 = vrsqrt.f32 %v4430_v18 }
 0xf2d   :  { %v8891_v19 = vpop.eup %8890 }
 0xf2e   :  { %v4432_v20 = vmul.f32 %v8891_v19, %v4429_v59 }
 0xf30   :  { %8472 = vmatmul.mubr.msk.f32.vlgmr.msra.gmra.mxu0 %vm1293_vm6, %v4432_v20  ;;  %v4434_v23 = vmul.f32 %v4432_v20, %v4355_v45  ;;  %v8815_v45 = vld [vmem:[%s8981_s29] sm:$0xff]  }
 0xf31   :  { %8475 = vmatpush3.msra.mxu0 %v9985_v50  ;;  %8476 = vmatprep.mubr.msk.f32.mxu0 %vm8904_vm1, %v8902_v14 }
 0xf32   :  { %v4435_v25 = vsub.f32 %v4433_v22, %v4434_v23  ;;  %7551 = vmatprep.subr.bf16.mxu0 %v8784_v21  ;;  %7594 = vmatpush3.bf16.msra.mxu1 %v8815_v45 }
 0xf33   :  { %8479 = vmatprep.subr.mxu1 %v8902_v14 }
 0xf34   :  { %8477 = vmatmul.mubr.msk.f32.vlgmr.msra.gmra.mxu0 %vm1293_vm6, %v4435_v25 }
 0xf35   :  { %4766 = vmatprep.mubr.bf16.mxu0 %v9465_v0  ;;  %7552 = vmatpush3.bf16.msra.mxu0 %v8785_v24 }
 0xf36   :  { %7553 = vmatprep.subr.bf16.mxu0 %v8788_v26  ;;  %v8817_v26 = vld [vmem:[%s8981_s29 + $0x138] sm:$0xff]  }
 0xf39   :  { %7554 = vmatpush3.bf16.msra.mxu0 %v8789_v27 }
 0xf3a   :  { %7555 = vmatprep.subr.bf16.mxu0 %v8792_v28  ;;  %v8818_v28 = vld [vmem:[%s8981_s29 + $0x170] sm:$0xff]  }
 0xf3d   :  { %7556 = vmatpush3.bf16.msra.mxu0 %v8793_v30  ;;  %v8819_v30 = vld [vmem:[%s8981_s29 + $0x130] sm:$0xff]  }
 0xf3e   :  { %7557 = vmatprep.subr.bf16.mxu0 %v8796_v2 }
 0xf41   :  { %7558 = vmatpush3.bf16.msra.mxu0 %v8797_v8  ;;  %v8821_v8 = vld [vmem:[%s8981_s29 + $0x128] sm:$0xff]  }
 0xf42   :  { %7559 = vmatprep.subr.bf16.mxu0 %v8800_v48 }
 0xf45   :  { %7560 = vmatpush3.bf16.msra.mxu0 %v8801_v49  ;;  %v8822_v49 = vld [vmem:[%s8981_s29 + $0x160] sm:$0xff]  }
 0xf46   :  { %7561 = vmatprep.subr.bf16.mxu0 %v8804_v51  ;;  %v8823_v51 = vld [vmem:[%s8981_s29 + $0x120] sm:$0xff]  }
 0xf49   :  { %7562 = vmatpush3.bf16.msra.mxu0 %v8805_v52  ;;  %v8824_v52 = vld [vmem:[%s8981_s29 + $0x158] sm:$0xff]  }
 0xf4a   :  { %7563 = vmatprep.subr.bf16.mxu0 %v8808_v56  ;;  %v8828_v56 = vld [vmem:[%s8981_s29 + $0x148] sm:$0xff]  }
 0xf4d   :  { %7564 = vmatpush3.bf16.msra.mxu0 %v8809_v61  ;;  %v8829_v61 = vld [vmem:[%s8981_s29 + $0x108] sm:$0xff]  }
 0xf4e   :  { %7565 = vmatprep.subr.bf16.mxu0 %v8812_v6 }
 0xf51   :  { %7566 = vmatpush3.bf16.msra.mxu0 %v8813_v38 }
 0xf52   :  { %7607 = vmatprep.subr.bf16.mxu0 %v8816_v40 }
 0xff0   :  { %v4506_v9 = vpop.f32.mrf.mxu0 }
 0xff1   :  { %v4586_v10 = vrot.slane %v4506_v9, %v9102_v55 }
 0xff2   :  { %v8473_v12 = vpop.f32.mrf.mxu0 }
 0xff3   :  { %v4587_v29 = vmul.f32 %v4586_v10, %v9960_v1  ;;  %v4588_v18 = vmul.f32 %v4586_v10, %v9963_v16  ;;  %v4589_v24 = vmul.f32 %v4586_v10, %v9965_v17  ;;  %v4590_v25 = vmul.f32 %v4586_v10, %v9976_v31  ;;  %v8820_v17 = vld [vmem:[%s8981_s29 + $0x168] sm:$0xff]  }
 0xff4   :  { %v4579_v4 = vpop.f32.mrf.mxu0 }
 0xff5   :  { %v4594_v59 = vrot.slane %v4579_v4, %v9102_v55 }
 0xff6   :  { %v8478_v19 = vpop.f32.mrf.mxu0 }
 0xff7   :  { %v4595_v20 = vadd.f32 %v4594_v59, %v4587_v29  ;;  %v4596_v21 = vadd.f32 %v4594_v59, %v4588_v18  ;;  %v4597_v1 = vadd.f32 %v4594_v59, %v4589_v24  ;;  %v4598_v16 = vadd.f32 %v4594_v59, %v4590_v25 }
 0xff9   :  { %v4599_v22 = vmax.f32 %v4595_v20, 0.0  ;;  %v4600_v23 = vmax.f32 %v4596_v21, 0.0  ;;  %v4601_v31 = vmax.f32 %v4597_v1, 0.0  ;;  %v4602_v2 = vmax.f32 %v4598_v16, 0.0 }
 0xffb   :  { %v10042_v27 = vpack.c.bf16 %v4600_v23, %v4599_v22  ;;  %v10055_v48 = vpack.c.bf16 %v4602_v2, %v4601_v31 }
 0xffd   :  { %4767 = vmatmul.mubr.bf16.vlgmr.msra.gmra.mxu0 %v10042_v27  ;;  %4948 = vmatmul.mubr.bf16.vlgmr.msra.gmra.mxu1 %v10042_v27 }
 0xffe   :  { %7608 = vmatpush3.bf16.msra.mxu0 %v8817_v26  ;;  %4774 = vmatprep.mubr.bf16.mxu0 %v9467_v41 }
 0xfff   :  { %4955 = vmatprep.mubr.bf16.mxu1 %v9467_v41  ;;  %7609 = vmatprep.subr.bf16.mxu0 %v8818_v28 }
0x1000   :  { %8480 = vmatpush3.msra.mxu1 %v9849_v57 }
0x1001   :  { %8481 = vmatprep.subr.mxu1 %v8902_v14 }
0x1002   :  { %7610 = vmatpush3.bf16.msra.mxu0 %v8819_v30  ;;  %8482 = vmatpush3.msra.mxu1 %v9855_v47 }
0x1003   :  { %7611 = vmatprep.subr.bf16.mxu0 %v8820_v17  ;;  %8483 = vmatprep.subr.mxu1 %v8902_v14 }
0x1004   :  { %8484 = vmatpush3.msra.mxu1 %v9862_v3 }
0x1005   :  { %4775 = vmatmul.mubr.bf16.gmra.mxu0 %v10055_v48  ;;  %4956 = vmatmul.mubr.bf16.gmra.mxu1 %v10055_v48 }
0x1006   :  { %7612 = vmatpush3.bf16.msra.mxu0 %v8821_v8  ;;  %5125 = vmatprep.mubr.bf16.mxu0 %v9465_v0  ;;  %v8826_v0 = vld [vmem:[%s8981_s29 + $0x150] sm:$0xff]   ;;  %s8922_s29 = smov 20  }
0x1007   :  { %7613 = vmatprep.subr.bf16.mxu0 %v8822_v49  ;;  %8485 = vmatprep.subr.mxu1 %v8902_v14  ;;  %s6521_s17 = sld [smem:[%s10337_s0 + %s8922_s29]]  }
0x1008   :  { %8486 = vmatpush3.msra.mxu1 %v9869_v60  ;;  %8511 = vmatprep.mubr.msk.f32.mxu1 %vm8904_vm1, %v8902_v14 }
0x1009   :  { %8487 = vmatprep.subr.mxu1 %v8902_v14 }
0x100a   :  { %7614 = vmatpush3.bf16.msra.mxu0 %v8823_v51  ;;  %8488 = vmatpush3.msra.mxu1 %v9876_v15 }
0x100b   :  { %7615 = vmatprep.subr.bf16.mxu0 %v8824_v52  ;;  %8489 = vmatprep.subr.mxu1 %v8902_v14 }
0x100c   :  { %8490 = vmatpush3.msra.mxu1 %v9883_v46 }
0x100d   :  { %8491 = vmatprep.subr.mxu1 %v8902_v14 }
0x100e   :  { %7616 = vmatpush3.bf16.msra.mxu0 %v8825_v53  ;;  %8492 = vmatpush3.msra.mxu1 %v9887_v32 }
0x100f   :  { %7617 = vmatprep.subr.bf16.mxu0 %v8826_v0  ;;  %8493 = vmatprep.subr.mxu1 %v8902_v14 }
0x1010   :  { %8494 = vmatpush3.msra.mxu1 %v9894_v33 }
0x1011   :  { %8495 = vmatprep.subr.mxu1 %v8902_v14 }
0x1012   :  { %7618 = vmatpush3.bf16.msra.mxu0 %v8827_v54  ;;  %8496 = vmatpush3.msra.mxu1 %v9901_v34 }
0x1013   :  { %7619 = vmatprep.subr.bf16.mxu0 %v8828_v56  ;;  %8497 = vmatprep.subr.mxu1 %v8902_v14 }
0x1014   :  { %8498 = vmatpush3.msra.mxu1 %v9908_v35 }
0x1015   :  { %8499 = vmatprep.subr.mxu1 %v8902_v14 }
0x1016   :  { %7620 = vmatpush3.bf16.msra.mxu0 %v8829_v61  ;;  %8500 = vmatpush3.msra.mxu1 %v9915_v36 }
0x1017   :  { %7621 = vmatprep.subr.bf16.mxu0 %v8830_v5  ;;  %8501 = vmatprep.subr.mxu1 %v8902_v14 }
0x1018   :  { %8502 = vmatpush3.msra.mxu1 %v9922_v37 }
0x1019   :  { %8503 = vmatprep.subr.mxu1 %v8902_v14 }
0x101a   :  { %7622 = vmatpush3.bf16.msra.mxu0 %v8831_v7  ;;  %8504 = vmatpush3.msra.mxu1 %v9929_v39 }
0x101b   :  { %8514 = vmatprep.subr.mxu0 %v8902_v14  ;;  %8505 = vmatprep.subr.mxu1 %v8902_v14 }
0x101c   :  { %8506 = vmatpush3.msra.mxu1 %v9936_v42 }
0x101d   :  { %5126 = vmatmul.mubr.bf16.vlgmr.msra.gmra.mxu0 %v10042_v27  ;;  %8507 = vmatprep.subr.mxu1 %v8902_v14 }
0x101e   :  { %5133 = vmatprep.mubr.bf16.mxu0 %v9467_v41  ;;  %8515 = vmatpush3.msra.mxu0 %v9849_v57 }
0x101f   :  { %8516 = vmatprep.subr.mxu0 %v8902_v14  ;;  %8508 = vmatpush3.msra.mxu1 %v9943_v43 }
0x1020   :  { %8517 = vmatpush3.msra.mxu0 %v9855_v47  ;;  %8509 = vmatprep.subr.mxu1 %v8902_v14 }
0x1021   :  { %8518 = vmatprep.subr.mxu0 %v8902_v14  ;;  %8510 = vmatpush3.msra.mxu1 %v9950_v44 }
0x1022   :  { %8519 = vmatpush3.msra.mxu0 %v9862_v3  ;;  %8549 = vmatprep.subr.mxu1 %v8902_v14 }
0x1023   :  { %8520 = vmatprep.subr.mxu0 %v8902_v14 }
0x1024   :  { %8521 = vmatpush3.msra.mxu0 %v9869_v60 }
0x1025   :  { %5134 = vmatmul.mubr.bf16.gmra.mxu0 %v10055_v48  ;;  %8522 = vmatprep.subr.mxu0 %v8902_v14 }
0x1026   :  { %8523 = vmatpush3.msra.mxu0 %v9876_v15  ;;  %8546 = vmatprep.mubr.msk.f32.mxu0 %vm8904_vm1, %v8902_v14 }
0x1027   :  { %8524 = vmatprep.subr.mxu0 %v8902_v14 }
0x1028   :  { %8525 = vmatpush3.msra.mxu0 %v9883_v46 }
0x1029   :  { %8526 = vmatprep.subr.mxu0 %v8902_v14 }
0x102a   :  { %8527 = vmatpush3.msra.mxu0 %v9887_v32 }
0x102b   :  { %8528 = vmatprep.subr.mxu0 %v8902_v14 }
0x102c   :  { %8529 = vmatpush3.msra.mxu0 %v9894_v33 }
0x102d   :  { %8530 = vmatprep.subr.mxu0 %v8902_v14 }
0x102e   :  { %8531 = vmatpush3.msra.mxu0 %v9901_v34 }
0x102f   :  { %8532 = vmatprep.subr.mxu0 %v8902_v14 }
0x1030   :  { %8533 = vmatpush3.msra.mxu0 %v9908_v35 }
0x1031   :  { %8534 = vmatprep.subr.mxu0 %v8902_v14 }
0x1032   :  { %8535 = vmatpush3.msra.mxu0 %v9915_v36 }
0x1033   :  { %8536 = vmatprep.subr.mxu0 %v8902_v14 }
0x1034   :  { %8537 = vmatpush3.msra.mxu0 %v9922_v37 }
0x1035   :  { %8538 = vmatprep.subr.mxu0 %v8902_v14 }
0x1036   :  { %8539 = vmatpush3.msra.mxu0 %v9929_v39 }
0x1037   :  { %8540 = vmatprep.subr.mxu0 %v8902_v14 }
0x1038   :  { %8541 = vmatpush3.msra.mxu0 %v9936_v42 }
0x1039   :  { %8542 = vmatprep.subr.mxu0 %v8902_v14 }
0x103a   :  { %8543 = vmatpush3.msra.mxu0 %v9943_v43 }
0x103b   :  { %8544 = vmatprep.subr.mxu0 %v8902_v14 }
0x103c   :  { %8545 = vmatpush3.msra.mxu0 %v9950_v44 }
0x10bd   :  { %v7567_v41 = vpop.f32.mrf.mxu0  ;;  %v7595_v57 = vpop.f32.mrf.mxu1 }
0x10bf   :  { %v7568_v47 = vpop.f32.mrf.mxu0  ;;  %v7596_v3 = vpop.f32.mrf.mxu1 }
0x10c0   :  { %v7569_v60 = vadd.f32 %v7568_v47, %v7567_v41  ;;  %v7597_v6 = vadd.f32 %v7596_v3, %v7595_v57 }
0x10c1   :  { %v7570_v15 = vpop.f32.mrf.mxu0  ;;  %v7598_v46 = vpop.f32.mrf.mxu1 }
0x10c2   :  { %4783 = vst [vmem:[#allocation3] sm:$0xff] %v7569_v60 }
0x10c3   :  { %v7571_v32 = vpop.f32.mrf.mxu0  ;;  %v7599_v33 = vpop.f32.mrf.mxu1 }
0x10c4   :  { %v7572_v34 = vadd.f32 %v7571_v32, %v7570_v15  ;;  %v7600_v38 = vadd.f32 %v7599_v33, %v7598_v46 }
0x10c5   :  { %v7573_v35 = vpop.f32.mrf.mxu0  ;;  %v7601_v36 = vpop.f32.mrf.mxu1 }
0x10c6   :  { %4784 = vst [vmem:[#allocation3 + $0x8] sm:$0xff] %v7572_v34 }
0x10c7   :  { %v7574_v37 = vpop.f32.mrf.mxu0  ;;  %v7602_v42 = vpop.f32.mrf.mxu1 }
0x10c8   :  { %v7575_v39 = vadd.f32 %v7574_v37, %v7573_v35  ;;  %v7603_v29 = vadd.f32 %v7602_v42, %v7601_v36 }
0x10c9   :  { %v7576_v43 = vpop.f32.mrf.mxu0  ;;  %v7604_v40 = vpop.f32.mrf.mxu1 }
0x10ca   :  { %4785 = vst [vmem:[#allocation3 + $0x10] sm:$0xff] %v7575_v39 }
0x10cb   :  { %v7577_v44 = vpop.f32.mrf.mxu0  ;;  %v7605_v4 = vpop.f32.mrf.mxu1 }
0x10cc   :  { %v7578_v11 = vadd.f32 %v7577_v44, %v7576_v43  ;;  %v7606_v18 = vadd.f32 %v7605_v4, %v7604_v40  ;;  %v8834_v4 = vld [vmem:[%s9009_s7 + $0x78] sm:$0xff]  }
0x10cd   :  { %v5143_v45 = vld [vmem:[#allocation3 + $0xa] sm:$0x3f]  ;;  %v5142_v9 = vld [vmem:[#allocation3 + $0x2] sm:$0xff]  ;;  %7701 = vmatprep.subr.bf16.mxu0 %v8834_v4 }
0x10ce   :  { %v5145_v10 = vadd.f32 %v7600_v38, %v5143_v45  ;;  %4786 = vst [vmem:[#allocation3 + $0x18] sm:$0xff] %v7578_v11  ;;  %v5144_v12 = vadd.f32 %v7597_v6, %v5142_v9 }
0x10d0   :  { %5147 = vst [vmem:[#allocation3 + $0xa] sm:$0x3f] %v5145_v10  ;;  %5146 = vst [vmem:[#allocation3 + $0x2] sm:$0xff] %v5144_v12 }
0x10d5   :  { %v5162_v59 = vld [vmem:[#allocation3 + $0x1a] sm:$0x3f]  ;;  %v5161_v19 = vld [vmem:[#allocation3 + $0x12] sm:$0xff] }
0x10d6   :  { %v5164_v20 = vadd.f32 %v7606_v18, %v5162_v59  ;;  %v5163_v21 = vadd.f32 %v7603_v29, %v5161_v19  ;;  %v8835_v29 = vld [vmem:[%s9009_s7 + $0x38] sm:$0xff]   ;;  %v8838_v18 = vld [vmem:[%s9009_s7 + $0x70] sm:$0xff]   ;;  %v8842_v19 = vld [vmem:[%s9009_s7 + $0x68] sm:$0xff]  }
0x10d7   :  { %v5149_v30 = vld [vmem:[#allocation3 + $0x8] sm:$0x3f]  ;;  %v5148_v31 = vld [vmem:[#allocation3] sm:$0xff]  ;;  %v8839_v59 = vld [vmem:[%s9009_s7 + $0x30] sm:$0xff]  }
0x10d8   :  { %5166 = vst [vmem:[#allocation3 + $0x1a] sm:$0x3f] %v5164_v20  ;;  %5165 = vst [vmem:[#allocation3 + $0x12] sm:$0xff] %v5163_v21  ;;  %v8843_v20 = vld [vmem:[%s9009_s7 + $0x28] sm:$0xff]   ;;  %v8846_v21 = vld [vmem:[%s9009_s7 + $0x60] sm:$0xff]  }
0x10dd   :  { %v7623_v22 = vpop.f32.mrf.mxu0 }
0x10df   :  { %v7624_v23 = vpop.f32.mrf.mxu0  ;;  %v5168_v56 = vld [vmem:[#allocation3 + $0x18] sm:$0x3f]  ;;  %v5167_v61 = vld [vmem:[#allocation3 + $0x10] sm:$0xff] }
0x10e0   :  { %v7625_v25 = vadd.f32 %v7624_v23, %v7623_v22  ;;  %v8847_v22 = vld [vmem:[%s9009_s7 + $0x20] sm:$0xff]   ;;  %v8850_v23 = vld [vmem:[%s9009_s7 + $0x58] sm:$0xff]  }
0x10e1   :  { %v7626_v24 = vpop.f32.mrf.mxu0 }
0x10e2   :  { %v5152_v1 = vrot.slane %v7625_v25, 2 }
0x10e3   :  { %v7627_v26 = vpop.f32.mrf.mxu0 }
0x10e4   :  { %v7628_v27 = vadd.f32 %v7627_v26, %v7626_v24  ;;  %v8851_v24 = vld [vmem:[%s9009_s7 + $0x18] sm:$0xff]  }
0x10e5   :  { %v7629_v28 = vpop.f32.mrf.mxu0 }
0x10e6   :  { %v5153_v16 = vrot.slane %v7628_v27, 2 }
0x10e7   :  { %v7630_v17 = vpop.f32.mrf.mxu0 }
0x10e8   :  { %v5154_v2 = vsel %vm1817_vm7, %v5152_v1, %v5153_v16  ;;  %v5158_v8 = vadd.f32 %v5153_v16, %v5149_v30  ;;  %v7631_v51 = vadd.f32 %v7630_v17, %v7629_v28 }
0x10e9   :  { %v10139_v48 = vadd.f32 %v5154_v2, %v5148_v31  ;;  %v7632_v49 = vpop.f32.mrf.mxu0  ;;  %v5366_v2 = vld [vmem:[%s6521_s17] sm:$0x1] }
0x10ea   :  { %5160 = vst [vmem:[#allocation3 + $0x8] sm:$0x3f] %v5158_v8  ;;  %v5171_v0 = vrot.slane %v7631_v51, 2  ;;  %v8832_v51 = vld [vmem:[%s9009_s7 + $0xf8] sm:$0xff]  }
0x10eb   :  { %5159 = vst [vmem:[#allocation3] sm:$0xff] %v10139_v48  ;;  %v7633_v52 = vpop.f32.mrf.mxu0  ;;  %v5193_v60 = vmul.f32 %v10139_v48, %v10139_v48 }
0x10ec   :  { %v7634_v53 = vadd.f32 %v7633_v52, %v7632_v49  ;;  %v5370_v52 = vld [vmem:[%s6522_s5] sm:$0x1] }
0x10ee   :  { %v5172_v54 = vrot.slane %v7634_v53, 2 }
0x10f0   :  { %v5173_v5 = vsel %vm1817_vm7, %v5171_v0, %v5172_v54  ;;  %v5177_v7 = vadd.f32 %v5172_v54, %v5168_v56  ;;  %v8833_v0 = vld [vmem:[%s9009_s7 + $0xb8] sm:$0xff]   ;;  %v8836_v56 = vld [vmem:[%s9009_s7 + $0xf0] sm:$0xff]  }
0x10f1   :  { %v10143_v41 = vadd.f32 %v5173_v5, %v5167_v61  ;;  %v10145_v57 = vld [vmem:[#allocation3 + $0x8] sm:$0xff]  ;;  %v8837_v61 = vld [vmem:[%s9009_s7 + $0xb0] sm:$0xff]  }
0x10f2   :  { %5179 = vst [vmem:[#allocation3 + $0x18] sm:$0x3f] %v5177_v7  ;;  %v5194_v47 = vmul.f32 %v10145_v57, %v10145_v57  ;;  %v5184_v3 = vadd.f32 %v10145_v57, %v10139_v48  ;;  %v8841_v5 = vld [vmem:[%s9009_s7 + $0xa8] sm:$0xff]   ;;  %v8844_v7 = vld [vmem:[%s9009_s7 + $0xe0] sm:$0xff]  }
0x10f3   :  { %5178 = vst [vmem:[#allocation3 + $0x10] sm:$0xff] %v10143_v41  ;;  %v5195_v15 = vmul.f32 %v10143_v41, %v10143_v41 }
0x10f4   :  { %v5197_v46 = vadd.f32 %v5194_v47, %v5193_v60  ;;  %v5185_v32 = vadd.f32 %v5184_v3, %v10143_v41  ;;  %v8845_v47 = vld [vmem:[%s9009_s7 + $0xa0] sm:$0xff]   ;;  %v8848_v3 = vld [vmem:[%s9009_s7 + $0xd8] sm:$0xff]  }
0x10f5   :  { %v8849_v60 = vld [vmem:[%s9009_s7 + $0x98] sm:$0xff]  }
0x10f6   :  { %v5198_v36 = vadd.f32 %v5197_v46, %v5195_v15  ;;  %v8852_v15 = vld [vmem:[%s9009_s7 + $0xd0] sm:$0xff]  }
0x10f7   :  { %v8853_v46 = vld [vmem:[%s9009_s7 + $0x90] sm:$0xff]  }
0x10f9   :  { %v10157_v33 = vld [vmem:[#allocation3 + $0x18] sm:$0xff] }
0x10fa   :  { %v5186_v34 = vadd.f32 %v5185_v32, %v10157_v33  ;;  %v5196_v35 = vmul.f32 %v10157_v33, %v10157_v33  ;;  %v8854_v32 = vld [vmem:[%s9009_s7 + $0x50] sm:$0xff]  }
0x10fc   :  { %v5187_v37 = vrot.slane %v5186_v34, 4  ;;  %v5199_v39 = vadd.f32 %v5198_v36, %v5196_v35  ;;  %v8856_v35 = vld [vmem:[%s9009_s7 + $0xc8] sm:$0xff]  }
0x10fd   :  { %v8857_v36 = vld [vmem:[%s9009_s7 + $0x88] sm:$0xff]  }
0x10fe   :  { %v5188_v42 = vadd.f32 %v5187_v37, %v5186_v34  ;;  %v5200_v43 = vrot.slane %v5199_v39, 4  ;;  %v8855_v34 = vld [vmem:[%s9009_s7 + $0x10] sm:$0xff]   ;;  %v8858_v37 = vld [vmem:[%s9009_s7 + $0x48] sm:$0xff]  }
0x1100   :  { %v5189_v44 = vrot.slane %v5188_v42, 2  ;;  %v5201_v6 = vadd.f32 %v5200_v43, %v5199_v39  ;;  %v8859_v39 = vld [vmem:[%s9009_s7 + $0x8] sm:$0xff]   ;;  %v8861_v43 = vld [vmem:[%s9009_s7 + $0x80] sm:$0xff]  }
0x1102   :  { %v5190_v38 = vadd.f32 %v5189_v44, %v5188_v42  ;;  %v5202_v11 = vrot.slane %v5201_v6, 2  ;;  %v8860_v42 = vld [vmem:[%s9009_s7 + $0xc0] sm:$0xff]  }
0x1103   :  { %v8862_v44 = vld [vmem:[%s9009_s7 + $0x40] sm:$0xff]  }
0x1104   :  { %v5191_v45 = vrot.slane %v5190_v38, 1  ;;  %v5203_v40 = vadd.f32 %v5202_v11, %v5201_v6  ;;  %v8863_v6 = vld [vmem:[%s9009_s7] sm:$0xff]  }
0x1106   :  { %v5192_v9 = vadd.f32 %v5191_v45, %v5190_v38  ;;  %v5204_v10 = vrot.slane %v5203_v40, 1  ;;  %v8864_v38 = vld [vmem:[%s9009_s7 + $0x178] sm:$0xff]  }
0x1108   :  { %8512 = vmatmul.mubr.f32.vlgmr.msra.gmra.mxu1 %v5192_v9  ;;  %v5205_v12 = vadd.f32 %v5204_v10, %v5203_v40 }
0x1109   :  { %8550 = vmatpush3.msra.mxu1 %v9985_v50  ;;  %8551 = vmatprep.mubr.msk.f32.mxu1 %vm8904_vm1, %v8902_v14 }
0x110a   :  { %8547 = vmatmul.mubr.f32.vlgmr.msra.gmra.mxu0 %v5205_v12  ;;  %8554 = vmatprep.subr.mxu1 %v8902_v14 }
0x110b   :  { %5884 = vmatprep.mubr.bf16.mxu0 %v9319_v62  ;;  %7702 = vmatpush3.bf16.msra.mxu0 %v8835_v29 }
0x110c   :  { %7703 = vmatprep.subr.bf16.mxu0 %v8838_v18 }
0x110f   :  { %7704 = vmatpush3.bf16.msra.mxu0 %v8839_v59 }
0x1110   :  { %7705 = vmatprep.subr.bf16.mxu0 %v8842_v19 }
0x1113   :  { %7706 = vmatpush3.bf16.msra.mxu0 %v8843_v20 }
0x1114   :  { %7707 = vmatprep.subr.bf16.mxu0 %v8846_v21 }
0x1117   :  { %7708 = vmatpush3.bf16.msra.mxu0 %v8847_v22 }
0x1118   :  { %7709 = vmatprep.subr.bf16.mxu0 %v8850_v23  ;;  %v8865_v23 = vld [vmem:[%s9009_s7 + $0x138] sm:$0xff]  }
0x111b   :  { %7710 = vmatpush3.bf16.msra.mxu0 %v8851_v24 }
0x111c   :  { %7711 = vmatprep.subr.bf16.mxu0 %v8854_v32 }
0x111f   :  { %7712 = vmatpush3.bf16.msra.mxu0 %v8855_v34 }
0x1120   :  { %7713 = vmatprep.subr.bf16.mxu0 %v8858_v37 }
0x1123   :  { %7714 = vmatpush3.bf16.msra.mxu0 %v8859_v39 }
0x1124   :  { %7715 = vmatprep.subr.bf16.mxu0 %v8862_v44 }
0x1127   :  { %7716 = vmatpush3.bf16.msra.mxu0 %v8863_v6 }
0x1128   :  { %8559 = vmatprep.subr.mxu0 %v8902_v14 }
0x11c8   :  { %v5288_v25 = vpop.f32.mrf.mxu1 }
0x11c9   :  { %v5292_v26 = vmul.f32 0.001953125, %v5288_v25  ;;  %v8866_v25 = vld [vmem:[%s9009_s7 + $0x170] sm:$0xff]  }
0x11ca   :  { %v8513_v27 = vpop.f32.mrf.mxu1  ;;  %v5359_v28 = vpop.f32.mrf.mxu0 }
0x11cb   :  { %v5364_v1 = vmul.f32 %v5292_v26, %v5292_v26  ;;  %v5363_v16 = vmul.f32 0.001953125, %v5359_v28  ;;  %v8869_v28 = vld [vmem:[%s9009_s7 + $0x128] sm:$0xff]  }
0x11cc   :  { %v8548_v30 = vpop.f32.mrf.mxu0 }
0x11cd   :  { %v5365_v17 = vsub.f32 %v5363_v16, %v5364_v1  ;;  %v8870_v16 = vld [vmem:[%s9009_s7 + $0x160] sm:$0xff]  }
0x11ce   :  { %v8871_v30 = vld [vmem:[%s9009_s7 + $0x120] sm:$0xff]  }
0x11cf   :  { %v5367_v31 = vadd.f32 1e-05, %v5365_v17  ;;  %v8872_v17 = vld [vmem:[%s9009_s7 + $0x158] sm:$0xff]  }
0x11d1   :  { %8892 = vrsqrt.f32 %v5367_v31  ;;  %v8873_v31 = vld [vmem:[%s9009_s7 + $0x118] sm:$0xff]  }
0x11de   :  { %v8893_v8 = vpop.eup %8892 }
0x11df   :  { %v5369_v49 = vmul.f32 %v8893_v8, %v5366_v2  ;;  %v8874_v2 = vld [vmem:[%s9009_s7 + $0x150] sm:$0xff]  }
0x11e0   :  { %v8875_v8 = vld [vmem:[%s9009_s7 + $0x110] sm:$0xff]  }
0x11e1   :  { %8552 = vmatmul.mubr.msk.f32.vlgmr.msra.gmra.mxu1 %vm1293_vm6, %v5369_v49  ;;  %v5371_v53 = vmul.f32 %v5369_v49, %v5292_v26  ;;  %v8867_v26 = vld [vmem:[%s9009_s7 + $0x130] sm:$0xff]   ;;  %v8876_v49 = vld [vmem:[%s9009_s7 + $0x148] sm:$0xff]  }
0x11e2   :  { %8555 = vmatpush3.msra.mxu1 %v9985_v50  ;;  %8556 = vmatprep.mubr.msk.f32.mxu1 %vm8904_vm1, %v8902_v14  ;;  %v8840_v50 = vld [vmem:[%s9009_s7 + $0xe8] sm:$0xff]  }
0x11e3   :  { %v5372_v54 = vsub.f32 %v5370_v52, %v5371_v53  ;;  %7673 = vmatprep.subr.bf16.mxu1 %v8832_v51  ;;  %v8878_v51 = vld [vmem:[%s9009_s7 + $0x140] sm:$0xff]   ;;  %v6158_v53 = vld [vmem:[%s8987_s3 + $0x38] sm:$0xff] }
0x11e4   :  { %v8879_v52 = vld [vmem:[%s9009_s7 + $0x100] sm:$0xff]  }
0x11e5   :  { %8557 = vmatmul.mubr.msk.f32.vlgmr.msra.gmra.mxu1 %vm1293_vm6, %v5372_v54  ;;  %v6156_v54 = vld [vmem:[%s8987_s3 + $0x28] sm:$0xff] }
0x11e6   :  { %5703 = vmatprep.mubr.bf16.mxu1 %v9319_v62  ;;  %7674 = vmatpush3.bf16.msra.mxu1 %v8833_v0  ;;  %v6157_v0 = vld [vmem:[%s8987_s3 + $0x30] sm:$0xff] }
0x11e7   :  { %7675 = vmatprep.subr.bf16.mxu1 %v8836_v56  ;;  %v6154_v56 = vld [vmem:[%s8987_s3 + $0x18] sm:$0xff] }
0x11ea   :  { %7676 = vmatpush3.bf16.msra.mxu1 %v8837_v61  ;;  %v6153_v61 = vld [vmem:[%s8987_s3 + $0x10] sm:$0xff] }
0x11eb   :  { %7677 = vmatprep.subr.bf16.mxu1 %v8840_v50  ;;  %v6152_v50 = vld [vmem:[%s8987_s3 + $0x8] sm:$0xff] }
0x11ee   :  { %7678 = vmatpush3.bf16.msra.mxu1 %v8841_v5  ;;  %v6151_v5 = vld [vmem:[%s8987_s3] sm:$0xff] }
0x11ef   :  { %7679 = vmatprep.subr.bf16.mxu1 %v8844_v7 }
0x11f2   :  { %7680 = vmatpush3.bf16.msra.mxu1 %v8845_v47 }
0x11f3   :  { %7681 = vmatprep.subr.bf16.mxu1 %v8848_v3 }
0x11f6   :  { %7682 = vmatpush3.bf16.msra.mxu1 %v8849_v60 }
0x11f7   :  { %7683 = vmatprep.subr.bf16.mxu1 %v8852_v15 }
0x11fa   :  { %7684 = vmatpush3.bf16.msra.mxu1 %v8853_v46 }
0x11fb   :  { %7685 = vmatprep.subr.bf16.mxu1 %v8856_v35 }
0x11fe   :  { %7686 = vmatpush3.bf16.msra.mxu1 %v8857_v36 }
0x11ff   :  { %7687 = vmatprep.subr.bf16.mxu1 %v8860_v42 }
0x1202   :  { %7688 = vmatpush3.bf16.msra.mxu1 %v8861_v43 }
0x1203   :  { %7729 = vmatprep.subr.bf16.mxu1 %v8864_v38 }
0x12a1   :  { %v5443_v11 = vpop.f32.mrf.mxu1 }
0x12a2   :  { %v5523_v45 = vrot.slane %v5443_v11, %v9102_v55 }
0x12a3   :  { %v8553_v40 = vpop.f32.mrf.mxu1 }
0x12a4   :  { %v5524_v10 = vmul.f32 %v5523_v45, %v10139_v48  ;;  %v5525_v12 = vmul.f32 %v5523_v45, %v10145_v57  ;;  %v5526_v21 = vmul.f32 %v5523_v45, %v10143_v41  ;;  %v5527_v22 = vmul.f32 %v5523_v45, %v10157_v33  ;;  %v8868_v41 = vld [vmem:[%s9009_s7 + $0x168] sm:$0xff]  }
0x12a5   :  { %v5516_v9 = vpop.f32.mrf.mxu1 }
0x12a6   :  { %v5531_v4 = vrot.slane %v5516_v9, %v9102_v55 }
0x12a7   :  { %v8558_v29 = vpop.f32.mrf.mxu1 }
0x12a8   :  { %v5532_v18 = vadd.f32 %v5531_v4, %v5524_v10  ;;  %v5533_v59 = vadd.f32 %v5531_v4, %v5525_v12  ;;  %v5534_v48 = vadd.f32 %v5531_v4, %v5526_v21  ;;  %v5535_v57 = vadd.f32 %v5531_v4, %v5527_v22 }
0x12aa   :  { %v5536_v19 = vmax.f32 %v5532_v18, 0.0  ;;  %v5537_v20 = vmax.f32 %v5533_v59, 0.0  ;;  %v5538_v33 = vmax.f32 %v5534_v48, 0.0  ;;  %v5539_v27 = vmax.f32 %v5535_v57, 0.0 }
0x12ac   :  { %v5540_v24 = vpack.c.bf16 %v5537_v20, %v5536_v19  ;;  %v5541_v1 = vpack.c.bf16 %v5539_v27, %v5538_v33 }
0x12ae   :  { %5704 = vmatmul.mubr.bf16.vlgmr.msra.gmra.mxu1 %v5540_v24  ;;  %5885 = vmatmul.mubr.bf16.vlgmr.msra.gmra.mxu0 %v5540_v24 }
0x12af   :  { %7730 = vmatpush3.bf16.msra.mxu1 %v8865_v23  ;;  %5711 = vmatprep.mubr.bf16.mxu1 %v9321_v63 }
0x12b0   :  { %5892 = vmatprep.mubr.bf16.mxu0 %v9321_v63  ;;  %7731 = vmatprep.subr.bf16.mxu1 %v8866_v25 }
0x12b1   :  { %8560 = vmatpush3.msra.mxu0 %v6158_v53 }
0x12b2   :  { %8561 = vmatprep.subr.mxu0 %v8902_v14 }
0x12b3   :  { %7732 = vmatpush3.bf16.msra.mxu1 %v8867_v26  ;;  %8562 = vmatpush3.msra.mxu0 %v6157_v0 }
0x12b4   :  { %7733 = vmatprep.subr.bf16.mxu1 %v8868_v41  ;;  %8563 = vmatprep.subr.mxu0 %v8902_v14 }
0x12b5   :  { %8564 = vmatpush3.msra.mxu0 %v6156_v54 }
0x12b6   :  { %5712 = vmatmul.mubr.bf16.gmra.mxu1 %v5541_v1  ;;  %5893 = vmatmul.mubr.bf16.gmra.mxu0 %v5541_v1 }
0x12b7   :  { %7734 = vmatpush3.bf16.msra.mxu1 %v8869_v28  ;;  %6062 = vmatprep.mubr.bf16.mxu1 %v9319_v62  ;;  %v8877_v62 = vld [vmem:[%s9009_s7 + $0x108] sm:$0xff]  }
0x12b8   :  { %7735 = vmatprep.subr.bf16.mxu1 %v8870_v16  ;;  %8575 = vmatprep.mubr.msk.f32.mxu0 %vm8904_vm1, %v8902_v14 }
0x12b9   :  { %8565 = vmatprep.subr.mxu0 %v8902_v14 }
0x12bb   :  { %7736 = vmatpush3.bf16.msra.mxu1 %v8871_v30 }
0x12bc   :  { %7737 = vmatprep.subr.bf16.mxu1 %v8872_v17 }
0x12bf   :  { %7738 = vmatpush3.bf16.msra.mxu1 %v8873_v31 }
0x12c0   :  { %7739 = vmatprep.subr.bf16.mxu1 %v8874_v2 }
0x12c3   :  { %7740 = vmatpush3.bf16.msra.mxu1 %v8875_v8 }
0x12c4   :  { %7741 = vmatprep.subr.bf16.mxu1 %v8876_v49 }
0x12c7   :  { %7742 = vmatpush3.bf16.msra.mxu1 %v8877_v62 }
0x12c8   :  { %7743 = vmatprep.subr.bf16.mxu1 %v8878_v51 }
0x12cb   :  { %7744 = vmatpush3.bf16.msra.mxu1 %v8879_v52 }
0x12cc   :  { %8578 = vmatprep.subr.mxu1 %v8902_v14 }
0x12ce   :  { %6063 = vmatmul.mubr.bf16.vlgmr.msra.gmra.mxu1 %v5540_v24 }
0x12cf   :  { %6070 = vmatprep.mubr.bf16.mxu1 %v9321_v63  ;;  %8579 = vmatpush3.msra.mxu1 %v6158_v53  ;;  %v6155_v63 = vld [vmem:[%s8987_s3 + $0x20] sm:$0xff]  ;;  %s8924_s3 = smov 23  }
0x12d0   :  { %8580 = vmatprep.subr.mxu1 %v8902_v14  ;;  %8566 = vmatpush3.msra.mxu0 %v6155_v63  ;;  %s6524_s9 = sld [smem:[%s10337_s0 + %s8924_s3]]  }
0x12d1   :  { %8581 = vmatpush3.msra.mxu1 %v6157_v0  ;;  %8567 = vmatprep.subr.mxu0 %v8902_v14 }
0x12d2   :  { %8582 = vmatprep.subr.mxu1 %v8902_v14  ;;  %8568 = vmatpush3.msra.mxu0 %v6154_v56 }
0x12d3   :  { %8583 = vmatpush3.msra.mxu1 %v6156_v54  ;;  %8569 = vmatprep.subr.mxu0 %v8902_v14 }
0x12d4   :  { %8584 = vmatprep.subr.mxu1 %v8902_v14  ;;  %8570 = vmatpush3.msra.mxu0 %v6153_v61 }
0x12d5   :  { %8585 = vmatpush3.msra.mxu1 %v6155_v63  ;;  %8571 = vmatprep.subr.mxu0 %v8902_v14 }
0x12d6   :  { %6071 = vmatmul.mubr.bf16.gmra.mxu1 %v5541_v1  ;;  %8586 = vmatprep.subr.mxu1 %v8902_v14 }
0x12d7   :  { %8594 = vmatprep.mubr.msk.f32.mxu1 %vm8904_vm1, %v8902_v14  ;;  %8587 = vmatpush3.msra.mxu1 %v6154_v56 }
0x12d8   :  { %8588 = vmatprep.subr.mxu1 %v8902_v14  ;;  %8572 = vmatpush3.msra.mxu0 %v6152_v50 }
0x12d9   :  { %8589 = vmatpush3.msra.mxu1 %v6153_v61  ;;  %8573 = vmatprep.subr.mxu0 %v8902_v14 }
0x12da   :  { %8590 = vmatprep.subr.mxu1 %v8902_v14  ;;  %8574 = vmatpush3.msra.mxu0 %v6151_v5 }
0x12db   :  { %8591 = vmatpush3.msra.mxu1 %v6152_v50  ;;  %8597 = vmatprep.subr.mxu0 %v8902_v14 }
0x12dc   :  { %8592 = vmatprep.subr.mxu1 %v8902_v14 }
0x12dd   :  { %8593 = vmatpush3.msra.mxu1 %v6151_v5 }
0x136e   :  { %v7689_v7 = vpop.f32.mrf.mxu1  ;;  %v7717_v47 = vpop.f32.mrf.mxu0 }
0x1370   :  { %v7690_v3 = vpop.f32.mrf.mxu1  ;;  %v7718_v60 = vpop.f32.mrf.mxu0 }
0x1371   :  { %v7691_v15 = vadd.f32 %v7690_v3, %v7689_v7  ;;  %v7719_v11 = vadd.f32 %v7718_v60, %v7717_v47 }
0x1372   :  { %v7692_v46 = vpop.f32.mrf.mxu1  ;;  %v7720_v32 = vpop.f32.mrf.mxu0 }
0x1373   :  { %5720 = vst.msk [vmem:[#allocation2] sm:$0xff] %vm170_vm0, %v7691_v15 }
0x1374   :  { %v7693_v34 = vpop.f32.mrf.mxu1  ;;  %v7721_v35 = vpop.f32.mrf.mxu0 }
0x1375   :  { %v7694_v36 = vadd.f32 %v7693_v34, %v7692_v46  ;;  %v7722_v45 = vadd.f32 %v7721_v35, %v7720_v32 }
0x1376   :  { %v7695_v37 = vpop.f32.mrf.mxu1  ;;  %v7723_v39 = vpop.f32.mrf.mxu0 }
0x1377   :  { %5721 = vst.msk [vmem:[#allocation2 + $0x8] sm:$0xff] %vm170_vm0, %v7694_v36 }
0x1378   :  { %v7696_v42 = vpop.f32.mrf.mxu1  ;;  %v7724_v44 = vpop.f32.mrf.mxu0 }
0x1379   :  { %v7697_v43 = vadd.f32 %v7696_v42, %v7695_v37  ;;  %v7725_v59 = vadd.f32 %v7724_v44, %v7723_v39 }
0x137a   :  { %v7698_v6 = vpop.f32.mrf.mxu1  ;;  %v7726_v10 = vpop.f32.mrf.mxu0 }
0x137b   :  { %5722 = vst.msk [vmem:[#allocation2 + $0x10] sm:$0xff] %vm170_vm0, %v7697_v43 }
0x137c   :  { %v7699_v38 = vpop.f32.mrf.mxu1  ;;  %v7727_v18 = vpop.f32.mrf.mxu0 }
0x137d   :  { %v7700_v40 = vadd.f32 %v7699_v38, %v7698_v6  ;;  %v7728_v19 = vadd.f32 %v7727_v18, %v7726_v10 }
0x137e   :  { %v6080_v9 = vld [vmem:[#allocation2 + $0x9] sm:$0x7f]  ;;  %v6079_v12 = vld [vmem:[#allocation2 + $0x1] sm:$0xff] }
0x137f   :  { %v6082_v4 = vadd.f32 %v7722_v45, %v6080_v9  ;;  %5723 = vst.msk [vmem:[#allocation2 + $0x18] sm:$0xff] %vm170_vm0, %v7700_v40  ;;  %v6081_v29 = vadd.f32 %v7719_v11, %v6079_v12 }
0x1381   :  { %6084 = vst.msk [vmem:[#allocation2 + $0x9] sm:$0x7f] %vm398_vm2, %v6082_v4 }
0x1382   :  { %6083 = vst.msk [vmem:[#allocation2 + $0x1] sm:$0xff] %vm170_vm0, %v6081_v29 }
0x1386   :  { %v6099_v20 = vld [vmem:[#allocation2 + $0x19] sm:$0x7f]  ;;  %v6098_v21 = vld [vmem:[#allocation2 + $0x11] sm:$0xff] }
0x1387   :  { %v6101_v22 = vadd.f32 %v7728_v19, %v6099_v20  ;;  %v6100_v23 = vadd.f32 %v7725_v59, %v6098_v21 }
0x1389   :  { %6103 = vst.msk [vmem:[#allocation2 + $0x19] sm:$0x7f] %vm398_vm2, %v6101_v22  ;;  %v6086_v1 = vld [vmem:[#allocation2 + $0x8] sm:$0x7f]  ;;  %v6085_v30 = vld [vmem:[#allocation2] sm:$0xff] }
0x138a   :  { %6102 = vst.msk [vmem:[#allocation2 + $0x11] sm:$0xff] %vm170_vm0, %v6100_v23 }
0x138e   :  { %v7745_v24 = vpop.f32.mrf.mxu1 }
0x1390   :  { %v7746_v25 = vpop.f32.mrf.mxu1 }
0x1391   :  { %v7747_v57 = vadd.f32 %v7746_v25, %v7745_v24  ;;  %v6105_v0 = vld [vmem:[#allocation2 + $0x18] sm:$0x7f]  ;;  %v6104_v54 = vld [vmem:[#allocation2 + $0x10] sm:$0xff]  ;;  %v6316_v24 = vld [vmem:[%s9071_s11] sm:$0xf]  ;;  %s8925_s11 = smov 24  }
0x1392   :  { %v7748_v48 = vpop.f32.mrf.mxu1  ;;  %s6525_s12 = sld [smem:[%s10337_s0 + %s8925_s11]]  }
0x1393   :  { %v6089_v27 = vrot.slane %v7747_v57, 1 }
0x1394   :  { %v7749_v26 = vpop.f32.mrf.mxu1 }
0x1395   :  { %v7750_v41 = vadd.f32 %v7749_v26, %v7748_v48 }
0x1396   :  { %v7751_v33 = vpop.f32.mrf.mxu1 }
0x1397   :  { %v6090_v28 = vrot.slane %v7750_v41, 1 }
0x1398   :  { %v7752_v16 = vpop.f32.mrf.mxu1 }
0x1399   :  { %v6091_v17 = vsel %vm404_vm3, %v6089_v27, %v6090_v28  ;;  %v6095_v31 = vadd.f32 %v6090_v28, %v6086_v1  ;;  %v7753_v49 = vadd.f32 %v7752_v16, %v7751_v33  ;;  %v6309_v16 = vld [vmem:[%s6524_s9] sm:$0x1] }
0x139a   :  { %v6094_v2 = vadd.f32 %v6091_v17, %v6085_v30  ;;  %v7754_v8 = vpop.f32.mrf.mxu1 }
0x139b   :  { %6097 = vst.msk [vmem:[#allocation2 + $0x8] sm:$0x7f] %vm398_vm2, %v6095_v31  ;;  %v6108_v52 = vrot.slane %v7753_v49, 1  ;;  %v6313_v31 = vld [vmem:[%s6525_s12] sm:$0x1] }
0x139c   :  { %6096 = vst.msk [vmem:[#allocation2] sm:$0xff] %vm170_vm0, %v6094_v2  ;;  %v7755_v62 = vpop.f32.mrf.mxu1 }
0x139d   :  { %v7756_v51 = vadd.f32 %v7755_v62, %v7754_v8 }
0x139f   :  { %v6109_v53 = vrot.slane %v7756_v51, 1 }
0x13a1   :  { %v6110_v63 = vsel %vm404_vm3, %v6108_v52, %v6109_v53  ;;  %v6114_v56 = vadd.f32 %v6109_v53, %v6105_v0 }
0x13a2   :  { %v6113_v61 = vadd.f32 %v6110_v63, %v6104_v54  ;;  %v10281_v5 = vld [vmem:[#allocation2 + $0x8] sm:$0xff] }
0x13a3   :  { %6116 = vst.msk [vmem:[#allocation2 + $0x18] sm:$0x7f] %vm398_vm2, %v6114_v56  ;;  %v10279_v50 = vld [vmem:[#allocation2] sm:$0xff]  ;;  %v6135_v47 = vmul.f32 %v10281_v5, %v10281_v5  ;;  %v6122_v60 = vsel %vm170_vm0, %v10281_v5, 0.0 }
0x13a4   :  { %6115 = vst.msk [vmem:[#allocation2 + $0x10] sm:$0xff] %vm170_vm0, %v6113_v61  ;;  %v6134_v7 = vmul.f32 %v10279_v50, %v10279_v50  ;;  %v6121_v3 = vsel %vm170_vm0, %v10279_v50, 0.0 }
0x13a5   :  { %v6139_v32 = vsel %vm170_vm0, %v6135_v47, 0.0  ;;  %v6123_v35 = vadd.f32 %v6122_v60, %v6121_v3  ;;  %v6487_v60 = vunpack.c.h.bf16 %v9110_v13 }
0x13a6   :  { %v6138_v46 = vsel %vm170_vm0, %v6134_v7, 0.0 }
0x13a7   :  { %v6140_v43 = vadd.f32 %v6139_v32, %v6138_v46 }
0x13aa   :  { %v10292_v15 = vld [vmem:[#allocation2 + $0x18] sm:$0xff] }
0x13ab   :  { %v6119_v34 = vld [vmem:[#allocation2 + $0x10] sm:$0xff]  ;;  %v6137_v39 = vmul.f32 %v10292_v15, %v10292_v15  ;;  %v6126_v44 = vsel %vm170_vm0, %v10292_v15, 0.0 }
0x13ac   :  { %v6124_v36 = vsel %vm170_vm0, %v6119_v34, 0.0  ;;  %v6136_v37 = vmul.f32 %v6119_v34, %v6119_v34 }
0x13ad   :  { %v6125_v42 = vadd.f32 %v6124_v36, %v6123_v35  ;;  %v6143_v45 = vsel %vm170_vm0, %v6137_v39, 0.0 }
0x13ae   :  { %v6141_v6 = vsel %vm170_vm0, %v6136_v37, 0.0 }
0x13af   :  { %v6127_v38 = vadd.f32 %v6126_v44, %v6125_v42  ;;  %v6142_v11 = vadd.f32 %v6141_v6, %v6140_v43 }
0x13b1   :  { %v6128_v40 = vrot.slane %v6127_v38, 4  ;;  %v6144_v9 = vadd.f32 %v6143_v45, %v6142_v11 }
0x13b3   :  { %v6129_v10 = vadd.f32 %v6128_v40, %v6127_v38  ;;  %v6145_v12 = vrot.slane %v6144_v9, 4 }
0x13b5   :  { %v6130_v4 = vrot.slane %v6129_v10, 2  ;;  %v6146_v29 = vadd.f32 %v6145_v12, %v6144_v9 }
0x13b7   :  { %v6131_v18 = vadd.f32 %v6130_v4, %v6129_v10  ;;  %v6147_v59 = vrot.slane %v6146_v29, 2 }
0x13b9   :  { %v6132_v19 = vrot.slane %v6131_v18, 1  ;;  %v6148_v20 = vadd.f32 %v6147_v59, %v6146_v29 }
0x13bb   :  { %v6133_v21 = vadd.f32 %v6132_v19, %v6131_v18  ;;  %v6149_v22 = vrot.slane %v6148_v20, 1 }
0x13bd   :  { %8576 = vmatmul.mubr.msk.f32.vlgmr.msra.gmra.mxu0 %vm170_vm0, %v6133_v21  ;;  %v6150_v23 = vadd.f32 %v6149_v22, %v6148_v20 }
0x13be   :  { %8599 = vmatprep.mubr.msk.f32.mxu0 %vm8904_vm1, %v8902_v14  ;;  %8598 = vmatpush3.msk.msra.mxu0 %vm637_vm4, %v6316_v24 }
0x13bf   :  { %8595 = vmatmul.mubr.msk.f32.vlgmr.msra.gmra.mxu1 %vm170_vm0, %v6150_v23  ;;  %8602 = vmatprep.subr.mxu0 %v8902_v14 }
0x147d   :  { %v6228_v25 = vpop.f32.mrf.mxu0 }
0x147e   :  { %v6232_v48 = vmul.f32 0.001953125, %v6228_v25 }
0x147f   :  { %v8577_v57 = vpop.f32.mrf.mxu0  ;;  %v6302_v26 = vpop.f32.mrf.mxu1 }
0x1480   :  { %v6307_v41 = vmul.f32 %v6232_v48, %v6232_v48  ;;  %v6306_v33 = vmul.f32 0.001953125, %v6302_v26 }
0x1481   :  { %v8596_v27 = vpop.f32.mrf.mxu1 }
0x1482   :  { %v6308_v28 = vsub.f32 %v6306_v33, %v6307_v41 }
0x1484   :  { %v6310_v1 = vadd.f32 1e-05, %v6308_v28 }
0x1486   :  { %8894 = vrsqrt.f32 %v6310_v1 }
0x1493   :  { %v8895_v30 = vpop.eup %8894 }
0x1494   :  { %v6312_v17 = vmul.f32 %v8895_v30, %v6309_v16 }
0x1496   :  { %8600 = vmatmul.mubr.msk.f32.vlgmr.msra.gmra.mxu0 %vm633_vm5, %v6312_v17  ;;  %v6314_v2 = vmul.f32 %v6312_v17, %v6232_v48 }
0x1497   :  { %8603 = vmatpush3.msk.msra.mxu0 %vm637_vm4, %v6316_v24  ;;  %8604 = vmatprep.mubr.msk.f32.mxu0 %vm8904_vm1, %v8902_v14 }
0x1498   :  { %v6315_v8 = vsub.f32 %v6313_v31, %v6314_v2 }
0x149a   :  { %8605 = vmatmul.mubr.msk.f32.vlgmr.msra.gmra.mxu0 %vm633_vm5, %v6315_v8 }
0x1556   :  { %v6389_v49 = vpop.f32.mrf.mxu0 }
0x1557   :  { %v6469_v62 = vrot.slane %v6389_v49, %v9102_v55 }
0x1558   :  { %v8601_v51 = vpop.f32.mrf.mxu0 }
0x1559   :  { %v6470_v52 = vmul.f32 %v6469_v62, %v10279_v50  ;;  %v6471_v0 = vmul.f32 %v6469_v62, %v10281_v5  ;;  %v6472_v54 = vmul.f32 %v6469_v62, %v6119_v34  ;;  %v6473_v63 = vmul.f32 %v6469_v62, %v10292_v15 }
0x155a   :  { %v6462_v53 = vpop.f32.mrf.mxu0  ;;  %v6486_v50 = vunpack.c.l.bf16 %v9110_v13  ;;  %v6488_v5 = vunpack.c.l.bf16 %v9112_v58  ;;  %v6489_v15 = vunpack.c.h.bf16 %v9112_v58 }
0x155b   :  { %v6477_v14 = vrot.slane %v6462_v53, %v9102_v55 }
0x155c   :  { %v8606_v56 = vpop.f32.mrf.mxu0 }
0x155d   :  { %v6478_v61 = vadd.f32 %v6477_v14, %v6470_v52  ;;  %v6479_v7 = vadd.f32 %v6477_v14, %v6471_v0  ;;  %v6480_v47 = vadd.f32 %v6477_v14, %v6472_v54  ;;  %v6481_v3 = vadd.f32 %v6477_v14, %v6473_v63 }
0x155f   :  { %v6482_v46 = vmax.f32 %v6478_v61, 0.0  ;;  %v6483_v32 = vmax.f32 %v6479_v7, 0.0  ;;  %v6484_v34 = vmax.f32 %v6480_v47, 0.0  ;;  %v6485_v35 = vmax.f32 %v6481_v3, 0.0 }
0x1561   :  { %v6490_v36 = vadd.f32 %v6486_v50, %v6482_v46  ;;  %v6491_v37 = vadd.f32 %v6487_v60, %v6483_v32  ;;  %v6492_v55 = vadd.f32 %v6488_v5, %v6484_v34  ;;  %v6493_v39 = vadd.f32 %v6489_v15, %v6485_v35 }
0x1563   :  { %6494 = vst.msk [vmem:[%s6530_s18] sm:$0xff] %vm170_vm0, %v6490_v36  ;;  %6495 = vst.msk [vmem:[%s6530_s18 + $0x8] sm:$0xff] %vm170_vm0, %v6491_v37 }
0x1564   :  { %6496 = vst.msk [vmem:[%s6530_s18 + $0x10] sm:$0xff] %vm170_vm0, %v6492_v55  ;;  %6497 = vst.msk [vmem:[%s6530_s18 + $0x18] sm:$0xff] %vm170_vm0, %v6493_v39 }

</bundles_post_ra>
